<compile_context>
chip_gen: v6e
topology: v6e:2x2x1
jax: 0.10.0
libtpu: 0.0.40
codegen_flags: <defaults>
</compile_context>

<pallas_src>
import numpy as np
import jax
import jax.numpy as jnp
from jax import lax
from jax.experimental import pallas as pl
from jax.experimental.pallas import tpu as pltpu

# ----------------------------- hyper-parameters -----------------------------
Z_DIM = 64            # settings['z_dim'] (small stand-in for the 256 default)
MAP_LAYERS = 8        # mapping network depth
FMAPS = 32            # feature maps per synthesis layer
LEVEL = 2             # PGGAN resolution level -> output 8x8
RES = 4 * (2 ** (LEVEL - 1))          # 8
RES_LO = RES // 2                     # 4
HW = RES * RES                        # 64
HW_LO = RES_LO * RES_LO               # 16
N_W_LAYERS = 2 * LEVEL
LRELU = 0.2
TRUNC_W_LAYERS = 8
TRUNC_W_PSI = 0.8


# ------------------------------ kernel helpers ------------------------------
def _lrelu(x):
    return jnp.where(x >= 0, x, LRELU * x)


def _adain(x, styles, layer_idx):
    """Instance norm over HW + style affine + LeakyReLU.  x: [B, HW, C] f32."""
    c = x.shape[-1]
    s = styles[:, layer_idx * 2 * c:(layer_idx + 1) * 2 * c]        # [B, 2C]
    scale = s[:, :c][:, None, :]                                    # [B, 1, C]
    bias = s[:, c:][:, None, :]
    mu = jnp.mean(x, axis=1, keepdims=True)
    var = jnp.mean((x - mu) ** 2, axis=1, keepdims=True)
    xn = (x - mu) * lax.rsqrt(var + 1e-8)
    return _lrelu(scale * xn + bias)


def _conv3x3(xpad, w_bf16, b, hs, ws):
    """3x3 'same' conv as one im2col matmul.

    xpad:   [B, hs+2, ws+2, Cin] f32 (zero border, written interior)
    w_bf16: [9*Cin, Cout] bf16 (tap-major dy, dx, ci -- matches concat order)
    b:      [1, Cout] f32
    returns [B, hs*ws, Cout] f32
    """
    bsz, _, _, cin = xpad.shape
    cout = w_bf16.shape[-1]
    taps = [xpad[:, dy:dy + hs, dx:dx + ws, :]
            for dy in range(3) for dx in range(3)]
    patches = jnp.concatenate(taps, axis=-1)                        # [B,hs,ws,9C]
    patches = patches.reshape(bsz * hs * ws, 9 * cin).astype(jnp.bfloat16)
    y = jnp.dot(patches, w_bf16, preferred_element_type=jnp.float32) + b
    return y.reshape(bsz, hs * ws, cout)


# --------------------------------- kernel -----------------------------------
def generator_kernel(alpha_ref,                       # SMEM  [1]
                     z_ref,                           # VMEM  [B, Z] f32
                     map_w_ref, map_b_ref,            # [L,Z,Z] bf16, [L,1,Z] f32
                     w_avg_ref,                       # [1, Z] f32
                     const_ref,                       # [1, HW_LO, C] f32
                     c1w_ref, c1b_ref,                # [9C,C] bf16, [1,C] f32
                     c2aw_ref, c2ab_ref,              # [9C,C] bf16, [1,C] f32
                     c2bw_ref, c2bb_ref,              # [9C,C] bf16, [1,C] f32
                     adain_a_ref, adain_b_ref,        # [Z, 4*2C] bf16, [1, 4*2C] f32
                     up_ref,                          # [B*HW, B*HW_LO] f32 (0/1)
                     rgb1_wt_ref, rgb1_b_ref,         # [3,C] f32, [3,1] f32
                     rgb2_wt_ref, rgb2_b_ref,         # [3,C] f32, [3,1] f32
                     out_ref,                         # [3, B*HW] f32
                     pad_ref):                        # VMEM scratch [B,RES+2,RES+2,C] f32
    bsz = z_ref.shape[0]

    # ---- LatentTransformation: pixel-norm + 8x (FC -> LeakyReLU) -------------
    x = z_ref[...]
    x = x * lax.rsqrt(jnp.mean(x * x, axis=-1, keepdims=True) + 1e-8)
    for layer in range(MAP_LAYERS):
        x = _lrelu(jnp.dot(x.astype(jnp.bfloat16), map_w_ref[layer],
                           preferred_element_type=jnp.float32) + map_b_ref[layer])
    w_lat = x                                                       # [B, Z] f32

    # ---- truncation trick (eval mode) + all AdaIN styles in ONE matmul -------
    # Reference truncates layers >= trunc_w_layers; statically dead at LEVEL=2.
    if N_W_LAYERS > TRUNC_W_LAYERS:
        w_avg = w_avg_ref[...]
        w_tr = w_avg + TRUNC_W_PSI * (w_lat - w_avg)
        split = TRUNC_W_LAYERS * 2 * FMAPS
        st_lo = jnp.dot(w_lat.astype(jnp.bfloat16), adain_a_ref[:, :split],
                        preferred_element_type=jnp.float32)
        st_hi = jnp.dot(w_tr.astype(jnp.bfloat16), adain_a_ref[:, split:],
                        preferred_element_type=jnp.float32)
        styles = jnp.concatenate([st_lo, st_hi], axis=-1) + adain_b_ref[...]
    else:
        styles = (jnp.dot(w_lat.astype(jnp.bfloat16), adain_a_ref[...],
                          preferred_element_type=jnp.float32)
                  + adain_b_ref[...])                               # [B, 4*2C]

    # ---- zero pad scratch ONCE -----------------------------------------------
    # Invariant: every later write targets only interior pixels; the 1-px
    # border is never written, so it stays zero ('same' padding for all convs).
    pad_ref[...] = jnp.zeros_like(pad_ref)

    # ---- SynthesisModule level-1 block (4x4) ---------------------------------
    x0 = jnp.broadcast_to(const_ref[...], (bsz, HW_LO, FMAPS))
    x0 = _adain(x0, styles, 0)                                      # [B,16,C]
    pad_ref[:, 1:RES_LO + 1, 1:RES_LO + 1, :] = x0.reshape(bsz, RES_LO, RES_LO, FMAPS)
    x1 = _conv3x3(pad_ref[:, :RES_LO + 2, :RES_LO + 2, :],
                  c1w_ref[...], c1b_ref[...], RES_LO, RES_LO)
    x1 = _adain(x1, styles, 1)                                      # [B,16,C]

    # ---- 2x nearest-neighbour upsample as ONE matmul + ONE store -------------
    # up_ref is a constant block-diagonal 0/1 matrix mapping [B*HW_LO] -> [B*HW].
    x1up_2d = jnp.dot(up_ref[...], x1.reshape(bsz * HW_LO, FMAPS),
                      preferred_element_type=jnp.float32)           # [B*HW, C]
    pad_ref[:, 1:RES + 1, 1:RES + 1, :] = x1up_2d.reshape(bsz, RES, RES, FMAPS)

    # ---- level-2 block (8x8) -------------------------------------------------
    x2 = _conv3x3(pad_ref[...], c2aw_ref[...], c2ab_ref[...], RES, RES)
    x2 = _adain(x2, styles, 2)                                      # [B,64,C]
    pad_ref[:, 1:RES + 1, 1:RES + 1, :] = x2.reshape(bsz, RES, RES, FMAPS)
    x2 = _conv3x3(pad_ref[...], c2bw_ref[...], c2bb_ref[...], RES, RES)
    x2 = _adain(x2, styles, 3)                                      # [B,64,C]

    # ---- toRGB (both levels) + PGGAN alpha blend, fused, lane-dense ----------
    # upsample(toRGB_lo(x1)) == toRGB_lo(upsample(x1)) for a 1x1 conv, so x1up
    # is reused.  dot_general contracts the minor dims: no explicit transpose.
    a = alpha_ref[0]
    x_cat = jnp.concatenate([x2.reshape(bsz * HW, FMAPS), x1up_2d], axis=-1)    # [B*HW, 2C]
    w_cat = jnp.concatenate([a * rgb2_wt_ref[...],
                             (1.0 - a) * rgb1_wt_ref[...]], axis=-1)            # [3, 2C]
    b_cat = a * rgb2_b_ref[...] + (1.0 - a) * rgb1_b_ref[...]                   # [3, 1]
    out_ref[...] = lax.dot_general(w_cat, x_cat, (((1,), (1,)), ((), ())),
                                   preferred_element_type=jnp.float32) + b_cat


# ------------------------------- parameters ---------------------------------
def init_params(key):
    ks = jax.random.split(key, 12)
    p = {}
    p['map_w'] = (jax.random.normal(ks[0], (MAP_LAYERS, Z_DIM, Z_DIM), jnp.float32)
                  / jnp.sqrt(Z_DIM)).astype(jnp.bfloat16)
    p['map_b'] = jnp.zeros((MAP_LAYERS, 1, Z_DIM), jnp.float32)
    p['const'] = jax.random.normal(ks[1], (1, HW_LO, FMAPS), jnp.float32)

    # conv weights pre-flattened for im2col: [3,3,Cin,Cout] -> [9*Cin, Cout], bf16
    def conv_w(k):
        w = jax.random.normal(k, (3, 3, FMAPS, FMAPS), jnp.float32) * 0.05
        return w.reshape(9 * FMAPS, FMAPS).astype(jnp.bfloat16)

    p['conv1_w'] = conv_w(ks[2]);  p['conv1_b'] = jnp.zeros((1, FMAPS), jnp.float32)
    p['conv2a_w'] = conv_w(ks[3]); p['conv2a_b'] = jnp.zeros((1, FMAPS), jnp.float32)
    p['conv2b_w'] = conv_w(ks[4]); p['conv2b_b'] = jnp.zeros((1, FMAPS), jnp.float32)

    # AdaIN style affines stacked into one [Z, n_layers*2*FMAPS] matrix
    # (per-layer block = [scale | bias], scale init 1, bias init 0).
    p['adain_A'] = jnp.concatenate(
        [jax.random.normal(ks[5 + i], (Z_DIM, 2 * FMAPS), jnp.float32) * 0.05
         for i in range(N_W_LAYERS)], axis=-1).astype(jnp.bfloat16)
    p['adain_b'] = jnp.tile(
        jnp.concatenate([jnp.ones((1, FMAPS), jnp.float32),
                         jnp.zeros((1, FMAPS), jnp.float32)], axis=-1),
        (1, N_W_LAYERS))

    # toRGB weights stored transposed [3, C] so the fused blend matmul is direct.
    p['rgb1_wT'] = jax.random.normal(ks[9], (3, FMAPS), jnp.float32) * 0.05
    p['rgb1_b'] = jnp.zeros((3, 1), jnp.float32)
    p['rgb2_wT'] = jax.random.normal(ks[10], (3, FMAPS), jnp.float32) * 0.05
    p['rgb2_b'] = jnp.zeros((3, 1), jnp.float32)

    p['w_average'] = jnp.zeros((1, Z_DIM), jnp.float32)   # register_buffer zeros
    return p


def _upsample_block_matrix(bsz):
    """Constant 0/1 matrix: [B*HW, B*HW_LO], block-diag of the 2x NN upsample map."""
    u = np.zeros((HW, HW_LO), np.float32)
    for y in range(RES):
        for x in range(RES):
            u[y * RES + x, (y // 2) * RES_LO + (x // 2)] = 1.0
    return jnp.asarray(np.kron(np.eye(bsz, dtype=np.float32), u))


# -------------------------------- forward -----------------------------------
def generator_forward(params, z, labels, alpha):
    # TODO(synk): labels are unused (label_size=1 / use_labels=False path).
    del labels
    bsz = z.shape[0]
    z2 = z.reshape(bsz, Z_DIM)
    alpha_arr = jnp.asarray(alpha, jnp.float32).reshape(1)
    up_mat = _upsample_block_matrix(bsz)    # trace-time constant (bsz is static)

    vmem = pl.BlockSpec(memory_space=pltpu.MemorySpace.VMEM)
    smem = pl.BlockSpec(memory_space=pltpu.MemorySpace.SMEM)

    out = pl.pallas_call(
        generator_kernel,
        out_shape=jax.ShapeDtypeStruct((3, bsz * HW), jnp.float32),
        in_specs=[smem] + [vmem] * 18,
        out_specs=vmem,
        scratch_shapes=[pltpu.VMEM((bsz, RES + 2, RES + 2, FMAPS), jnp.float32)],
    )(alpha_arr, z2,
      params['map_w'], params['map_b'], params['w_average'], params['const'],
      params['conv1_w'], params['conv1_b'],
      params['conv2a_w'], params['conv2a_b'],
      params['conv2b_w'], params['conv2b_b'],
      params['adain_A'], params['adain_b'], up_mat,
      params['rgb1_wT'], params['rgb1_b'],
      params['rgb2_wT'], params['rgb2_b'])

    # Kernel emits lane-dense [3, B*H*W]; tiny host-side transpose to NCHW.
    return jnp.transpose(out.reshape(3, bsz, RES, RES), (1, 0, 2, 3))


# ---------------------------------- main -------------------------------------
if __name__ == "__main__":
    key = jax.random.PRNGKey(0)
    k_param, k_z = jax.random.split(key)
    params = init_params(k_param)

    batch = 2
    z = jax.random.normal(k_z, (batch, Z_DIM, 1, 1), jnp.float32)   # torch-style input
    labels = jnp.zeros((batch,), jnp.int32)
    alpha = jnp.float32(0.5)    # traced argument: no recompile per fade-in step

    fwd = jax.jit(lambda zz, aa: generator_forward(params, zz, labels, aa))
    fakes = fwd(z, alpha)
    jax.block_until_ready(fakes)

    assert fakes.shape == (batch, 3, RES, RES)
    assert bool(jnp.all(jnp.isfinite(fakes)))
    print("KERNEL_OK")
</pallas_src>

<mosaic_0001>
module attributes {stable_mosaic.version = 11 : i64} {
  func.func @generator_kernel(%arg0: memref<1xf32, #tpu.memory_space<smem>>, %arg1: memref<2x64xf32, #tpu.memory_space<vmem>>, %arg2: memref<8x64x64xbf16, #tpu.memory_space<vmem>>, %arg3: memref<8x1x64xf32, #tpu.memory_space<vmem>>, %arg4: memref<1x64xf32, #tpu.memory_space<vmem>>, %arg5: memref<1x16x32xf32, #tpu.memory_space<vmem>>, %arg6: memref<288x32xbf16, #tpu.memory_space<vmem>>, %arg7: memref<1x32xf32, #tpu.memory_space<vmem>>, %arg8: memref<288x32xbf16, #tpu.memory_space<vmem>>, %arg9: memref<1x32xf32, #tpu.memory_space<vmem>>, %arg10: memref<288x32xbf16, #tpu.memory_space<vmem>>, %arg11: memref<1x32xf32, #tpu.memory_space<vmem>>, %arg12: memref<64x256xbf16, #tpu.memory_space<vmem>>, %arg13: memref<1x256xf32, #tpu.memory_space<vmem>>, %arg14: memref<128x32xf32, #tpu.memory_space<vmem>>, %arg15: memref<3x32xf32, #tpu.memory_space<vmem>>, %arg16: memref<3x1xf32, #tpu.memory_space<vmem>>, %arg17: memref<3x32xf32, #tpu.memory_space<vmem>>, %arg18: memref<3x1xf32, #tpu.memory_space<vmem>>, %arg19: memref<3x128xf32, #tpu.memory_space<vmem>>, %arg20: memref<2x10x10x32xf32, #tpu.memory_space<vmem>>) attributes {dimension_semantics = [], scalar_prefetch = 0 : i64, scratch_operands = 1 : i64, tpu.core_type = #tpu.core_type<tc>} {
    %c0 = arith.constant 0 : index
    %c0_0 = arith.constant 0 : index
    %0 = vector.load %arg1[%c0, %c0_0] : memref<2x64xf32, #tpu.memory_space<vmem>>, vector<2x64xf32>
    %1 = arith.mulf %0, %0 : vector<2x64xf32>
    %cst = arith.constant dense<0.000000e+00> : vector<2xf32>
    %2 = vector.multi_reduction <add>, %1, %cst [1] : vector<2x64xf32> to vector<2xf32>
    %3 = vector.shape_cast %2 : vector<2xf32> to vector<2x1xf32>
    %cst_1 = arith.constant 6.400000e+01 : f32
    %4 = vector.broadcast %cst_1 : f32 to vector<2x1xf32>
    %5 = arith.divf %3, %4 : vector<2x1xf32>
    %cst_2 = arith.constant 9.99999993E-9 : f32
    %6 = vector.broadcast %cst_2 : f32 to vector<2x1xf32>
    %7 = arith.addf %5, %6 : vector<2x1xf32>
    %8 = math.rsqrt %7 : vector<2x1xf32>
    %9 = vector.broadcast %8 : vector<2x1xf32> to vector<2x64xf32>
    %10 = arith.mulf %0, %9 : vector<2x64xf32>
    %11 = arith.truncf %10 : vector<2x64xf32> to vector<2x64xbf16>
    %c0_3 = arith.constant 0 : index
    %c0_4 = arith.constant 0 : index
    %c0_5 = arith.constant 0 : index
    %12 = vector.load %arg2[%c0_3, %c0_4, %c0_5] : memref<8x64x64xbf16, #tpu.memory_space<vmem>>, vector<1x64x64xbf16>
    %13 = vector.shape_cast %12 : vector<1x64x64xbf16> to vector<64x64xbf16>
    %cst_6 = arith.constant dense<0.000000e+00> : vector<2x64xf32>
    %14 = tpu.matmul %11, %13, %cst_6 {dimension_numbers = #tpu.dot_dimension_numbers<[1], [0], [0], [1], [0, 0, 1, 1], [], []>} : vector<2x64xbf16>, vector<64x64xbf16>, vector<2x64xf32> -> vector<2x64xf32>
    %c0_7 = arith.constant 0 : index
    %c0_8 = arith.constant 0 : index
    %c0_9 = arith.constant 0 : index
    %15 = vector.load %arg3[%c0_7, %c0_8, %c0_9] : memref<8x1x64xf32, #tpu.memory_space<vmem>>, vector<1x1x64xf32>
    %16 = vector.shape_cast %15 : vector<1x1x64xf32> to vector<1x64xf32>
    %17 = vector.broadcast %16 : vector<1x64xf32> to vector<2x64xf32>
    %18 = arith.addf %14, %17 : vector<2x64xf32>
    %cst_10 = arith.constant 0.000000e+00 : f32
    %19 = vector.broadcast %cst_10 : f32 to vector<2x64xf32>
    %20 = arith.cmpf oge, %18, %19 : vector<2x64xf32>
    %cst_11 = arith.constant 2.000000e-01 : f32
    %21 = vector.broadcast %cst_11 : f32 to vector<2x64xf32>
    %22 = arith.mulf %21, %18 : vector<2x64xf32>
    %23 = arith.select %20, %18, %22 : vector<2x64xi1>, vector<2x64xf32>
    %24 = arith.truncf %23 : vector<2x64xf32> to vector<2x64xbf16>
    %c1 = arith.constant 1 : index
    %c0_12 = arith.constant 0 : index
    %c0_13 = arith.constant 0 : index
    %25 = vector.load %arg2[%c1, %c0_12, %c0_13] : memref<8x64x64xbf16, #tpu.memory_space<vmem>>, vector<1x64x64xbf16>
    %26 = vector.shape_cast %25 : vector<1x64x64xbf16> to vector<64x64xbf16>
    %cst_14 = arith.constant dense<0.000000e+00> : vector<2x64xf32>
    %27 = tpu.matmul %24, %26, %cst_14 {dimension_numbers = #tpu.dot_dimension_numbers<[1], [0], [0], [1], [0, 0, 1, 1], [], []>} : vector<2x64xbf16>, vector<64x64xbf16>, vector<2x64xf32> -> vector<2x64xf32>
    %c1_15 = arith.constant 1 : index
    %c0_16 = arith.constant 0 : index
    %c0_17 = arith.constant 0 : index
    %28 = vector.load %arg3[%c1_15, %c0_16, %c0_17] : memref<8x1x64xf32, #tpu.memory_space<vmem>>, vector<1x1x64xf32>
    %29 = vector.shape_cast %28 : vector<1x1x64xf32> to vector<1x64xf32>
    %30 = vector.broadcast %29 : vector<1x64xf32> to vector<2x64xf32>
    %31 = arith.addf %27, %30 : vector<2x64xf32>
    %cst_18 = arith.constant 0.000000e+00 : f32
    %32 = vector.broadcast %cst_18 : f32 to vector<2x64xf32>
    %33 = arith.cmpf oge, %31, %32 : vector<2x64xf32>
    %cst_19 = arith.constant 2.000000e-01 : f32
    %34 = vector.broadcast %cst_19 : f32 to vector<2x64xf32>
    %35 = arith.mulf %34, %31 : vector<2x64xf32>
    %36 = arith.select %33, %31, %35 : vector<2x64xi1>, vector<2x64xf32>
    %37 = arith.truncf %36 : vector<2x64xf32> to vector<2x64xbf16>
    %c2 = arith.constant 2 : index
    %c0_20 = arith.constant 0 : index
    %c0_21 = arith.constant 0 : index
    %38 = vector.load %arg2[%c2, %c0_20, %c0_21] : memref<8x64x64xbf16, #tpu.memory_space<vmem>>, vector<1x64x64xbf16>
    %39 = vector.shape_cast %38 : vector<1x64x64xbf16> to vector<64x64xbf16>
    %cst_22 = arith.constant dense<0.000000e+00> : vector<2x64xf32>
    %40 = tpu.matmul %37, %39, %cst_22 {dimension_numbers = #tpu.dot_dimension_numbers<[1], [0], [0], [1], [0, 0, 1, 1], [], []>} : vector<2x64xbf16>, vector<64x64xbf16>, vector<2x64xf32> -> vector<2x64xf32>
    %c2_23 = arith.constant 2 : index
    %c0_24 = arith.constant 0 : index
    %c0_25 = arith.constant 0 : index
    %41 = vector.load %arg3[%c2_23, %c0_24, %c0_25] : memref<8x1x64xf32, #tpu.memory_space<vmem>>, vector<1x1x64xf32>
    %42 = vector.shape_cast %41 : vector<1x1x64xf32> to vector<1x64xf32>
    %43 = vector.broadcast %42 : vector<1x64xf32> to vector<2x64xf32>
    %44 = arith.addf %40, %43 : vector<2x64xf32>
    %cst_26 = arith.constant 0.000000e+00 : f32
    %45 = vector.broadcast %cst_26 : f32 to vector<2x64xf32>
    %46 = arith.cmpf oge, %44, %45 : vector<2x64xf32>
    %cst_27 = arith.constant 2.000000e-01 : f32
    %47 = vector.broadcast %cst_27 : f32 to vector<2x64xf32>
    %48 = arith.mulf %47, %44 : vector<2x64xf32>
    %49 = arith.select %46, %44, %48 : vector<2x64xi1>, vector<2x64xf32>
    %50 = arith.truncf %49 : vector<2x64xf32> to vector<2x64xbf16>
    %c3 = arith.constant 3 : index
    %c0_28 = arith.constant 0 : index
    %c0_29 = arith.constant 0 : index
    %51 = vector.load %arg2[%c3, %c0_28, %c0_29] : memref<8x64x64xbf16, #tpu.memory_space<vmem>>, vector<1x64x64xbf16>
    %52 = vector.shape_cast %51 : vector<1x64x64xbf16> to vector<64x64xbf16>
    %cst_30 = arith.constant dense<0.000000e+00> : vector<2x64xf32>
    %53 = tpu.matmul %50, %52, %cst_30 {dimension_numbers = #tpu.dot_dimension_numbers<[1], [0], [0], [1], [0, 0, 1, 1], [], []>} : vector<2x64xbf16>, vector<64x64xbf16>, vector<2x64xf32> -> vector<2x64xf32>
    %c3_31 = arith.constant 3 : index
    %c0_32 = arith.constant 0 : index
    %c0_33 = arith.constant 0 : index
    %54 = vector.load %arg3[%c3_31, %c0_32, %c0_33] : memref<8x1x64xf32, #tpu.memory_space<vmem>>, vector<1x1x64xf32>
    %55 = vector.shape_cast %54 : vector<1x1x64xf32> to vector<1x64xf32>
    %56 = vector.broadcast %55 : vector<1x64xf32> to vector<2x64xf32>
    %57 = arith.addf %53, %56 : vector<2x64xf32>
    %cst_34 = arith.constant 0.000000e+00 : f32
    %58 = vector.broadcast %cst_34 : f32 to vector<2x64xf32>
    %59 = arith.cmpf oge, %57, %58 : vector<2x64xf32>
    %cst_35 = arith.constant 2.000000e-01 : f32
    %60 = vector.broadcast %cst_35 : f32 to vector<2x64xf32>
    %61 = arith.mulf %60, %57 : vector<2x64xf32>
    %62 = arith.select %59, %57, %61 : vector<2x64xi1>, vector<2x64xf32>
    %63 = arith.truncf %62 : vector<2x64xf32> to vector<2x64xbf16>
    %c4 = arith.constant 4 : index
    %c0_36 = arith.constant 0 : index
    %c0_37 = arith.constant 0 : index
    %64 = vector.load %arg2[%c4, %c0_36, %c0_37] : memref<8x64x64xbf16, #tpu.memory_space<vmem>>, vector<1x64x64xbf16>
    %65 = vector.shape_cast %64 : vector<1x64x64xbf16> to vector<64x64xbf16>
    %cst_38 = arith.constant dense<0.000000e+00> : vector<2x64xf32>
    %66 = tpu.matmul %63, %65, %cst_38 {dimension_numbers = #tpu.dot_dimension_numbers<[1], [0], [0], [1], [0, 0, 1, 1], [], []>} : vector<2x64xbf16>, vector<64x64xbf16>, vector<2x64xf32> -> vector<2x64xf32>
    %c4_39 = arith.constant 4 : index
    %c0_40 = arith.constant 0 : index
    %c0_41 = arith.constant 0 : index
    %67 = vector.load %arg3[%c4_39, %c0_40, %c0_41] : memref<8x1x64xf32, #tpu.memory_space<vmem>>, vector<1x1x64xf32>
    %68 = vector.shape_cast %67 : vector<1x1x64xf32> to vector<1x64xf32>
    %69 = vector.broadcast %68 : vector<1x64xf32> to vector<2x64xf32>
    %70 = arith.addf %66, %69 : vector<2x64xf32>
    %cst_42 = arith.constant 0.000000e+00 : f32
    %71 = vector.broadcast %cst_42 : f32 to vector<2x64xf32>
    %72 = arith.cmpf oge, %70, %71 : vector<2x64xf32>
    %cst_43 = arith.constant 2.000000e-01 : f32
    %73 = vector.broadcast %cst_43 : f32 to vector<2x64xf32>
    %74 = arith.mulf %73, %70 : vector<2x64xf32>
    %75 = arith.select %72, %70, %74 : vector<2x64xi1>, vector<2x64xf32>
    %76 = arith.truncf %75 : vector<2x64xf32> to vector<2x64xbf16>
    %c5 = arith.constant 5 : index
    %c0_44 = arith.constant 0 : index
    %c0_45 = arith.constant 0 : index
    %77 = vector.load %arg2[%c5, %c0_44, %c0_45] : memref<8x64x64xbf16, #tpu.memory_space<vmem>>, vector<1x64x64xbf16>
    %78 = vector.shape_cast %77 : vector<1x64x64xbf16> to vector<64x64xbf16>
    %cst_46 = arith.constant dense<0.000000e+00> : vector<2x64xf32>
    %79 = tpu.matmul %76, %78, %cst_46 {dimension_numbers = #tpu.dot_dimension_numbers<[1], [0], [0], [1], [0, 0, 1, 1], [], []>} : vector<2x64xbf16>, vector<64x64xbf16>, vector<2x64xf32> -> vector<2x64xf32>
    %c5_47 = arith.constant 5 : index
    %c0_48 = arith.constant 0 : index
    %c0_49 = arith.constant 0 : index
    %80 = vector.load %arg3[%c5_47, %c0_48, %c0_49] : memref<8x1x64xf32, #tpu.memory_space<vmem>>, vector<1x1x64xf32>
    %81 = vector.shape_cast %80 : vector<1x1x64xf32> to vector<1x64xf32>
    %82 = vector.broadcast %81 : vector<1x64xf32> to vector<2x64xf32>
    %83 = arith.addf %79, %82 : vector<2x64xf32>
    %cst_50 = arith.constant 0.000000e+00 : f32
    %84 = vector.broadcast %cst_50 : f32 to vector<2x64xf32>
    %85 = arith.cmpf oge, %83, %84 : vector<2x64xf32>
    %cst_51 = arith.constant 2.000000e-01 : f32
    %86 = vector.broadcast %cst_51 : f32 to vector<2x64xf32>
    %87 = arith.mulf %86, %83 : vector<2x64xf32>
    %88 = arith.select %85, %83, %87 : vector<2x64xi1>, vector<2x64xf32>
    %89 = arith.truncf %88 : vector<2x64xf32> to vector<2x64xbf16>
    %c6 = arith.constant 6 : index
    %c0_52 = arith.constant 0 : index
    %c0_53 = arith.constant 0 : index
    %90 = vector.load %arg2[%c6, %c0_52, %c0_53] : memref<8x64x64xbf16, #tpu.memory_space<vmem>>, vector<1x64x64xbf16>
    %91 = vector.shape_cast %90 : vector<1x64x64xbf16> to vector<64x64xbf16>
    %cst_54 = arith.constant dense<0.000000e+00> : vector<2x64xf32>
    %92 = tpu.matmul %89, %91, %cst_54 {dimension_numbers = #tpu.dot_dimension_numbers<[1], [0], [0], [1], [0, 0, 1, 1], [], []>} : vector<2x64xbf16>, vector<64x64xbf16>, vector<2x64xf32> -> vector<2x64xf32>
    %c6_55 = arith.constant 6 : index
    %c0_56 = arith.constant 0 : index
    %c0_57 = arith.constant 0 : index
    %93 = vector.load %arg3[%c6_55, %c0_56, %c0_57] : memref<8x1x64xf32, #tpu.memory_space<vmem>>, vector<1x1x64xf32>
    %94 = vector.shape_cast %93 : vector<1x1x64xf32> to vector<1x64xf32>
    %95 = vector.broadcast %94 : vector<1x64xf32> to vector<2x64xf32>
    %96 = arith.addf %92, %95 : vector<2x64xf32>
    %cst_58 = arith.constant 0.000000e+00 : f32
    %97 = vector.broadcast %cst_58 : f32 to vector<2x64xf32>
    %98 = arith.cmpf oge, %96, %97 : vector<2x64xf32>
    %cst_59 = arith.constant 2.000000e-01 : f32
    %99 = vector.broadcast %cst_59 : f32 to vector<2x64xf32>
    %100 = arith.mulf %99, %96 : vector<2x64xf32>
    %101 = arith.select %98, %96, %100 : vector<2x64xi1>, vector<2x64xf32>
    %102 = arith.truncf %101 : vector<2x64xf32> to vector<2x64xbf16>
    %c7 = arith.constant 7 : index
    %c0_60 = arith.constant 0 : index
    %c0_61 = arith.constant 0 : index
    %103 = vector.load %arg2[%c7, %c0_60, %c0_61] : memref<8x64x64xbf16, #tpu.memory_space<vmem>>, vector<1x64x64xbf16>
    %104 = vector.shape_cast %103 : vector<1x64x64xbf16> to vector<64x64xbf16>
    %cst_62 = arith.constant dense<0.000000e+00> : vector<2x64xf32>
    %105 = tpu.matmul %102, %104, %cst_62 {dimension_numbers = #tpu.dot_dimension_numbers<[1], [0], [0], [1], [0, 0, 1, 1], [], []>} : vector<2x64xbf16>, vector<64x64xbf16>, vector<2x64xf32> -> vector<2x64xf32>
    %c7_63 = arith.constant 7 : index
    %c0_64 = arith.constant 0 : index
    %c0_65 = arith.constant 0 : index
    %106 = vector.load %arg3[%c7_63, %c0_64, %c0_65] : memref<8x1x64xf32, #tpu.memory_space<vmem>>, vector<1x1x64xf32>
    %107 = vector.shape_cast %106 : vector<1x1x64xf32> to vector<1x64xf32>
    %108 = vector.broadcast %107 : vector<1x64xf32> to vector<2x64xf32>
    %109 = arith.addf %105, %108 : vector<2x64xf32>
    %cst_66 = arith.constant 0.000000e+00 : f32
    %110 = vector.broadcast %cst_66 : f32 to vector<2x64xf32>
    %111 = arith.cmpf oge, %109, %110 : vector<2x64xf32>
    %cst_67 = arith.constant 2.000000e-01 : f32
    %112 = vector.broadcast %cst_67 : f32 to vector<2x64xf32>
    %113 = arith.mulf %112, %109 : vector<2x64xf32>
    %114 = arith.select %111, %109, %113 : vector<2x64xi1>, vector<2x64xf32>
    %115 = arith.truncf %114 : vector<2x64xf32> to vector<2x64xbf16>
    %c0_68 = arith.constant 0 : index
    %c0_69 = arith.constant 0 : index
    %116 = vector.load %arg12[%c0_68, %c0_69] : memref<64x256xbf16, #tpu.memory_space<vmem>>, vector<64x256xbf16>
    %cst_70 = arith.constant dense<0.000000e+00> : vector<2x256xf32>
    %117 = tpu.matmul %115, %116, %cst_70 {dimension_numbers = #tpu.dot_dimension_numbers<[1], [0], [0], [1], [0, 0, 1, 1], [], []>} : vector<2x64xbf16>, vector<64x256xbf16>, vector<2x256xf32> -> vector<2x256xf32>
    %c0_71 = arith.constant 0 : index
    %c0_72 = arith.constant 0 : index
    %118 = vector.load %arg13[%c0_71, %c0_72] : memref<1x256xf32, #tpu.memory_space<vmem>>, vector<1x256xf32>
    %119 = vector.broadcast %118 : vector<1x256xf32> to vector<2x256xf32>
    %120 = arith.addf %117, %119 : vector<2x256xf32>
    %cst_73 = arith.constant 0.000000e+00 : f32
    %121 = vector.broadcast %cst_73 : f32 to vector<2x10x10x32xf32>
    %c0_74 = arith.constant 0 : index
    %c0_75 = arith.constant 0 : index
    %c0_76 = arith.constant 0 : index
    %c0_77 = arith.constant 0 : index
    %122 = vector.load %arg20[%c0_74, %c0_75, %c0_76, %c0_77] : memref<2x10x10x32xf32, #tpu.memory_space<vmem>>, vector<2x10x10x32xf32>
    tpu.vector_store %arg20[%c0_74, %c0_75, %c0_76, %c0_77], %121 {strides = array<i32>} : memref<2x10x10x32xf32, #tpu.memory_space<vmem>>, vector<2x10x10x32xf32>,
    %c0_78 = arith.constant 0 : index
    %c0_79 = arith.constant 0 : index
    %c0_80 = arith.constant 0 : index
    %123 = vector.load %arg5[%c0_78, %c0_79, %c0_80] : memref<1x16x32xf32, #tpu.memory_space<vmem>>, vector<1x16x32xf32>
    %124 = vector.shape_cast %123 : vector<1x16x32xf32> to vector<1x16x32xf32>
    %125 = vector.broadcast %124 : vector<1x16x32xf32> to vector<2x16x32xf32>
    %126 = vector.extract_strided_slice %120 {offsets = [0, 0], sizes = [2, 64], strides = [1, 1]} : vector<2x256xf32> to vector<2x64xf32>
    %127 = vector.extract_strided_slice %126 {offsets = [0, 0], sizes = [2, 32], strides = [1, 1]} : vector<2x64xf32> to vector<2x32xf32>
    %128 = vector.shape_cast %127 : vector<2x32xf32> to vector<2x1x32xf32>
    %129 = vector.extract_strided_slice %126 {offsets = [0, 32], sizes = [2, 32], strides = [1, 1]} : vector<2x64xf32> to vector<2x32xf32>
    %130 = vector.shape_cast %129 : vector<2x32xf32> to vector<2x1x32xf32>
    %cst_81 = arith.constant dense<0.000000e+00> : vector<2x32xf32>
    %131 = vector.multi_reduction <add>, %125, %cst_81 [1] : vector<2x16x32xf32> to vector<2x32xf32>
    %132 = vector.shape_cast %131 : vector<2x32xf32> to vector<2x1x32xf32>
    %cst_82 = arith.constant 1.600000e+01 : f32
    %133 = vector.broadcast %cst_82 : f32 to vector<2x1x32xf32>
    %134 = arith.divf %132, %133 : vector<2x1x32xf32>
    %135 = vector.broadcast %134 : vector<2x1x32xf32> to vector<2x16x32xf32>
    %136 = arith.subf %125, %135 : vector<2x16x32xf32>
    %137 = arith.mulf %136, %136 : vector<2x16x32xf32>
    %cst_83 = arith.constant dense<0.000000e+00> : vector<2x32xf32>
    %138 = vector.multi_reduction <add>, %137, %cst_83 [1] : vector<2x16x32xf32> to vector<2x32xf32>
    %139 = vector.shape_cast %138 : vector<2x32xf32> to vector<2x1x32xf32>
    %cst_84 = arith.constant 1.600000e+01 : f32
    %140 = vector.broadcast %cst_84 : f32 to vector<2x1x32xf32>
    %141 = arith.divf %139, %140 : vector<2x1x32xf32>
    %142 = vector.broadcast %134 : vector<2x1x32xf32> to vector<2x16x32xf32>
    %143 = arith.subf %125, %142 : vector<2x16x32xf32>
    %cst_85 = arith.constant 9.99999993E-9 : f32
    %144 = vector.broadcast %cst_85 : f32 to vector<2x1x32xf32>
    %145 = arith.addf %141, %144 : vector<2x1x32xf32>
    %146 = math.rsqrt %145 : vector<2x1x32xf32>
    %147 = vector.broadcast %146 : vector<2x1x32xf32> to vector<2x16x32xf32>
    %148 = arith.mulf %143, %147 : vector<2x16x32xf32>
    %149 = vector.broadcast %128 : vector<2x1x32xf32> to vector<2x16x32xf32>
    %150 = arith.mulf %149, %148 : vector<2x16x32xf32>
    %151 = vector.broadcast %130 : vector<2x1x32xf32> to vector<2x16x32xf32>
    %152 = arith.addf %150, %151 : vector<2x16x32xf32>
    %cst_86 = arith.constant 0.000000e+00 : f32
    %153 = vector.broadcast %cst_86 : f32 to vector<2x16x32xf32>
    %154 = arith.cmpf oge, %152, %153 : vector<2x16x32xf32>
    %cst_87 = arith.constant 2.000000e-01 : f32
    %155 = vector.broadcast %cst_87 : f32 to vector<2x16x32xf32>
    %156 = arith.mulf %155, %152 : vector<2x16x32xf32>
    %157 = arith.select %154, %152, %156 : vector<2x16x32xi1>, vector<2x16x32xf32>
    %158 = vector.shape_cast %157 : vector<2x16x32xf32> to vector<2x4x4x32xf32>
    %c0_88 = arith.constant 0 : index
    %c1_89 = arith.constant 1 : index
    %c1_90 = arith.constant 1 : index
    %c0_91 = arith.constant 0 : index
    %159 = vector.load %arg20[%c0_88, %c1_89, %c1_90, %c0_91] : memref<2x10x10x32xf32, #tpu.memory_space<vmem>>, vector<2x4x4x32xf32>
    tpu.vector_store %arg20[%c0_88, %c1_89, %c1_90, %c0_91], %158 {strides = array<i32>} : memref<2x10x10x32xf32, #tpu.memory_space<vmem>>, vector<2x4x4x32xf32>,
    %c0_92 = arith.constant 0 : index
    %c0_93 = arith.constant 0 : index
    %c0_94 = arith.constant 0 : index
    %c0_95 = arith.constant 0 : index
    %160 = vector.load %arg20[%c0_92, %c0_93, %c0_94, %c0_95] : memref<2x10x10x32xf32, #tpu.memory_space<vmem>>, vector<2x6x6x32xf32>
    %c0_96 = arith.constant 0 : index
    %c0_97 = arith.constant 0 : index
    %161 = vector.load %arg6[%c0_96, %c0_97] : memref<288x32xbf16, #tpu.memory_space<vmem>>, vector<288x32xbf16>
    %c0_98 = arith.constant 0 : index
    %c0_99 = arith.constant 0 : index
    %162 = vector.load %arg7[%c0_98, %c0_99] : memref<1x32xf32, #tpu.memory_space<vmem>>, vector<1x32xf32>
    %163 = vector.extract_strided_slice %160 {offsets = [0, 0, 0, 0], sizes = [2, 4, 4, 32], strides = [1, 1, 1, 1]} : vector<2x6x6x32xf32> to vector<2x4x4x32xf32>
    %164 = vector.extract_strided_slice %160 {offsets = [0, 0, 1, 0], sizes = [2, 4, 4, 32], strides = [1, 1, 1, 1]} : vector<2x6x6x32xf32> to vector<2x4x4x32xf32>
    %165 = vector.extract_strided_slice %160 {offsets = [0, 0, 2, 0], sizes = [2, 4, 4, 32], strides = [1, 1, 1, 1]} : vector<2x6x6x32xf32> to vector<2x4x4x32xf32>
    %166 = vector.extract_strided_slice %160 {offsets = [0, 1, 0, 0], sizes = [2, 4, 4, 32], strides = [1, 1, 1, 1]} : vector<2x6x6x32xf32> to vector<2x4x4x32xf32>
    %167 = vector.extract_strided_slice %160 {offsets = [0, 1, 1, 0], sizes = [2, 4, 4, 32], strides = [1, 1, 1, 1]} : vector<2x6x6x32xf32> to vector<2x4x4x32xf32>
    %168 = vector.extract_strided_slice %160 {offsets = [0, 1, 2, 0], sizes = [2, 4, 4, 32], strides = [1, 1, 1, 1]} : vector<2x6x6x32xf32> to vector<2x4x4x32xf32>
    %169 = vector.extract_strided_slice %160 {offsets = [0, 2, 0, 0], sizes = [2, 4, 4, 32], strides = [1, 1, 1, 1]} : vector<2x6x6x32xf32> to vector<2x4x4x32xf32>
    %170 = vector.extract_strided_slice %160 {offsets = [0, 2, 1, 0], sizes = [2, 4, 4, 32], strides = [1, 1, 1, 1]} : vector<2x6x6x32xf32> to vector<2x4x4x32xf32>
    %171 = vector.extract_strided_slice %160 {offsets = [0, 2, 2, 0], sizes = [2, 4, 4, 32], strides = [1, 1, 1, 1]} : vector<2x6x6x32xf32> to vector<2x4x4x32xf32>
    %172 = tpu.concatenate %163, %164, %165, %166, %167, %168, %169, %170, %171 in 3 : vector<2x4x4x32xf32>, vector<2x4x4x32xf32>, vector<2x4x4x32xf32>, vector<2x4x4x32xf32>, vector<2x4x4x32xf32>, vector<2x4x4x32xf32>, vector<2x4x4x32xf32>, vector<2x4x4x32xf32>, vector<2x4x4x32xf32> -> vector<2x4x4x288xf32>
    %173 = vector.shape_cast %172 : vector<2x4x4x288xf32> to vector<32x288xf32>
    %174 = arith.truncf %173 : vector<32x288xf32> to vector<32x288xbf16>
    %cst_100 = arith.constant dense<0.000000e+00> : vector<32x32xf32>
    %175 = tpu.matmul %174, %161, %cst_100 {dimension_numbers = #tpu.dot_dimension_numbers<[1], [0], [0], [1], [0, 0, 1, 1], [], []>} : vector<32x288xbf16>, vector<288x32xbf16>, vector<32x32xf32> -> vector<32x32xf32>
    %176 = vector.broadcast %162 : vector<1x32xf32> to vector<32x32xf32>
    %177 = arith.addf %175, %176 : vector<32x32xf32>
    %178 = vector.shape_cast %177 : vector<32x32xf32> to vector<2x16x32xf32>
    %179 = vector.extract_strided_slice %120 {offsets = [0, 64], sizes = [2, 64], strides = [1, 1]} : vector<2x256xf32> to vector<2x64xf32>
    %180 = vector.extract_strided_slice %179 {offsets = [0, 0], sizes = [2, 32], strides = [1, 1]} : vector<2x64xf32> to vector<2x32xf32>
    %181 = vector.shape_cast %180 : vector<2x32xf32> to vector<2x1x32xf32>
    %182 = vector.extract_strided_slice %179 {offsets = [0, 32], sizes = [2, 32], strides = [1, 1]} : vector<2x64xf32> to vector<2x32xf32>
    %183 = vector.shape_cast %182 : vector<2x32xf32> to vector<2x1x32xf32>
    %cst_101 = arith.constant dense<0.000000e+00> : vector<2x32xf32>
    %184 = vector.multi_reduction <add>, %178, %cst_101 [1] : vector<2x16x32xf32> to vector<2x32xf32>
    %185 = vector.shape_cast %184 : vector<2x32xf32> to vector<2x1x32xf32>
    %cst_102 = arith.constant 1.600000e+01 : f32
    %186 = vector.broadcast %cst_102 : f32 to vector<2x1x32xf32>
    %187 = arith.divf %185, %186 : vector<2x1x32xf32>
    %188 = vector.broadcast %187 : vector<2x1x32xf32> to vector<2x16x32xf32>
    %189 = arith.subf %178, %188 : vector<2x16x32xf32>
    %190 = arith.mulf %189, %189 : vector<2x16x32xf32>
    %cst_103 = arith.constant dense<0.000000e+00> : vector<2x32xf32>
    %191 = vector.multi_reduction <add>, %190, %cst_103 [1] : vector<2x16x32xf32> to vector<2x32xf32>
    %192 = vector.shape_cast %191 : vector<2x32xf32> to vector<2x1x32xf32>
    %cst_104 = arith.constant 1.600000e+01 : f32
    %193 = vector.broadcast %cst_104 : f32 to vector<2x1x32xf32>
    %194 = arith.divf %192, %193 : vector<2x1x32xf32>
    %195 = vector.broadcast %187 : vector<2x1x32xf32> to vector<2x16x32xf32>
    %196 = arith.subf %178, %195 : vector<2x16x32xf32>
    %cst_105 = arith.constant 9.99999993E-9 : f32
    %197 = vector.broadcast %cst_105 : f32 to vector<2x1x32xf32>
    %198 = arith.addf %194, %197 : vector<2x1x32xf32>
    %199 = math.rsqrt %198 : vector<2x1x32xf32>
    %200 = vector.broadcast %199 : vector<2x1x32xf32> to vector<2x16x32xf32>
    %201 = arith.mulf %196, %200 : vector<2x16x32xf32>
    %202 = vector.broadcast %181 : vector<2x1x32xf32> to vector<2x16x32xf32>
    %203 = arith.mulf %202, %201 : vector<2x16x32xf32>
    %204 = vector.broadcast %183 : vector<2x1x32xf32> to vector<2x16x32xf32>
    %205 = arith.addf %203, %204 : vector<2x16x32xf32>
    %cst_106 = arith.constant 0.000000e+00 : f32
    %206 = vector.broadcast %cst_106 : f32 to vector<2x16x32xf32>
    %207 = arith.cmpf oge, %205, %206 : vector<2x16x32xf32>
    %cst_107 = arith.constant 2.000000e-01 : f32
    %208 = vector.broadcast %cst_107 : f32 to vector<2x16x32xf32>
    %209 = arith.mulf %208, %205 : vector<2x16x32xf32>
    %210 = arith.select %207, %205, %209 : vector<2x16x32xi1>, vector<2x16x32xf32>
    %c0_108 = arith.constant 0 : index
    %c0_109 = arith.constant 0 : index
    %211 = vector.load %arg14[%c0_108, %c0_109] : memref<128x32xf32, #tpu.memory_space<vmem>>, vector<128x32xf32>
    %212 = vector.shape_cast %210 : vector<2x16x32xf32> to vector<32x32xf32>
    %cst_110 = arith.constant dense<0.000000e+00> : vector<128x32xf32>
    %213 = tpu.matmul %211, %212, %cst_110 {dimension_numbers = #tpu.dot_dimension_numbers<[1], [0], [0], [1], [0, 0, 1, 1], [], []>} : vector<128x32xf32>, vector<32x32xf32>, vector<128x32xf32> -> vector<128x32xf32>
    %214 = vector.shape_cast %213 : vector<128x32xf32> to vector<2x8x8x32xf32>
    %c0_111 = arith.constant 0 : index
    %c1_112 = arith.constant 1 : index
    %c1_113 = arith.constant 1 : index
    %c0_114 = arith.constant 0 : index
    %215 = vector.load %arg20[%c0_111, %c1_112, %c1_113, %c0_114] : memref<2x10x10x32xf32, #tpu.memory_space<vmem>>, vector<2x8x8x32xf32>
    tpu.vector_store %arg20[%c0_111, %c1_112, %c1_113, %c0_114], %214 {strides = array<i32>} : memref<2x10x10x32xf32, #tpu.memory_space<vmem>>, vector<2x8x8x32xf32>,
    %c0_115 = arith.constant 0 : index
    %c0_116 = arith.constant 0 : index
    %c0_117 = arith.constant 0 : index
    %c0_118 = arith.constant 0 : index
    %216 = vector.load %arg20[%c0_115, %c0_116, %c0_117, %c0_118] : memref<2x10x10x32xf32, #tpu.memory_space<vmem>>, vector<2x10x10x32xf32>
    %c0_119 = arith.constant 0 : index
    %c0_120 = arith.constant 0 : index
    %217 = vector.load %arg8[%c0_119, %c0_120] : memref<288x32xbf16, #tpu.memory_space<vmem>>, vector<288x32xbf16>
    %c0_121 = arith.constant 0 : index
    %c0_122 = arith.constant 0 : index
    %218 = vector.load %arg9[%c0_121, %c0_122] : memref<1x32xf32, #tpu.memory_space<vmem>>, vector<1x32xf32>
    %219 = vector.extract_strided_slice %216 {offsets = [0, 0, 0, 0], sizes = [2, 8, 8, 32], strides = [1, 1, 1, 1]} : vector<2x10x10x32xf32> to vector<2x8x8x32xf32>
    %220 = vector.extract_strided_slice %216 {offsets = [0, 0, 1, 0], sizes = [2, 8, 8, 32], strides = [1, 1, 1, 1]} : vector<2x10x10x32xf32> to vector<2x8x8x32xf32>
    %221 = vector.extract_strided_slice %216 {offsets = [0, 0, 2, 0], sizes = [2, 8, 8, 32], strides = [1, 1, 1, 1]} : vector<2x10x10x32xf32> to vector<2x8x8x32xf32>
    %222 = vector.extract_strided_slice %216 {offsets = [0, 1, 0, 0], sizes = [2, 8, 8, 32], strides = [1, 1, 1, 1]} : vector<2x10x10x32xf32> to vector<2x8x8x32xf32>
    %223 = vector.extract_strided_slice %216 {offsets = [0, 1, 1, 0], sizes = [2, 8, 8, 32], strides = [1, 1, 1, 1]} : vector<2x10x10x32xf32> to vector<2x8x8x32xf32>
    %224 = vector.extract_strided_slice %216 {offsets = [0, 1, 2, 0], sizes = [2, 8, 8, 32], strides = [1, 1, 1, 1]} : vector<2x10x10x32xf32> to vector<2x8x8x32xf32>
    %225 = vector.extract_strided_slice %216 {offsets = [0, 2, 0, 0], sizes = [2, 8, 8, 32], strides = [1, 1, 1, 1]} : vector<2x10x10x32xf32> to vector<2x8x8x32xf32>
    %226 = vector.extract_strided_slice %216 {offsets = [0, 2, 1, 0], sizes = [2, 8, 8, 32], strides = [1, 1, 1, 1]} : vector<2x10x10x32xf32> to vector<2x8x8x32xf32>
    %227 = vector.extract_strided_slice %216 {offsets = [0, 2, 2, 0], sizes = [2, 8, 8, 32], strides = [1, 1, 1, 1]} : vector<2x10x10x32xf32> to vector<2x8x8x32xf32>
    %228 = tpu.concatenate %219, %220, %221, %222, %223, %224, %225, %226, %227 in 3 : vector<2x8x8x32xf32>, vector<2x8x8x32xf32>, vector<2x8x8x32xf32>, vector<2x8x8x32xf32>, vector<2x8x8x32xf32>, vector<2x8x8x32xf32>, vector<2x8x8x32xf32>, vector<2x8x8x32xf32>, vector<2x8x8x32xf32> -> vector<2x8x8x288xf32>
    %229 = vector.shape_cast %228 : vector<2x8x8x288xf32> to vector<128x288xf32>
    %230 = arith.truncf %229 : vector<128x288xf32> to vector<128x288xbf16>
    %cst_123 = arith.constant dense<0.000000e+00> : vector<128x32xf32>
    %231 = tpu.matmul %230, %217, %cst_123 {dimension_numbers = #tpu.dot_dimension_numbers<[1], [0], [0], [1], [0, 0, 1, 1], [], []>} : vector<128x288xbf16>, vector<288x32xbf16>, vector<128x32xf32> -> vector<128x32xf32>
    %232 = vector.broadcast %218 : vector<1x32xf32> to vector<128x32xf32>
    %233 = arith.addf %231, %232 : vector<128x32xf32>
    %234 = vector.shape_cast %233 : vector<128x32xf32> to vector<2x64x32xf32>
    %235 = vector.extract_strided_slice %120 {offsets = [0, 128], sizes = [2, 64], strides = [1, 1]} : vector<2x256xf32> to vector<2x64xf32>
    %236 = vector.extract_strided_slice %235 {offsets = [0, 0], sizes = [2, 32], strides = [1, 1]} : vector<2x64xf32> to vector<2x32xf32>
    %237 = vector.shape_cast %236 : vector<2x32xf32> to vector<2x1x32xf32>
    %238 = vector.extract_strided_slice %235 {offsets = [0, 32], sizes = [2, 32], strides = [1, 1]} : vector<2x64xf32> to vector<2x32xf32>
    %239 = vector.shape_cast %238 : vector<2x32xf32> to vector<2x1x32xf32>
    %cst_124 = arith.constant dense<0.000000e+00> : vector<2x32xf32>
    %240 = vector.multi_reduction <add>, %234, %cst_124 [1] : vector<2x64x32xf32> to vector<2x32xf32>
    %241 = vector.shape_cast %240 : vector<2x32xf32> to vector<2x1x32xf32>
    %cst_125 = arith.constant 6.400000e+01 : f32
    %242 = vector.broadcast %cst_125 : f32 to vector<2x1x32xf32>
    %243 = arith.divf %241, %242 : vector<2x1x32xf32>
    %244 = vector.broadcast %243 : vector<2x1x32xf32> to vector<2x64x32xf32>
    %245 = arith.subf %234, %244 : vector<2x64x32xf32>
    %246 = arith.mulf %245, %245 : vector<2x64x32xf32>
    %cst_126 = arith.constant dense<0.000000e+00> : vector<2x32xf32>
    %247 = vector.multi_reduction <add>, %246, %cst_126 [1] : vector<2x64x32xf32> to vector<2x32xf32>
    %248 = vector.shape_cast %247 : vector<2x32xf32> to vector<2x1x32xf32>
    %cst_127 = arith.constant 6.400000e+01 : f32
    %249 = vector.broadcast %cst_127 : f32 to vector<2x1x32xf32>
    %250 = arith.divf %248, %249 : vector<2x1x32xf32>
    %251 = vector.broadcast %243 : vector<2x1x32xf32> to vector<2x64x32xf32>
    %252 = arith.subf %234, %251 : vector<2x64x32xf32>
    %cst_128 = arith.constant 9.99999993E-9 : f32
    %253 = vector.broadcast %cst_128 : f32 to vector<2x1x32xf32>
    %254 = arith.addf %250, %253 : vector<2x1x32xf32>
    %255 = math.rsqrt %254 : vector<2x1x32xf32>
    %256 = vector.broadcast %255 : vector<2x1x32xf32> to vector<2x64x32xf32>
    %257 = arith.mulf %252, %256 : vector<2x64x32xf32>
    %258 = vector.broadcast %237 : vector<2x1x32xf32> to vector<2x64x32xf32>
    %259 = arith.mulf %258, %257 : vector<2x64x32xf32>
    %260 = vector.broadcast %239 : vector<2x1x32xf32> to vector<2x64x32xf32>
    %261 = arith.addf %259, %260 : vector<2x64x32xf32>
    %cst_129 = arith.constant 0.000000e+00 : f32
    %262 = vector.broadcast %cst_129 : f32 to vector<2x64x32xf32>
    %263 = arith.cmpf oge, %261, %262 : vector<2x64x32xf32>
    %cst_130 = arith.constant 2.000000e-01 : f32
    %264 = vector.broadcast %cst_130 : f32 to vector<2x64x32xf32>
    %265 = arith.mulf %264, %261 : vector<2x64x32xf32>
    %266 = arith.select %263, %261, %265 : vector<2x64x32xi1>, vector<2x64x32xf32>
    %267 = vector.shape_cast %266 : vector<2x64x32xf32> to vector<2x8x8x32xf32>
    %c0_131 = arith.constant 0 : index
    %c1_132 = arith.constant 1 : index
    %c1_133 = arith.constant 1 : index
    %c0_134 = arith.constant 0 : index
    %268 = vector.load %arg20[%c0_131, %c1_132, %c1_133, %c0_134] : memref<2x10x10x32xf32, #tpu.memory_space<vmem>>, vector<2x8x8x32xf32>
    tpu.vector_store %arg20[%c0_131, %c1_132, %c1_133, %c0_134], %267 {strides = array<i32>} : memref<2x10x10x32xf32, #tpu.memory_space<vmem>>, vector<2x8x8x32xf32>,
    %c0_135 = arith.constant 0 : index
    %c0_136 = arith.constant 0 : index
    %c0_137 = arith.constant 0 : index
    %c0_138 = arith.constant 0 : index
    %269 = vector.load %arg20[%c0_135, %c0_136, %c0_137, %c0_138] : memref<2x10x10x32xf32, #tpu.memory_space<vmem>>, vector<2x10x10x32xf32>
    %c0_139 = arith.constant 0 : index
    %c0_140 = arith.constant 0 : index
    %270 = vector.load %arg10[%c0_139, %c0_140] : memref<288x32xbf16, #tpu.memory_space<vmem>>, vector<288x32xbf16>
    %c0_141 = arith.constant 0 : index
    %c0_142 = arith.constant 0 : index
    %271 = vector.load %arg11[%c0_141, %c0_142] : memref<1x32xf32, #tpu.memory_space<vmem>>, vector<1x32xf32>
    %272 = vector.extract_strided_slice %269 {offsets = [0, 0, 0, 0], sizes = [2, 8, 8, 32], strides = [1, 1, 1, 1]} : vector<2x10x10x32xf32> to vector<2x8x8x32xf32>
    %273 = vector.extract_strided_slice %269 {offsets = [0, 0, 1, 0], sizes = [2, 8, 8, 32], strides = [1, 1, 1, 1]} : vector<2x10x10x32xf32> to vector<2x8x8x32xf32>
    %274 = vector.extract_strided_slice %269 {offsets = [0, 0, 2, 0], sizes = [2, 8, 8, 32], strides = [1, 1, 1, 1]} : vector<2x10x10x32xf32> to vector<2x8x8x32xf32>
    %275 = vector.extract_strided_slice %269 {offsets = [0, 1, 0, 0], sizes = [2, 8, 8, 32], strides = [1, 1, 1, 1]} : vector<2x10x10x32xf32> to vector<2x8x8x32xf32>
    %276 = vector.extract_strided_slice %269 {offsets = [0, 1, 1, 0], sizes = [2, 8, 8, 32], strides = [1, 1, 1, 1]} : vector<2x10x10x32xf32> to vector<2x8x8x32xf32>
    %277 = vector.extract_strided_slice %269 {offsets = [0, 1, 2, 0], sizes = [2, 8, 8, 32], strides = [1, 1, 1, 1]} : vector<2x10x10x32xf32> to vector<2x8x8x32xf32>
    %278 = vector.extract_strided_slice %269 {offsets = [0, 2, 0, 0], sizes = [2, 8, 8, 32], strides = [1, 1, 1, 1]} : vector<2x10x10x32xf32> to vector<2x8x8x32xf32>
    %279 = vector.extract_strided_slice %269 {offsets = [0, 2, 1, 0], sizes = [2, 8, 8, 32], strides = [1, 1, 1, 1]} : vector<2x10x10x32xf32> to vector<2x8x8x32xf32>
    %280 = vector.extract_strided_slice %269 {offsets = [0, 2, 2, 0], sizes = [2, 8, 8, 32], strides = [1, 1, 1, 1]} : vector<2x10x10x32xf32> to vector<2x8x8x32xf32>
    %281 = tpu.concatenate %272, %273, %274, %275, %276, %277, %278, %279, %280 in 3 : vector<2x8x8x32xf32>, vector<2x8x8x32xf32>, vector<2x8x8x32xf32>, vector<2x8x8x32xf32>, vector<2x8x8x32xf32>, vector<2x8x8x32xf32>, vector<2x8x8x32xf32>, vector<2x8x8x32xf32>, vector<2x8x8x32xf32> -> vector<2x8x8x288xf32>
    %282 = vector.shape_cast %281 : vector<2x8x8x288xf32> to vector<128x288xf32>
    %283 = arith.truncf %282 : vector<128x288xf32> to vector<128x288xbf16>
    %cst_143 = arith.constant dense<0.000000e+00> : vector<128x32xf32>
    %284 = tpu.matmul %283, %270, %cst_143 {dimension_numbers = #tpu.dot_dimension_numbers<[1], [0], [0], [1], [0, 0, 1, 1], [], []>} : vector<128x288xbf16>, vector<288x32xbf16>, vector<128x32xf32> -> vector<128x32xf32>
    %285 = vector.broadcast %271 : vector<1x32xf32> to vector<128x32xf32>
    %286 = arith.addf %284, %285 : vector<128x32xf32>
    %287 = vector.shape_cast %286 : vector<128x32xf32> to vector<2x64x32xf32>
    %288 = vector.extract_strided_slice %120 {offsets = [0, 192], sizes = [2, 64], strides = [1, 1]} : vector<2x256xf32> to vector<2x64xf32>
    %289 = vector.extract_strided_slice %288 {offsets = [0, 0], sizes = [2, 32], strides = [1, 1]} : vector<2x64xf32> to vector<2x32xf32>
    %290 = vector.shape_cast %289 : vector<2x32xf32> to vector<2x1x32xf32>
    %291 = vector.extract_strided_slice %288 {offsets = [0, 32], sizes = [2, 32], strides = [1, 1]} : vector<2x64xf32> to vector<2x32xf32>
    %292 = vector.shape_cast %291 : vector<2x32xf32> to vector<2x1x32xf32>
    %cst_144 = arith.constant dense<0.000000e+00> : vector<2x32xf32>
    %293 = vector.multi_reduction <add>, %287, %cst_144 [1] : vector<2x64x32xf32> to vector<2x32xf32>
    %294 = vector.shape_cast %293 : vector<2x32xf32> to vector<2x1x32xf32>
    %cst_145 = arith.constant 6.400000e+01 : f32
    %295 = vector.broadcast %cst_145 : f32 to vector<2x1x32xf32>
    %296 = arith.divf %294, %295 : vector<2x1x32xf32>
    %297 = vector.broadcast %296 : vector<2x1x32xf32> to vector<2x64x32xf32>
    %298 = arith.subf %287, %297 : vector<2x64x32xf32>
    %299 = arith.mulf %298, %298 : vector<2x64x32xf32>
    %cst_146 = arith.constant dense<0.000000e+00> : vector<2x32xf32>
    %300 = vector.multi_reduction <add>, %299, %cst_146 [1] : vector<2x64x32xf32> to vector<2x32xf32>
    %301 = vector.shape_cast %300 : vector<2x32xf32> to vector<2x1x32xf32>
    %cst_147 = arith.constant 6.400000e+01 : f32
    %302 = vector.broadcast %cst_147 : f32 to vector<2x1x32xf32>
    %303 = arith.divf %301, %302 : vector<2x1x32xf32>
    %304 = vector.broadcast %296 : vector<2x1x32xf32> to vector<2x64x32xf32>
    %305 = arith.subf %287, %304 : vector<2x64x32xf32>
    %cst_148 = arith.constant 9.99999993E-9 : f32
    %306 = vector.broadcast %cst_148 : f32 to vector<2x1x32xf32>
    %307 = arith.addf %303, %306 : vector<2x1x32xf32>
    %308 = math.rsqrt %307 : vector<2x1x32xf32>
    %309 = vector.broadcast %308 : vector<2x1x32xf32> to vector<2x64x32xf32>
    %310 = arith.mulf %305, %309 : vector<2x64x32xf32>
    %311 = vector.broadcast %290 : vector<2x1x32xf32> to vector<2x64x32xf32>
    %312 = arith.mulf %311, %310 : vector<2x64x32xf32>
    %313 = vector.broadcast %292 : vector<2x1x32xf32> to vector<2x64x32xf32>
    %314 = arith.addf %312, %313 : vector<2x64x32xf32>
    %cst_149 = arith.constant 0.000000e+00 : f32
    %315 = vector.broadcast %cst_149 : f32 to vector<2x64x32xf32>
    %316 = arith.cmpf oge, %314, %315 : vector<2x64x32xf32>
    %cst_150 = arith.constant 2.000000e-01 : f32
    %317 = vector.broadcast %cst_150 : f32 to vector<2x64x32xf32>
    %318 = arith.mulf %317, %314 : vector<2x64x32xf32>
    %319 = arith.select %316, %314, %318 : vector<2x64x32xi1>, vector<2x64x32xf32>
    %c0_151 = arith.constant 0 : index
    %320 = memref.load %arg0[%c0_151] : memref<1xf32, #tpu.memory_space<smem>>
    %321 = vector.shape_cast %319 : vector<2x64x32xf32> to vector<128x32xf32>
    %322 = tpu.concatenate %321, %213 in 1 : vector<128x32xf32>, vector<128x32xf32> -> vector<128x64xf32>
    %c0_152 = arith.constant 0 : index
    %c0_153 = arith.constant 0 : index
    %323 = vector.load %arg17[%c0_152, %c0_153] : memref<3x32xf32, #tpu.memory_space<vmem>>, vector<3x32xf32>
    %324 = vector.broadcast %320 : f32 to vector<3x32xf32>
    %325 = arith.mulf %324, %323 : vector<3x32xf32>
    %cst_154 = arith.constant 1.000000e+00 : f32
    %326 = arith.subf %cst_154, %320 : f32
    %c0_155 = arith.constant 0 : index
    %c0_156 = arith.constant 0 : index
    %327 = vector.load %arg15[%c0_155, %c0_156] : memref<3x32xf32, #tpu.memory_space<vmem>>, vector<3x32xf32>
    %328 = vector.broadcast %326 : f32 to vector<3x32xf32>
    %329 = arith.mulf %328, %327 : vector<3x32xf32>
    %330 = tpu.concatenate %325, %329 in 1 : vector<3x32xf32>, vector<3x32xf32> -> vector<3x64xf32>
    %c0_157 = arith.constant 0 : index
    %c0_158 = arith.constant 0 : index
    %331 = vector.load %arg18[%c0_157, %c0_158] : memref<3x1xf32, #tpu.memory_space<vmem>>, vector<3x1xf32>
    %332 = vector.broadcast %320 : f32 to vector<3x1xf32>
    %333 = arith.mulf %332, %331 : vector<3x1xf32>
    %cst_159 = arith.constant 1.000000e+00 : f32
    %334 = arith.subf %cst_159, %320 : f32
    %c0_160 = arith.constant 0 : index
    %c0_161 = arith.constant 0 : index
    %335 = vector.load %arg16[%c0_160, %c0_161] : memref<3x1xf32, #tpu.memory_space<vmem>>, vector<3x1xf32>
    %336 = vector.broadcast %334 : f32 to vector<3x1xf32>
    %337 = arith.mulf %336, %335 : vector<3x1xf32>
    %338 = arith.addf %333, %337 : vector<3x1xf32>
    %cst_162 = arith.constant dense<0.000000e+00> : vector<3x128xf32>
    %339 = tpu.matmul %330, %322, %cst_162 {dimension_numbers = #tpu.dot_dimension_numbers<[1], [1], [0], [0], [0, 0, 1, 0], [], []>} : vector<3x64xf32>, vector<128x64xf32>, vector<3x128xf32> -> vector<3x128xf32>
    %340 = vector.broadcast %338 : vector<3x1xf32> to vector<3x128xf32>
    %341 = arith.addf %339, %340 : vector<3x128xf32>
    %c0_163 = arith.constant 0 : index
    %c0_164 = arith.constant 0 : index
    %342 = vector.load %arg19[%c0_163, %c0_164] : memref<3x128xf32, #tpu.memory_space<vmem>>, vector<3x128xf32>
    tpu.vector_store %arg19[%c0_163, %c0_164], %341 {strides = array<i32>} : memref<3x128xf32, #tpu.memory_space<vmem>>, vector<3x128xf32>,
    return
  }
}

</mosaic_0001>

<bundles_post_ra>
// kernel: _lambda_.1
= control target key start
LH: loop header
LB: loop body
LE: loop exit
PB: predicated region body
PF: predicated region fallthrough
CT: control target
= control target key end

     0   :  { %s8665_s0 = inlined_call_operand.<no memory space> [shape: f32[1], index: 0, kind: input, shape index: {}]   ;;  %s8666_s1 = inlined_call_operand.vmem [shape: f32[2,64], index: 1, kind: input, shape index: {}]   ;;  %s8667_s2 = inlined_call_operand.hbm [shape: bf16[8,64,64], index: 2, kind: input, shape index: {}]   ;;  %s8668_s3 = inlined_call_operand.vmem [shape: f32[8,1,64], index: 3, kind: input, shape index: {}]   ;;  %s8669_s4 = inlined_call_operand.vmem [shape: f32[1,64], index: 4, kind: input, shape index: {}]   ;;  %s8670_s5 = inlined_call_operand.vmem [shape: f32[1,16,32], index: 5, kind: input, shape index: {}]   ;;  %s8671_s6 = inlined_call_operand.hbm [shape: bf16[288,32], index: 6, kind: input, shape index: {}]   ;;  %s8672_s7 = inlined_call_operand.vmem [shape: f32[1,32], index: 7, kind: input, shape index: {}, may-alias: {7,9,11}]   ;;  %s8673_s8 = inlined_call_operand.hbm [shape: bf16[288,32], index: 8, kind: input, shape index: {}]   ;;  %s8674_s9 = inlined_call_operand.vmem [shape: f32[1,32], index: 9, kind: input, shape index: {}, may-alias: {7,9,11}]   ;;  %s8675_s10 = inlined_call_operand.hbm [shape: bf16[288,32], index: 10, kind: input, shape index: {}]   ;;  %s8676_s11 = inlined_call_operand.vmem [shape: f32[1,32], index: 11, kind: input, shape index: {}, may-alias: {7,9,11}]   ;;  %s8677_s12 = inlined_call_operand.hbm [shape: bf16[64,256], index: 12, kind: input, shape index: {}]   ;;  %s8678_s13 = inlined_call_operand.vmem [shape: f32[1,256], index: 13, kind: input, shape index: {}]   ;;  %s8679_s14 = inlined_call_operand.hbm [shape: f32[128,32], index: 14, kind: input, shape index: {}]   ;;  %s8680_s15 = inlined_call_operand.vmem [shape: f32[3,32], index: 15, kind: input, shape index: {}]   ;;  %s8681_s16 = inlined_call_operand.vmem [shape: f32[3,1], index: 16, kind: input, shape index: {}, may-alias: {16,18}]   ;;  %s8682_s17 = inlined_call_operand.vmem [shape: f32[3,32], index: 17, kind: input, shape index: {}]   ;;  %s8683_s18 = inlined_call_operand.vmem [shape: f32[3,1], index: 18, kind: input, shape index: {}, may-alias: {16,18}]   ;;  %s8684_s19 = inlined_call_operand.vmem [shape: f32[3,128], index: 19, kind: output, shape index: {}]  }
   0x1   :  { %8714 = sst [smem:[#allocation35_spill]] %s8665_s0 }
   0x2   :  { %8715 = sst [smem:[#allocation36_spill]] %s8666_s1 }
   0x3   :  { %8716 = sst [smem:[#allocation37_spill]] %s8667_s2 }
   0x4   :  { %8717 = sst [smem:[#allocation38_spill]] %s8668_s3 }
   0x5   :  { %25 = vsyncpa [#allocation5], 0 }
   0x6   :  { %26 = vsyncpa [#allocation7], 0 }
   0x7   :  { %27 = vsyncpa [#allocation10], 0 }
   0x8   :  { %28 = vsyncpa [#allocation13], 0  ;;  %s6274_s28 = smov [#allocation6]   ;;  %s6275_s29 = smov [#allocation9]  }
   0x9   :  { %s56_s0 = sshll.u32 %s6274_s28, 4  ;;  %s84_s30 = sshll.u32 %s6275_s29, 4  ;;  %s57_s0 = int_to_ptr.vmem [resolvable:$true] %s56_s0  ;;  %s85_s30 = int_to_ptr.vmem [resolvable:$true] %s84_s30 }
   0xa   :  { %s6154_s20 = scalar_lea.vmem %s57_s0, 2304  ;;  %p6159_p1 = scmp.lt.s32.totalorder %s57_s0, %s57_s0 }
   0xb   :  { %p6155_p0 = scmp.ne.s32.totalorder %s57_s0, %s6154_s20  ;;  %p6160_p2 = scmp.lt.s32.totalorder %s6154_s20, %s6154_s20 }
   0xd   :  { %p6161_p3 = por %p6160_p2, %p6159_p1 }
   0xf   :  { %p6162_p4 = pnand %p6161_p3, %p6155_p0 }
  0x11   :  { %6165 = shalt.err (!%p6162_p4)
}
  0x12   :  { %s6276_s1 = smov 64   ;;  %s6277_s21 = smov 4  }
  0x13   :  { %62 = dma.hbm_to_vmem [thread:$0]  %s8671_s6, 2304, %s57_s0, [#allocation7], %s6276_s1, %s6276_s1, %s6277_s21  }
  0x14   :  { %s6174_s23 = scalar_lea.vmem %s85_s30, 2304  ;;  %p6179_p6 = scmp.lt.s32.totalorder %s85_s30, %s85_s30 }
  0x15   :  { %p6175_p5 = scmp.ne.s32.totalorder %s85_s30, %s6174_s23  ;;  %p6180_p7 = scmp.lt.s32.totalorder %s6174_s23, %s6174_s23 }
  0x17   :  { %p6181_p8 = por %p6180_p7, %p6179_p6 }
  0x19   :  { %p6182_p9 = pnand %p6181_p8, %p6175_p5 }
  0x1b   :  { %6185 = shalt.err (!%p6182_p9)
}
  0x1c   :  { %90 = dma.hbm_to_vmem [thread:$0]  %s8675_s10, 2304, %s85_s30, [#allocation10], %s6276_s1, %s6276_s1, %s6277_s21  }
  0x1d   :  { %s6278_s25 = smov [#allocation4]   ;;  %s6279_s27 = smov [#allocation8]  }
  0x1e   :  { %s38_s26 = sshll.u32 %s6278_s25, 4  ;;  %s70_s4 = sshll.u32 %s6279_s27, 4  ;;  %s39_s26 = int_to_ptr.vmem [resolvable:$true] %s38_s26  ;;  %s71_s4 = int_to_ptr.vmem [resolvable:$true] %s70_s4 }
  0x1f   :  { %s6194_s6 = scalar_lea.vmem %s39_s26, 4096  ;;  %p6199_p11 = scmp.lt.s32.totalorder %s39_s26, %s39_s26 }
  0x20   :  { %p6195_p10 = scmp.ne.s32.totalorder %s39_s26, %s6194_s6  ;;  %p6200_p12 = scmp.lt.s32.totalorder %s6194_s6, %s6194_s6 }
  0x22   :  { %p6201_p13 = por %p6200_p12, %p6199_p11 }
  0x24   :  { %p6202_p0 = pnand %p6201_p13, %p6195_p10 }
  0x26   :  { %6205 = shalt.err (!%p6202_p0)
}
  0x27   :  { %s8718_s29 = sld [smem:[#allocation37_spill]]  ;;  %s6214_s10 = scalar_lea.vmem %s71_s4, 2304 }
  0x28   :  { %p6215_p1 = scmp.ne.s32.totalorder %s71_s4, %s6214_s10  ;;  %p6219_p2 = scmp.lt.s32.totalorder %s71_s4, %s71_s4 }
  0x29   :  { %p6220_p3 = scmp.lt.s32.totalorder %s6214_s10, %s6214_s10 }
  0x2b   :  { %p6221_p4 = por %p6220_p3, %p6219_p2 }
  0x2d   :  { %44 = dma.hbm_to_vmem [thread:$0]  %s8718_s29, 4096, %s39_s26, [#allocation5], %s6276_s1, %s6276_s1, %s6277_s21  }
  0x2e   :  { %p6222_p5 = pnand %p6221_p4, %p6215_p1 }
  0x30   :  { %6225 = shalt.err (!%p6222_p5)
}
  0x31   :  { %76 = dma.hbm_to_vmem [thread:$0]  %s8673_s8, 2304, %s71_s4, [#allocation7], %s6276_s1, %s6276_s1, %s6277_s21  }
  0x32   :  { %s6280_s2 = smov [#allocation11]  }
  0x33   :  { %s98_s22 = sshll.u32 %s6280_s2, 4  ;;  %s99_s22 = int_to_ptr.vmem [resolvable:$true] %s98_s22 }
  0x34   :  { %s6234_s23 = scalar_lea.vmem %s99_s22, 1024  ;;  %p6239_p7 = scmp.lt.s32.totalorder %s99_s22, %s99_s22 }
  0x35   :  { %p6235_p6 = scmp.ne.s32.totalorder %s99_s22, %s6234_s23  ;;  %p6240_p8 = scmp.lt.s32.totalorder %s6234_s23, %s6234_s23 }
  0x37   :  { %p6241_p9 = por %p6240_p8, %p6239_p7 }
  0x39   :  { %p6242_p10 = pnand %p6241_p9, %p6235_p6 }
  0x3b   :  { %6245 = shalt.err (!%p6242_p10)
}
  0x3c   :  { %s6281_s24 = smov 128   ;;  %s6282_s3 = smov 8  }
  0x3d   :  { %104 = dma.hbm_to_vmem [thread:$0]  %s8677_s12, 1024, %s99_s22, [#allocation10], %s6281_s24, %s6281_s24, %s6282_s3  }
  0x3e   :  { %s6283_s27 = smov [#allocation12]  }
  0x3f   :  { %s112_s6 = sshll.u32 %s6283_s27, 4  ;;  %s113_s6 = int_to_ptr.vmem [resolvable:$true] %s112_s6 }
  0x40   :  { %s6254_s8 = scalar_lea.vmem %s113_s6, 2048  ;;  %p6259_p12 = scmp.lt.s32.totalorder %s113_s6, %s113_s6 }
  0x41   :  { %p6255_p11 = scmp.ne.s32.totalorder %s113_s6, %s6254_s8  ;;  %p6260_p13 = scmp.lt.s32.totalorder %s6254_s8, %s6254_s8 }
  0x43   :  { %p6261_p0 = por %p6260_p13, %p6259_p12 }
  0x45   :  { %p6262_p1 = pnand %p6261_p0, %p6255_p11 }
  0x47   :  { %6265 = shalt.err (!%p6262_p1)
}
  0x48   :  { %118 = dma.hbm_to_vmem [thread:$0]  %s8679_s14, 2048, %s113_s6, [#allocation13], %s6281_s24, %s6281_s24, %s6282_s3  }
  0x49   :  { %6266 = dma.done.wait [#allocation5], 4096  }
  0x4a   :  { %6267 = vsyncadd [#allocation5], 4294963200 }
  0x4b   :  { %6268 = dma.done.wait [#allocation7], 4608  }
  0x4c   :  { %6269 = vsyncadd [#allocation7], 4294962688 }
  0x4d   :  { %6270 = dma.done.wait [#allocation10], 3328  }
  0x4e   :  { %6271 = vsyncadd [#allocation10], 4294963968 }
  0x4f   :  { %6272 = dma.done.wait [#allocation13], 2048  }
  0x50   :  { %6273 = vsyncadd [#allocation13], 4294965248  ;;  %vm148_vm0 = vcmask 517120   ;;  %s8719_s0 = sld [smem:[#allocation36_spill]]  ;;  %v6032_v3 = vld [vmem:[#allocation4 + $0x18] sm:$0xff]   ;;  %v8687_v4 = vmov 0.0  }
  0x51   :  { %5323 = vmatprep.subr.bf16.mxu0 %v8687_v4  ;;  %v6033_v5 = vld [vmem:[#allocation4 + $0x10] sm:$0xff]   ;;  %vm6285_vm1 = vmmov 0   ;;  %5335 = vmatprep.subr.bf16.mxu1 %v8687_v4  ;;  %v6034_v6 = vld [vmem:[#allocation4 + $0x8] sm:$0xff]   ;;  %v6035_v7 = vld [vmem:[#allocation4] sm:$0xff]   ;;  %vm197_vm2 = vcmask 523264   ;;  %s8720_s10 = sld [smem:[#allocation38_spill]] }
  0x52   :  { %5331 = vmatprep.mubr.msk.bf16.mxu0 %vm6285_vm1, %v8687_v4  ;;  %5324 = vmatpush3.bf16.msra.mxu0 %v6032_v3  ;;  %v6036_v8 = vld [vmem:[#allocation4 + $0x38] sm:$0xff]   ;;  %v6037_v9 = vld [vmem:[#allocation4 + $0x30] sm:$0xff]   ;;  %v6038_v16 = vld [vmem:[#allocation4 + $0x28] sm:$0xff]   ;;  %vm965_vm10 = vcmask 261120   ;;  %s6287_s21 = smov 32   ;;  %s6288_s4 = smov 96  }
  0x53   :  { %5325 = vmatprep.subr.bf16.mxu0 %v8687_v4  ;;  %5343 = vmatprep.mubr.msk.bf16.mxu1 %vm6285_vm1, %v8687_v4  ;;  %v6039_v17 = vld [vmem:[#allocation4 + $0x20] sm:$0xff]   ;;  %v6040_v18 = vld [vmem:[#allocation4 + $0x58] sm:$0xff]   ;;  %v6041_v19 = vld [vmem:[#allocation4 + $0x50] sm:$0xff]   ;;  %966 = vst.msk [vmem:[#allocation2] sm:$0xff] %vm965_vm10, %v8687_v4  ;;  %vm1110_vm12 = vcmask 257024   ;;  %s8767_s24 = sld [smem:[#allocation35_spill]] }
  0x54   :  { %5336 = vmatpush3.bf16.msra.mxu1 %v6036_v8  ;;  %v6042_v29 = vld [vmem:[#allocation4 + $0x48] sm:$0xff]   ;;  %v6043_v30 = vld [vmem:[#allocation4 + $0x40] sm:$0xff]   ;;  %v6044_v31 = vld [vmem:[#allocation4 + $0x78] sm:$0xff]   ;;  %969 = vst.msk [vmem:[#allocation2 + $0x10] sm:$0xff] %vm965_vm10, %v8687_v4 }
  0x55   :  { %5337 = vmatprep.subr.bf16.mxu1 %v8687_v4  ;;  %v6045_v32 = vld [vmem:[#allocation4 + $0x70] sm:$0xff]   ;;  %v6046_v42 = vld [vmem:[#allocation4 + $0x68] sm:$0xff]   ;;  %v6047_v43 = vld [vmem:[#allocation4 + $0x60] sm:$0xff]   ;;  %971 = vst.msk [vmem:[#allocation2 + $0x20] sm:$0xff] %vm965_vm10, %v8687_v4 }
  0x56   :  { %v146_v0 = vld [vmem:[%s8719_s0] sm:$0x3]  ;;  %5326 = vmatpush3.bf16.msra.mxu0 %v6033_v5  ;;  %v6048_v44 = vld [vmem:[#allocation4 + $0x98] sm:$0xff]   ;;  %v6049_v45 = vld [vmem:[#allocation4 + $0x90] sm:$0xff]   ;;  %973 = vst.msk [vmem:[#allocation2 + $0x30] sm:$0xff] %vm965_vm10, %v8687_v4 }
  0x57   :  { %v147_v1 = vmul.f32 %v146_v0, %v146_v0  ;;  %5327 = vmatprep.subr.bf16.mxu0 %v8687_v4  ;;  %v4886_v20 = vld [vmem:[%s8720_s10] ss:$0 sm:$0xff]  ;;  %v4893_v33 = vld [vmem:[%s8720_s10 + $0x1] ss:$0 sm:$0xff]  ;;  %v4900_v46 = vld [vmem:[%s8720_s10 + $0x2] ss:$0 sm:$0xff] }
  0x58   :  { %5338 = vmatpush3.bf16.msra.mxu1 %v6037_v9  ;;  %v6050_v55 = vld [vmem:[#allocation4 + $0x88] sm:$0xff]   ;;  %v6051_v56 = vld [vmem:[#allocation4 + $0x80] sm:$0xff]   ;;  %v6052_v57 = vld [vmem:[#allocation4 + $0xb8] sm:$0xff]   ;;  %975 = vst.msk [vmem:[#allocation2 + $0x40] sm:$0xff] %vm965_vm10, %v8687_v4 }
  0x59   :  { %v149_v2 = vsel %vm148_vm0, %v147_v1, 0.0  ;;  %5339 = vmatprep.subr.bf16.mxu1 %v8687_v4  ;;  %v6053_v58 = vld [vmem:[#allocation4 + $0xb0] sm:$0xff]   ;;  %v4907_v59 = vld [vmem:[%s8720_s10 + $0x3] ss:$0 sm:$0xff]  ;;  %v6054_v5 = vld [vmem:[#allocation4 + $0xa8] sm:$0xff]   ;;  %977 = vst.msk [vmem:[#allocation2 + $0x50] sm:$0xff] %vm965_vm10, %v8687_v4 }
  0x5a   :  { %150 = vadd.xlane.f32.xlu0 %v149_v2  ;;  %5328 = vmatpush3.bf16.msra.mxu0 %v6034_v6  ;;  %v6055_v6 = vld [vmem:[#allocation4 + $0xa0] sm:$0xff]   ;;  %v6057_v8 = vld [vmem:[#allocation4 + $0xd0] sm:$0xff]   ;;  %979 = vst.msk [vmem:[#allocation2 + $0x60] sm:$0xff] %vm965_vm10, %v8687_v4  ;;  %981 = vst.msk [vmem:[#allocation2 + $0x70] sm:$0xff] %vm965_vm10, %v8687_v4  ;;  %s4737_s3 = ssub.f32 1.0, %s8767_s24 }
  0x5b   :  { %5329 = vmatprep.subr.bf16.mxu0 %v8687_v4  ;;  %v4914_v9 = vld [vmem:[%s8720_s10 + $0x4] ss:$0 sm:$0xff]  ;;  %983 = vst.msk [vmem:[#allocation2 + $0x80] sm:$0xff] %vm965_vm10, %v8687_v4  ;;  %985 = vst.msk [vmem:[#allocation2 + $0x90] sm:$0xff] %vm965_vm10, %v8687_v4 }
  0x5c   :  { %5340 = vmatpush3.bf16.msra.mxu1 %v6038_v16  ;;  %987 = vst.msk [vmem:[#allocation2 + $0xa0] sm:$0xff] %vm965_vm10, %v8687_v4  ;;  %989 = vst.msk [vmem:[#allocation2 + $0xb0] sm:$0xff] %vm965_vm10, %v8687_v4 }
  0x5d   :  { %5341 = vmatprep.subr.bf16.mxu1 %v8687_v4  ;;  %991 = vst.msk [vmem:[#allocation2 + $0xc0] sm:$0xff] %vm965_vm10, %v8687_v4  ;;  %993 = vst.msk [vmem:[#allocation2 + $0xd0] sm:$0xff] %vm965_vm10, %v8687_v4 }
  0x5e   :  { %5330 = vmatpush3.bf16.msra.mxu0 %v6035_v7  ;;  %v6056_v7 = vld [vmem:[#allocation4 + $0xd8] sm:$0xff]   ;;  %995 = vst.msk [vmem:[#allocation2 + $0xe0] sm:$0xff] %vm965_vm10, %v8687_v4  ;;  %997 = vst.msk [vmem:[#allocation2 + $0xf0] sm:$0xff] %vm965_vm10, %v8687_v4 }
  0x5f   :  { %5347 = vmatprep.subr.bf16.mxu0 %v8687_v4  ;;  %999 = vst.msk [vmem:[#allocation2 + $0x100] sm:$0xff] %vm965_vm10, %v8687_v4  ;;  %1001 = vst.msk [vmem:[#allocation2 + $0x110] sm:$0xff] %vm965_vm10, %v8687_v4 }
  0x60   :  { %5342 = vmatpush3.bf16.msra.mxu1 %v6039_v17  ;;  %1003 = vst.msk [vmem:[#allocation2 + $0x120] sm:$0xff] %vm965_vm10, %v8687_v4  ;;  %1005 = vst.msk [vmem:[#allocation2 + $0x130] sm:$0xff] %vm965_vm10, %v8687_v4 }
  0x61   :  { %5359 = vmatprep.subr.bf16.mxu1 %v8687_v4 }
  0xe3   :  { %v151_v10 = vpop.xlane.xlu0 %150 }
  0xe4   :  { %v153_v11 = vmul.f32 0.015625, %v151_v10 }
  0xe6   :  { %v154_v12 = vadd.f32 1e-08, %v153_v11 }
  0xe8   :  { %6130 = vrsqrt.f32 %v154_v12 }
  0xf5   :  { %v6131_v13 = vpop.eup %6130 }
  0xf6   :  { %v156_v14 = vmul.f32 %v6131_v13, %v146_v0 }
  0xf8   :  { %v157_v15 = vpack.c.bf16 %v156_v14, %v156_v14 }
  0xfa   :  { %5332 = vmatmul.mubr.msk.bf16.vlgmr.msra.gmra.mxu0 %vm197_vm2, %v157_v15 }
  0xfb   :  { %5355 = vmatprep.mubr.msk.bf16.mxu0 %vm6285_vm1, %v8687_v4  ;;  %5348 = vmatpush3.bf16.msra.mxu0 %v6040_v18  ;;  %v6058_v18 = vld [vmem:[#allocation4 + $0xc8] sm:$0xff]  }
  0xfc   :  { %5349 = vmatprep.subr.bf16.mxu0 %v8687_v4 }
  0xff   :  { %5350 = vmatpush3.bf16.msra.mxu0 %v6041_v19  ;;  %v6059_v19 = vld [vmem:[#allocation4 + $0xc0] sm:$0xff]  }
 0x100   :  { %5351 = vmatprep.subr.bf16.mxu0 %v8687_v4 }
 0x103   :  { %5352 = vmatpush3.bf16.msra.mxu0 %v6042_v29 }
 0x104   :  { %5353 = vmatprep.subr.bf16.mxu0 %v8687_v4 }
 0x107   :  { %5354 = vmatpush3.bf16.msra.mxu0 %v6043_v30 }
 0x108   :  { %5371 = vmatprep.subr.bf16.mxu0 %v8687_v4 }
 0x1ba   :  { %v235_v21 = vpop.f32.mrf.mxu0 }
 0x1bb   :  { %v236_v22 = vadd.f32 %v4886_v20, %v235_v21  ;;  %v6060_v20 = vld [vmem:[#allocation4 + $0xf8] sm:$0xff]   ;;  %v6061_v21 = vld [vmem:[#allocation4 + $0xf0] sm:$0xff]  }
 0x1bc   :  { %v5333_v23 = vpop.f32.mrf.mxu0 }
 0x1bd   :  { %vm241_vm3 = vcmp.ge.f32.partialorder %v236_v22, 0.0  ;;  %v242_v24 = vmul.f32 0.2, %v236_v22 }
 0x1be   :  { %v238_v25 = vpop.f32.mrf.mxu0 }
 0x1bf   :  { %v243_v26 = vsel %vm241_vm3, %v236_v22, %v242_v24  ;;  %v4921_v22 = vld [vmem:[%s8720_s10 + $0x5] ss:$0 sm:$0xff]  ;;  %vm1372_vm3 = vcmask 785408  }
 0x1c0   :  { %v244_v27 = vpack.c.bf16 %v243_v26, %v243_v26  ;;  %v5334_v28 = vpop.f32.mrf.mxu0 }
 0x1c2   :  { %5344 = vmatmul.mubr.msk.bf16.vlgmr.msra.gmra.mxu1 %vm197_vm2, %v244_v27 }
 0x1c3   :  { %5367 = vmatprep.mubr.msk.bf16.mxu1 %vm6285_vm1, %v8687_v4  ;;  %5360 = vmatpush3.bf16.msra.mxu1 %v6044_v31  ;;  %v6062_v31 = vld [vmem:[#allocation4 + $0xe8] sm:$0xff]  }
 0x1c4   :  { %5361 = vmatprep.subr.bf16.mxu1 %v8687_v4 }
 0x1c7   :  { %5362 = vmatpush3.bf16.msra.mxu1 %v6045_v32  ;;  %v6063_v32 = vld [vmem:[#allocation4 + $0xe0] sm:$0xff]  }
 0x1c8   :  { %5363 = vmatprep.subr.bf16.mxu1 %v8687_v4 }
 0x1cb   :  { %5364 = vmatpush3.bf16.msra.mxu1 %v6046_v42 }
 0x1cc   :  { %5365 = vmatprep.subr.bf16.mxu1 %v8687_v4 }
 0x1cf   :  { %5366 = vmatpush3.bf16.msra.mxu1 %v6047_v43 }
 0x1d0   :  { %5383 = vmatprep.subr.bf16.mxu1 %v8687_v4 }
 0x282   :  { %v323_v34 = vpop.f32.mrf.mxu1 }
 0x283   :  { %v324_v35 = vadd.f32 %v4893_v33, %v323_v34  ;;  %v6064_v33 = vld [vmem:[#allocation11 + $0x30] ss:$8 sps:$4 sm:$0xff]   ;;  %v6066_v34 = vld [vmem:[#allocation11 + $0x34] ss:$8 sps:$4 sm:$0xff]  }
 0x284   :  { %v5345_v36 = vpop.f32.mrf.mxu1 }
 0x285   :  { %vm329_vm4 = vcmp.ge.f32.partialorder %v324_v35, 0.0  ;;  %v330_v37 = vmul.f32 0.2, %v324_v35  ;;  %v6067_v36 = vld [vmem:[#allocation11 + $0x20] ss:$8 sps:$4 sm:$0xff]  }
 0x286   :  { %v326_v38 = vpop.f32.mrf.mxu1 }
 0x287   :  { %v331_v39 = vsel %vm329_vm4, %v324_v35, %v330_v37  ;;  %v6069_v35 = vld [vmem:[#allocation11 + $0x24] ss:$8 sps:$4 sm:$0xff]   ;;  %v4928_v37 = vld [vmem:[%s8720_s10 + $0x6] ss:$0 sm:$0xff] }
 0x288   :  { %v332_v40 = vpack.c.bf16 %v331_v39, %v331_v39  ;;  %v5346_v41 = vpop.f32.mrf.mxu1 }
 0x28a   :  { %5356 = vmatmul.mubr.msk.bf16.vlgmr.msra.gmra.mxu0 %vm197_vm2, %v332_v40 }
 0x28b   :  { %5379 = vmatprep.mubr.msk.bf16.mxu0 %vm6285_vm1, %v8687_v4  ;;  %5372 = vmatpush3.bf16.msra.mxu0 %v6048_v44 }
 0x28c   :  { %5373 = vmatprep.subr.bf16.mxu0 %v8687_v4 }
 0x28f   :  { %5374 = vmatpush3.bf16.msra.mxu0 %v6049_v45 }
 0x290   :  { %5375 = vmatprep.subr.bf16.mxu0 %v8687_v4 }
 0x293   :  { %5376 = vmatpush3.bf16.msra.mxu0 %v6050_v55  ;;  %v4935_v55 = vld [vmem:[%s8720_s10 + $0x7] ss:$0 sm:$0xff] }
 0x294   :  { %5377 = vmatprep.subr.bf16.mxu0 %v8687_v4 }
 0x297   :  { %5378 = vmatpush3.bf16.msra.mxu0 %v6051_v56 }
 0x298   :  { %5395 = vmatprep.subr.bf16.mxu0 %v8687_v4 }
 0x34a   :  { %v411_v47 = vpop.f32.mrf.mxu0 }
 0x34b   :  { %v412_v48 = vadd.f32 %v4900_v46, %v411_v47  ;;  %v6072_v46 = vld [vmem:[#allocation11 + $0x14] ss:$8 sps:$4 sm:$0xff]   ;;  %v6070_v47 = vld [vmem:[#allocation11 + $0x10] ss:$8 sps:$4 sm:$0xff]  }
 0x34c   :  { %v5357_v49 = vpop.f32.mrf.mxu0 }
 0x34d   :  { %vm417_vm5 = vcmp.ge.f32.partialorder %v412_v48, 0.0  ;;  %v418_v50 = vmul.f32 0.2, %v412_v48  ;;  %v6073_v49 = vld [vmem:[#allocation11] ss:$8 sps:$4 sm:$0xff]  }
 0x34e   :  { %v414_v51 = vpop.f32.mrf.mxu0 }
 0x34f   :  { %v419_v52 = vsel %vm417_vm5, %v412_v48, %v418_v50  ;;  %v6075_v48 = vld [vmem:[#allocation11 + $0x4] ss:$8 sps:$4 sm:$0xff]   ;;  %v6286_v50 = vmov 0   ;;  %v6540_v51 = vld [vmem:[#allocation2] sm:$0x3f] }
 0x350   :  { %v420_v53 = vpack.c.bf16 %v419_v52, %v419_v52  ;;  %v5358_v54 = vpop.f32.mrf.mxu0  ;;  %6030 = vset.pattern.permute.xlu1 %v6286_v50  ;;  %6031 = vset.pattern.permute.xlu0 %v6286_v50  ;;  %v1176_v52 = vrot.slane %v6540_v51, 1 }
 0x352   :  { %5368 = vmatmul.mubr.msk.bf16.vlgmr.msra.gmra.mxu1 %vm197_vm2, %v420_v53  ;;  %1184 = vrot.lane.b32.xlu1 %v1176_v52, %s6287_s21  ;;  %v6544_v53 = vld [vmem:[#allocation2 + $0x50] sm:$0x3f] }
 0x353   :  { %5391 = vmatprep.mubr.msk.bf16.mxu1 %vm6285_vm1, %v8687_v4  ;;  %5384 = vmatpush3.bf16.msra.mxu1 %v6052_v57  ;;  %v1328_v54 = vrot.slane %v6544_v53, 1 }
 0x354   :  { %5385 = vmatprep.subr.bf16.mxu1 %v8687_v4 }
 0x356   :  { %1310 = vrot.lane.b32.xlu1 %v6544_v53, %s6276_s1 }
 0x357   :  { %5386 = vmatpush3.bf16.msra.mxu1 %v6053_v58 }
 0x358   :  { %5387 = vmatprep.subr.bf16.mxu1 %v8687_v4 }
 0x35a   :  { %1336 = vrot.lane.b32.xlu1 %v1328_v54, %s6288_s4 }
 0x35b   :  { %5388 = vmatpush3.bf16.msra.mxu1 %v6054_v5  ;;  %v6289_v5 = vmov 1966171168  }
 0x35c   :  { %5389 = vmatprep.subr.bf16.mxu1 %v8687_v4 }
 0x35f   :  { %5390 = vmatpush3.bf16.msra.mxu1 %v6055_v6  ;;  %v1011_v6 = vunpack.c.l.s4 %v6289_v5 }
 0x360   :  { %5407 = vmatprep.subr.bf16.mxu1 %v8687_v4 }
 0x412   :  { %v499_v60 = vpop.f32.mrf.mxu1 }
 0x413   :  { %v500_v61 = vadd.f32 %v4907_v59, %v499_v60 }
 0x414   :  { %v5369_v62 = vpop.f32.mrf.mxu1 }
 0x415   :  { %vm505_vm6 = vcmp.ge.f32.partialorder %v500_v61, 0.0  ;;  %v506_v63 = vmul.f32 0.2, %v500_v61 }
 0x416   :  { %v502_v0 = vpop.f32.mrf.mxu1 }
 0x417   :  { %v507_v1 = vsel %vm505_vm6, %v500_v61, %v506_v63  ;;  %v6554_v0 = vld [vmem:[#allocation2 + $0xf0] sm:$0x3f] }
 0x418   :  { %v508_v2 = vpack.c.bf16 %v507_v1, %v507_v1  ;;  %v5370_v3 = vpop.f32.mrf.mxu1  ;;  %1318 = vrot.lane.b32.xlu1 %v6554_v0, %s6276_s1  ;;  %v1329_v1 = vrot.slane %v6554_v0, 1 }
 0x41a   :  { %5380 = vmatmul.mubr.msk.bf16.vlgmr.msra.gmra.mxu0 %vm197_vm2, %v508_v2  ;;  %v871_v2 = vlaneseq }
 0x41b   :  { %5403 = vmatprep.mubr.msk.bf16.mxu0 %vm6285_vm1, %v8687_v4  ;;  %5396 = vmatpush3.bf16.msra.mxu0 %v6056_v7 }
 0x41c   :  { %5397 = vmatprep.subr.bf16.mxu0 %v8687_v4  ;;  %1344 = vrot.lane.b32.xlu1 %v1329_v1, %s6288_s4  ;;  %v872_v3 = vshrl.u32 %v871_v2, 7 }
 0x41e   :  { %v6560_v7 = vsub.s32 0, %v872_v3 }
 0x41f   :  { %5398 = vmatpush3.bf16.msra.mxu0 %v6057_v8  ;;  %v869_v8 = vld [vmem:[%s8678_s13] sm:$0x3] }
 0x420   :  { %5399 = vmatprep.subr.bf16.mxu0 %v8687_v4 }
 0x423   :  { %5400 = vmatpush3.bf16.msra.mxu0 %v6058_v18 }
 0x424   :  { %5401 = vmatprep.subr.bf16.mxu0 %v8687_v4 }
 0x427   :  { %5402 = vmatpush3.bf16.msra.mxu0 %v6059_v19 }
 0x428   :  { %932 = vmatprep.subr.bf16.mxu0 %v6066_v34  ;;  %v1008_v34 = vld [vmem:[%s8670_s5 + $0x8] sm:$0xff] }
 0x4da   :  { %v587_v10 = vpop.f32.mrf.mxu0 }
 0x4db   :  { %v588_v11 = vadd.f32 %v4914_v9, %v587_v10  ;;  %v1012_v9 = vunpack.c.0.s8 %v1011_v6  ;;  %v877_v10 = vsub.s32 1, %v872_v3 }
 0x4dc   :  { %v5381_v12 = vpop.f32.mrf.mxu0 }
 0x4dd   :  { %vm593_vm7 = vcmp.ge.f32.partialorder %v588_v11, 0.0  ;;  %v594_v13 = vmul.f32 0.2, %v588_v11  ;;  %v6566_v12 = vsub.s32 %v1012_v9, %v872_v3 }
 0x4de   :  { %v590_v14 = vpop.f32.mrf.mxu0 }
 0x4df   :  { %v595_v15 = vsel %vm593_vm7, %v588_v11, %v594_v13  ;;  %v874_v11 = vrot.slane %v869_v8, %v6560_v7  ;;  %8721 = vst [vmem:[#allocation18_spill] sm:$0xff] %v6566_v12  ;;  %v878_v13 = vrot.slane %v869_v8, %v877_v10 }
 0x4e0   :  { %v596_v16 = vpack.c.bf16 %v595_v15, %v595_v15  ;;  %v5382_v17 = vpop.f32.mrf.mxu0 }
 0x4e2   :  { %5392 = vmatmul.mubr.msk.bf16.vlgmr.msra.gmra.mxu1 %vm197_vm2, %v596_v16 }
 0x4e3   :  { %5415 = vmatprep.mubr.msk.bf16.mxu1 %vm6285_vm1, %v8687_v4  ;;  %5408 = vmatpush3.bf16.msra.mxu1 %v6060_v20 }
 0x4e4   :  { %5409 = vmatprep.subr.bf16.mxu1 %v8687_v4 }
 0x4e7   :  { %5410 = vmatpush3.bf16.msra.mxu1 %v6061_v21 }
 0x4e8   :  { %5411 = vmatprep.subr.bf16.mxu1 %v8687_v4 }
 0x4eb   :  { %5412 = vmatpush3.bf16.msra.mxu1 %v6062_v31  ;;  %v6590_v31 = vld [vmem:[#allocation2 + $0xa0] sm:$0x3f] }
 0x4ec   :  { %5413 = vmatprep.subr.bf16.mxu1 %v8687_v4 }
 0x4ef   :  { %5414 = vmatpush3.bf16.msra.mxu1 %v6063_v32  ;;  %v1180_v32 = vrot.slane %v6590_v31, 1 }
 0x5a2   :  { %v675_v23 = vpop.f32.mrf.mxu1 }
 0x5a3   :  { %v676_v24 = vadd.f32 %v4921_v22, %v675_v23 }
 0x5a4   :  { %v5393_v25 = vpop.f32.mrf.mxu1 }
 0x5a5   :  { %vm681_vm8 = vcmp.ge.f32.partialorder %v676_v24, 0.0  ;;  %v682_v26 = vmul.f32 0.2, %v676_v24 }
 0x5a6   :  { %v678_v27 = vpop.f32.mrf.mxu1 }
 0x5a7   :  { %v683_v28 = vsel %vm681_vm8, %v676_v24, %v682_v26  ;;  %vm967_vm8 = vcmask 254976  }
 0x5a8   :  { %v684_v29 = vpack.c.bf16 %v683_v28, %v683_v28  ;;  %v5394_v30 = vpop.f32.mrf.mxu1 }
 0x5a9   :  { %v1208_v30 = vrot.slane %v6540_v51, 2 }
 0x5aa   :  { %5404 = vmatmul.mubr.msk.bf16.vlgmr.msra.gmra.mxu0 %vm197_vm2, %v684_v29 }
 0x5ab   :  { %933 = vmatpush1.bf16.msra.mxu0 %v6064_v33  ;;  %956 = vmatprep.mubr.bf16.mxu0 %v6286_v50  ;;  %v1007_v33 = vld [vmem:[%s8670_s5] sm:$0xff] }
 0x5ac   :  { %934 = vmatprep.subr.bf16.mxu0 %v6069_v35  ;;  %v1212_v35 = vrot.slane %v6590_v31, 2 }
 0x5af   :  { %935 = vmatpush1.bf16.msra.mxu0 %v6067_v36  ;;  %v1032_v36 = vsel %vm965_vm10, %v1007_v33, 0.0 }
 0x5b0   :  { %936 = vmatprep.subr.bf16.mxu0 %v6072_v46 }
 0x5b3   :  { %937 = vmatpush1.bf16.msra.mxu0 %v6070_v47 }
 0x5b4   :  { %938 = vmatprep.subr.bf16.mxu0 %v6075_v48 }
 0x5b7   :  { %939 = vmatpush1.bf16.msra.mxu0 %v6073_v49 }
 0x66a   :  { %v763_v38 = vpop.f32.mrf.mxu0 }
 0x66b   :  { %v764_v39 = vadd.f32 %v4928_v37, %v763_v38  ;;  %v1033_v37 = vsel %vm965_vm10, %v1008_v34, 0.0 }
 0x66c   :  { %v5405_v40 = vpop.f32.mrf.mxu0  ;;  %v1034_v38 = vadd.f32 %v1033_v37, %v1032_v36 }
 0x66d   :  { %vm769_vm9 = vcmp.ge.f32.partialorder %v764_v39, 0.0  ;;  %v770_v41 = vmul.f32 0.2, %v764_v39 }
 0x66e   :  { %v766_v42 = vpop.f32.mrf.mxu0 }
 0x66f   :  { %v771_v43 = vsel %vm769_vm9, %v764_v39, %v770_v41  ;;  %v1035_v39 = vrot.slane %v1034_v38, 4  ;;  %vm2216_vm9 = vcmask 1045504  }
 0x670   :  { %v772_v44 = vpack.c.bf16 %v771_v43, %v771_v43  ;;  %v5406_v45 = vpop.f32.mrf.mxu0 }
 0x671   :  { %v1036_v40 = vadd.f32 %v1035_v39, %v1034_v38 }
 0x672   :  { %5416 = vmatmul.mubr.msk.bf16.vlgmr.msra.gmra.mxu1 %vm197_vm2, %v772_v44 }
 0x673   :  { %v1037_v41 = vrot.slane %v1036_v40, 2 }
 0x675   :  { %v1038_v42 = vadd.f32 %v1037_v41, %v1036_v40  ;;  %v1354_v41 = vrot.slane %v6544_v53, 2 }
 0x677   :  { %v1039_v43 = vrot.slane %v1038_v42, 1 }
 0x679   :  { %v1040_v44 = vadd.f32 %v1039_v43, %v1038_v42 }
 0x67b   :  { %v1042_v45 = vmul.f32 0.0625, %v1040_v44 }
 0x67d   :  { %v1043_v46 = vsub.f32 %v1007_v33, %v1042_v45  ;;  %v1044_v47 = vsub.f32 %v1008_v34, %v1042_v45 }
 0x67f   :  { %v1045_v48 = vmul.f32 %v1043_v46, %v1043_v46  ;;  %v1046_v49 = vmul.f32 %v1044_v47, %v1044_v47 }
 0x681   :  { %v1047_v50 = vsel %vm965_vm10, %v1045_v48, 0.0  ;;  %v1048_v52 = vsel %vm965_vm10, %v1046_v49, 0.0 }
 0x682   :  { %v1049_v54 = vadd.f32 %v1048_v52, %v1047_v50  ;;  %v6076_v52 = vld [vmem:[#allocation6 + $0x78] sm:$0xff]  }
 0x683   :  { %5106 = vmatprep.subr.bf16.mxu1 %v6076_v52 }
 0x732   :  { %v851_v56 = vpop.f32.mrf.mxu1 }
 0x733   :  { %v852_v57 = vadd.f32 %v4935_v55, %v851_v56  ;;  %v1050_v55 = vrot.slane %v1049_v54, 4 }
 0x734   :  { %v5417_v58 = vpop.f32.mrf.mxu1 }
 0x735   :  { %vm857_vm11 = vcmp.ge.f32.partialorder %v852_v57, 0.0  ;;  %v858_v59 = vmul.f32 0.2, %v852_v57  ;;  %v1051_v56 = vadd.f32 %v1050_v55, %v1049_v54  ;;  %v6077_v54 = vld [vmem:[#allocation6 + $0x38] sm:$0xff]  }
 0x736   :  { %v854_v60 = vpop.f32.mrf.mxu1  ;;  %5107 = vmatpush3.bf16.msra.mxu1 %v6077_v54 }
 0x737   :  { %v859_v61 = vsel %vm857_vm11, %v852_v57, %v858_v59  ;;  %v1052_v57 = vrot.slane %v1051_v56, 2  ;;  %vm2119_vm11 = vcmask 1046528  }
 0x738   :  { %v860_v62 = vpack.c.bf16 %v859_v61, %v859_v61  ;;  %v5418_v63 = vpop.f32.mrf.mxu1 }
 0x739   :  { %v1053_v58 = vadd.f32 %v1052_v57, %v1051_v56  ;;  %v6078_v57 = vld [vmem:[#allocation6 + $0x70] sm:$0xff]  }
 0x73a   :  { %4949 = vmatmul.mubr.msk.bf16.vlgmr.msra.gmra.mxu0 %vm197_vm2, %v860_v62  ;;  %v6609_v62 = vpop.permute.xlu1 %1184  ;;  %5108 = vmatprep.subr.bf16.mxu1 %v6078_v57 }
 0x73b   :  { %v1054_v59 = vrot.slane %v1053_v58, 1  ;;  %v1356_v4 = vsel %vm965_vm10, %v6540_v51, %v6609_v62 }
 0x73d   :  { %v1055_v60 = vadd.f32 %v1054_v59, %v1053_v58  ;;  %v6079_v58 = vld [vmem:[#allocation6 + $0x30] sm:$0xff]  }
 0x73e   :  { %v6611_v1 = vpop.permute.xlu1 %1310  ;;  %5109 = vmatpush3.bf16.msra.mxu1 %v6079_v58 }
 0x73f   :  { %v1056_v61 = vmul.f32 0.0625, %v1055_v60  ;;  %v6080_v60 = vld [vmem:[#allocation6 + $0x68] sm:$0xff]  }
 0x740   :  { %5110 = vmatprep.subr.bf16.mxu1 %v6080_v60 }
 0x741   :  { %v1057_v63 = vadd.f32 1e-08, %v1056_v61  ;;  %v6081_v61 = vld [vmem:[#allocation6 + $0x28] sm:$0xff]  }
 0x742   :  { %v6613_v2 = vpop.permute.xlu1 %1336  ;;  %5111 = vmatpush3.bf16.msra.mxu1 %v6081_v61 }
 0x743   :  { %6132 = vrsqrt.f32 %v1057_v63  ;;  %v6082_v63 = vld [vmem:[#allocation6 + $0x60] sm:$0xff]  }
 0x744   :  { %5112 = vmatprep.subr.bf16.mxu1 %v6082_v63 }
 0x746   :  { %v6615_v3 = vpop.permute.xlu1 %1318 }
 0x74a   :  { %v6617_v9 = vpop.permute.xlu1 %1344 }
 0x750   :  { %v6133_v5 = vpop.eup %6132 }
 0x751   :  { %v1059_v6 = vmul.f32 %v6133_v5, %v1043_v46  ;;  %v1060_v8 = vmul.f32 %v6133_v5, %v1044_v47  ;;  %v6083_v5 = vld [vmem:[#allocation6 + $0x20] sm:$0xff]  }
 0x752   :  { %5113 = vmatpush3.bf16.msra.mxu1 %v6083_v5 }
 0x7fa   :  { %v958_v14 = vpop.f32.mrf.mxu0 }
 0x7fb   :  { %v959_v15 = vadd.f32 %v958_v14, %v874_v11 }
 0x7fc   :  { %v960_v16 = vpop.f32.mrf.mxu0 }
 0x7fd   :  { %v1016_v17 = vrot.slane %v959_v15, %v6566_v12  ;;  %v961_v18 = vadd.f32 %v960_v16, %v878_v13 }
 0x7fe   :  { %v962_v19 = vpop.f32.mrf.mxu0 }
 0x7ff   :  { %v1017_v20 = vcombine.high %v1016_v17, %v1016_v17  ;;  %v1024_v21 = vrot.slane %v1016_v17, %v6566_v12  ;;  %v6571_v22 = vrot.slane %v961_v18, %v6566_v12 }
 0x800   :  { %v963_v23 = vpop.f32.mrf.mxu0 }
 0x801   :  { %8722 = vst [vmem:[#allocation19_spill] sm:$0xff] %v6571_v22  ;;  %v1031_v24 = vrot.slane %v1017_v20, %v6566_v12  ;;  %v6575_v25 = vrot.slane %v1024_v21, %v6560_v7  ;;  %v3029_v26 = vcombine.high %v6571_v22, %v6571_v22 }
 0x803   :  { %v6582_v28 = vrot.slane %v1031_v24, %v6560_v7  ;;  %v6585_v29 = vrot.slane %v3029_v26, %v6566_v12  ;;  %1075 = vrot.lane.b32.xlu0 %v6575_v25, %s6288_s4  ;;  %v1071_v10 = vmul.f32 %v6575_v25, %v1059_v6  ;;  %v1072_v11 = vmul.f32 %v6575_v25, %v1060_v8 }
 0x805   :  { %8723 = vst [vmem:[#allocation20_spill] sm:$0xff] %v6585_v29  ;;  %1077 = vrot.lane.b32.xlu1 %v6582_v28, %s6288_s4  ;;  %v1073_v17 = vmul.f32 %v6582_v28, %v1059_v6  ;;  %v1074_v18 = vmul.f32 %v6582_v28, %v1060_v8  ;;  %v6084_v6 = vld [vmem:[#allocation6 + $0x58] sm:$0xff]  }
 0x806   :  { %v6085_v8 = vld [vmem:[#allocation6 + $0x18] sm:$0xff]   ;;  %5114 = vmatprep.subr.bf16.mxu1 %v6084_v6 }
 0x807   :  { %1216 = vrot.lane.b32.xlu0 %v1208_v30, %s6276_s1  ;;  %5115 = vmatpush3.bf16.msra.mxu1 %v6085_v8 }
 0x80b   :  { %1192 = vrot.lane.b32.xlu0 %v1180_v32, %s6287_s21 }
 0x80f   :  { %1224 = vrot.lane.b32.xlu0 %v1212_v35, %s6276_s1 }
 0x875   :  { %v6621_v13 = vpop.permute.xlu0 %1075 }
 0x876   :  { %v1081_v14 = vadd.f32 %v6621_v13, %v1071_v10  ;;  %v1082_v15 = vadd.f32 %v6621_v13, %v1072_v11  ;;  %v6086_v11 = vld [vmem:[#allocation6 + $0x50] sm:$0xff]  }
 0x877   :  { %v6625_v16 = vpop.permute.xlu1 %1077  ;;  %5116 = vmatprep.subr.bf16.mxu1 %v6086_v11 }
 0x878   :  { %vm1085_vm13 = vcmp.ge.f32.partialorder %v1081_v14, 0.0  ;;  %vm1086_vm14 = vcmp.ge.f32.partialorder %v1082_v15, 0.0  ;;  %v1089_v19 = vmul.f32 0.2, %v1081_v14  ;;  %v1090_v20 = vmul.f32 0.2, %v1082_v15 }
 0x879   :  { %v1083_v21 = vadd.f32 %v6625_v16, %v1073_v17  ;;  %v1084_v23 = vadd.f32 %v6625_v16, %v1074_v18  ;;  %v6088_v18 = vld [vmem:[#allocation6 + $0x48] sm:$0xff]  }
 0x87a   :  { %v1093_v24 = vsel %vm1085_vm13, %v1081_v14, %v1089_v19  ;;  %v1094_v26 = vsel %vm1086_vm14, %v1082_v15, %v1090_v20  ;;  %v6087_v14 = vld [vmem:[#allocation6 + $0x10] sm:$0xff]   ;;  %v6089_v19 = vld [vmem:[#allocation6 + $0x8] sm:$0xff]  }
 0x87b   :  { %v1101_v30 = vcombine.high %v1093_v24, %v1093_v24  ;;  %v1102_v32 = vcombine.high %v1094_v26, %v1094_v26  ;;  %1111 = vst.msk [vmem:[#allocation2 + $0x11] sm:$0xf] %vm1110_vm12, %v1093_v24  ;;  %1113 = vst.msk [vmem:[#allocation2 + $0x31] sm:$0xf] %vm1110_vm12, %v1094_v26  ;;  %vm1087_vm15 = vcmp.ge.f32.partialorder %v1083_v21, 0.0  ;;  %vm1088_vm0 = vcmp.ge.f32.partialorder %v1084_v23, 0.0  ;;  %5117 = vmatpush3.bf16.msra.mxu1 %v6087_v14 }
 0x87c   :  { %v1091_v33 = vmul.f32 0.2, %v1083_v21  ;;  %v1092_v34 = vmul.f32 0.2, %v1084_v23  ;;  %5118 = vmatprep.subr.bf16.mxu1 %v6088_v18 }
 0x87d   :  { %1112 = vst.msk [vmem:[#allocation2 + $0x21] sm:$0xf] %vm1110_vm12, %v1101_v30  ;;  %1114 = vst.msk [vmem:[#allocation2 + $0x41] sm:$0xf] %vm1110_vm12, %v1102_v32 }
 0x87e   :  { %v1095_v35 = vsel %vm1087_vm15, %v1083_v21, %v1091_v33  ;;  %v1096_v36 = vsel %vm1088_vm0, %v1084_v23, %v1092_v34  ;;  %v6090_v21 = vld [vmem:[#allocation6 + $0x40] sm:$0xff]  }
 0x87f   :  { %v1103_v37 = vcombine.high %v1095_v35, %v1095_v35  ;;  %v1104_v38 = vcombine.high %v1096_v36, %v1096_v36  ;;  %1115 = vst.msk [vmem:[#allocation2 + $0xb1] sm:$0xf] %vm1110_vm12, %v1095_v35  ;;  %1117 = vst.msk [vmem:[#allocation2 + $0xd1] sm:$0xf] %vm1110_vm12, %v1096_v36  ;;  %5119 = vmatpush3.bf16.msra.mxu1 %v6089_v19  ;;  %v6091_v23 = vld [vmem:[#allocation6] sm:$0xff]   ;;  %v6761_v36 = vld [vmem:[#allocation6 + $0x88] sm:$0xff]  }
 0x880   :  { %5120 = vmatprep.subr.bf16.mxu1 %v6090_v21 }
 0x881   :  { %1116 = vst.msk [vmem:[#allocation2 + $0xc1] sm:$0xf] %vm1110_vm12, %v1103_v37  ;;  %1118 = vst.msk [vmem:[#allocation2 + $0xe1] sm:$0xf] %vm1110_vm12, %v1104_v38  ;;  %v1217_v38 = vpop.permute.xlu0 %1216 }
 0x882   :  { %v6639_v39 = vld [vmem:[#allocation2 + $0x10] sm:$0x3f] }
 0x883   :  { %v6641_v40 = vld [vmem:[#allocation2 + $0x30] sm:$0x3f]  ;;  %1242 = vrot.lane.b32.xlu0 %v6639_v39, %s6288_s4  ;;  %v1209_v44 = vrot.slane %v6639_v39, 2  ;;  %v8693_v50 = vrot.slane %v6639_v39, 1  ;;  %5121 = vmatpush3.bf16.msra.mxu1 %v6091_v23  ;;  %v8724_v12 = vrot.slane %v6639_v39, 1 }
 0x884   :  { %1306 = vrot.lane.b32.xlu1 %v6641_v40, %s6276_s1  ;;  %v6648_v42 = vld [vmem:[#allocation2 + $0x20] sm:$0x3f]  ;;  %v1211_v45 = vrot.slane %v6641_v40, 2  ;;  %v6676_v55 = vrot.slane %v6641_v40, 1  ;;  %5419 = vmatprep.subr.bf16.mxu1 %v6761_v36 }
 0x885   :  { %v6650_v43 = vld [vmem:[#allocation2 + $0x40] sm:$0x3f]  ;;  %v6655_v46 = vrot.slane %v6648_v42, 2  ;;  %v6685_v59 = vrot.slane %v6648_v42, 1 }
 0x886   :  { %v1276_v47 = vrot.slane %v6650_v43, 2  ;;  %v6678_v56 = vld [vmem:[#allocation2 + $0xb0] sm:$0x3f]  ;;  %v8692_v10 = vrot.slane %v6650_v43, 1 }
 0x887   :  { %1246 = vrot.lane.b32.xlu0 %v6641_v40, %s6288_s4  ;;  %v1431_v53 = vcombine.low %v6655_v46, %v1211_v45  ;;  %v1213_v15 = vrot.slane %v6678_v56, 2  ;;  %v6704_v17 = vld [vmem:[#allocation2 + $0xd0] sm:$0x3f]  ;;  %v8691_v30 = vrot.slane %v6678_v56, 1 }
 0x888   :  { %1278 = vrot.lane.b32.xlu1 %v1209_v44, %s6287_s21  ;;  %v1434_v48 = vcombine.low %v1276_v47, %v1354_v41  ;;  %v6710_v20 = vrot.slane %v6704_v17, 2  ;;  %v6716_v24 = vld [vmem:[#allocation2 + $0xc0] sm:$0x3f]  ;;  %v6739_v33 = vrot.slane %v6704_v17, 1  ;;  %v6774_v41 = vpop.permute.xlu0 %1192 }
 0x889   :  { %v6722_v26 = vld [vmem:[#allocation2 + $0xe0] sm:$0x3f]  ;;  %v6731_v32 = vrot.slane %v6716_v24, 1  ;;  %v6742_v34 = vrot.slane %v6716_v24, 2 }
 0x88a   :  { %v6664_v49 = vpack.c.bf16 %v1434_v48, %v1431_v53  ;;  %v8690_v35 = vrot.slane %v6722_v26, 1  ;;  %v8689_v37 = vrot.slane %v6722_v26, 2 }
 0x88b   :  { %1304 = vrot.lane.b32.xlu0 %v6648_v42, %s6276_s1 }
 0x88c   :  { %1282 = vrot.lane.b32.xlu1 %v1211_v45, %s6287_s21 }
 0x88f   :  { %1308 = vrot.lane.b32.xlu0 %v6650_v43, %s6276_s1 }
 0x890   :  { %1186 = vrot.lane.b32.xlu1 %v8693_v50, %s6287_s21 }
 0x893   :  { %1250 = vrot.lane.b32.xlu0 %v6678_v56, %s6288_s4 }
 0x894   :  { %1190 = vrot.lane.b32.xlu1 %v6676_v55, %s6287_s21 }
 0x897   :  { %1188 = vrot.lane.b32.xlu0 %v6685_v59, %s6287_s21 }
 0x898   :  { %1218 = vrot.lane.b32.xlu1 %v1209_v44, %s6276_s1  ;;  %v6776_v44 = vpop.permute.xlu0 %1224 }
 0x89b   :  { %1220 = vrot.lane.b32.xlu0 %v6655_v46, %s6276_s1 }
 0x89c   :  { %1222 = vrot.lane.b32.xlu1 %v1211_v45, %s6276_s1 }
 0x89f   :  { %1330 = vrot.lane.b32.xlu0 %v6685_v59, %s6288_s4 }
 0x8a0   :  { %1332 = vrot.lane.b32.xlu1 %v6676_v55, %s6288_s4 }
 0x8a3   :  { %1334 = vrot.lane.b32.xlu0 %v8692_v10, %s6288_s4 }
 0x8a4   :  { %1244 = vrot.lane.b32.xlu1 %v6648_v42, %s6288_s4 }
 0x8a7   :  { %1286 = vrot.lane.b32.xlu0 %v1213_v15, %s6287_s21 }
 0x8a8   :  { %1248 = vrot.lane.b32.xlu1 %v6650_v43, %s6288_s4 }
 0x8ab   :  { %1290 = vrot.lane.b32.xlu0 %v6710_v20, %s6287_s21 }
 0x8ac   :  { %1314 = vrot.lane.b32.xlu1 %v6704_v17, %s6276_s1 }
 0x8af   :  { %1312 = vrot.lane.b32.xlu0 %v6716_v24, %s6276_s1 }
 0x8b0   :  { %1280 = vrot.lane.b32.xlu1 %v6655_v46, %s6287_s21 }
 0x8b3   :  { %1316 = vrot.lane.b32.xlu0 %v6722_v26, %s6276_s1 }
 0x8b4   :  { %1284 = vrot.lane.b32.xlu1 %v1276_v47, %s6287_s21 }
 0x8b7   :  { %1196 = vrot.lane.b32.xlu0 %v6731_v32, %s6287_s21 }
 0x8b8   :  { %1194 = vrot.lane.b32.xlu1 %v8691_v30, %s6287_s21 }
 0x8bb   :  { %1228 = vrot.lane.b32.xlu0 %v6742_v34, %s6276_s1 }
 0x8bc   :  { %1198 = vrot.lane.b32.xlu1 %v6739_v33, %s6287_s21 }
 0x8bf   :  { %1338 = vrot.lane.b32.xlu0 %v6731_v32, %s6288_s4 }
 0x8c0   :  { %1226 = vrot.lane.b32.xlu1 %v1213_v15, %s6276_s1 }
 0x8c3   :  { %1342 = vrot.lane.b32.xlu0 %v8690_v35, %s6288_s4 }
 0x8c4   :  { %1230 = vrot.lane.b32.xlu1 %v6710_v20, %s6276_s1 }
 0x8c7   :  { %1254 = vrot.lane.b32.xlu0 %v6704_v17, %s6288_s4 }
 0x8c8   :  { %1340 = vrot.lane.b32.xlu1 %v6739_v33, %s6288_s4 }
 0x8cc   :  { %1252 = vrot.lane.b32.xlu1 %v6716_v24, %s6288_s4 }
 0x8d0   :  { %1288 = vrot.lane.b32.xlu1 %v6742_v34, %s6287_s21 }
 0x8d4   :  { %1292 = vrot.lane.b32.xlu1 %v8689_v37, %s6287_s21 }
 0x8d8   :  { %1256 = vrot.lane.b32.xlu1 %v6722_v26, %s6288_s4 }
 0x8f5   :  { %v1243_v45 = vpop.permute.xlu0 %1242 }
 0x8f6   :  { %v1307_v46 = vpop.permute.xlu1 %1306 }
 0x8f9   :  { %v1247_v47 = vpop.permute.xlu0 %1246 }
 0x8fa   :  { %v1279_v53 = vpop.permute.xlu1 %1278 }
 0x8fb   :  { %v1381_v22 = vsel %vm965_vm10, %v8724_v12, %v1279_v53 }
 0x8fd   :  { %v1305_v48 = vpop.permute.xlu0 %1304 }
 0x8fe   :  { %v1283_v52 = vpop.permute.xlu1 %1282  ;;  %v1389_v62 = vsel %vm197_vm2, %v1381_v22, %v1305_v48 }
 0x901   :  { %v1309_v54 = vpop.permute.xlu0 %1308 }
 0x902   :  { %v1187_v57 = vpop.permute.xlu1 %1186 }
 0x905   :  { %v6778_v60 = vpop.permute.xlu0 %1250 }
 0x906   :  { %v1191_v58 = vpop.permute.xlu1 %1190 }
 0x907   :  { %v1359_v35 = vsel %vm965_vm10, %v6641_v40, %v1191_v58  ;;  %v1357_v40 = vsel %vm965_vm10, %v6639_v39, %v1187_v57 }
 0x909   :  { %v1189_v63 = vpop.permute.xlu0 %1188 }
 0x90a   :  { %v1219_v61 = vpop.permute.xlu1 %1218  ;;  %v1358_v30 = vsel %vm965_vm10, %v6648_v42, %v1189_v63  ;;  %v6093_v63 = vld [vmem:[#allocation6 + $0x80] sm:$0xff]  }
 0x90d   :  { %v1221_v6 = vpop.permute.xlu0 %1220 }
 0x90e   :  { %v1223_v5 = vpop.permute.xlu1 %1222  ;;  %v1366_v51 = vsel %vm197_vm2, %v1358_v30, %v1221_v6 }
 0x90f   :  { %v1367_v29 = vsel %vm197_vm2, %v1359_v35, %v1223_v5  ;;  %v8725_v35 = vrot.slane %v6650_v43, 1  ;;  %v1375_v39 = vsel %vm1372_vm3, %v1366_v51, %v1247_v47  ;;  %v1360_v51 = vsel %vm965_vm10, %v6590_v31, %v6774_v41 }
 0x911   :  { %v1331_v11 = vpop.permute.xlu0 %1330 }
 0x912   :  { %v1333_v8 = vpop.permute.xlu1 %1332 }
 0x915   :  { %v1335_v15 = vpop.permute.xlu0 %1334 }
 0x916   :  { %v1245_v14 = vpop.permute.xlu1 %1244 }
 0x919   :  { %v1287_v19 = vpop.permute.xlu0 %1286 }
 0x91a   :  { %v1249_v18 = vpop.permute.xlu1 %1248 }
 0x91b   :  { %v1376_v42 = vsel %vm1372_vm3, %v1367_v29, %v1249_v18 }
 0x91c   :  { %v4952_v53 = vcombine.low %v1375_v39, %v1376_v42  ;;  %v1368_v42 = vsel %vm197_vm2, %v1360_v51, %v6776_v44 }
 0x91d   :  { %v1291_v23 = vpop.permute.xlu0 %1290 }
 0x91e   :  { %v1315_v21 = vpop.permute.xlu1 %1314 }
 0x921   :  { %v1313_v50 = vpop.permute.xlu0 %1312 }
 0x922   :  { %v1281_v27 = vpop.permute.xlu1 %1280 }
 0x923   :  { %v1382_v37 = vsel %vm965_vm10, %v6685_v59, %v1281_v27  ;;  %v1364_v27 = vsel %vm197_vm2, %v1356_v4, %v1217_v38  ;;  %v1397_v38 = vsel %vm1372_vm3, %v1389_v62, %v1331_v11 }
 0x924   :  { %v1390_v10 = vsel %vm197_vm2, %v1382_v37, %v1307_v46  ;;  %v1383_v37 = vsel %vm965_vm10, %v6676_v55, %v1283_v52  ;;  %v1365_v46 = vsel %vm197_vm2, %v1357_v40, %v1219_v61  ;;  %v1373_v43 = vsel %vm1372_vm3, %v1364_v27, %v1243_v45 }
 0x925   :  { %v1398_v12 = vsel %vm1372_vm3, %v1390_v10, %v1333_v8  ;;  %v1391_v4 = vsel %vm197_vm2, %v1383_v37, %v1309_v54  ;;  %v1374_v22 = vsel %vm1372_vm3, %v1365_v46, %v1245_v14  ;;  %v1317_v48 = vpop.permute.xlu0 %1316 }
 0x926   :  { %v1285_v59 = vpop.permute.xlu1 %1284  ;;  %v1399_v55 = vsel %vm1372_vm3, %v1391_v4, %v1335_v15  ;;  %v4951_v54 = vcombine.low %v1397_v38, %v1398_v12  ;;  %v4950_v58 = vcombine.low %v1373_v43, %v1374_v22  ;;  %v1377_v38 = vsel %vm1372_vm3, %v1368_v42, %v6778_v60 }
 0x927   :  { %v1384_v30 = vsel %vm965_vm10, %v8725_v35, %v1285_v59  ;;  %v1387_v59 = vsel %vm965_vm10, %v6739_v33, %v1291_v23  ;;  %v8728_v60 = vrot.slane %v6722_v26, 2 }
 0x928   :  { %v1392_v29 = vsel %vm197_vm2, %v1384_v30, %v6611_v1  ;;  %v1453_v47 = vpack.c.bf16 %v4952_v53, %v4950_v58  ;;  %v1395_v31 = vsel %vm197_vm2, %v1387_v59, %v1317_v48  ;;  %v1355_v48 = vrot.slane %v6554_v0, 2 }
 0x929   :  { %v1400_v10 = vsel %vm1372_vm3, %v1392_v29, %v6613_v2  ;;  %v1197_v5 = vpop.permute.xlu0 %1196 }
 0x92a   :  { %v1195_v52 = vpop.permute.xlu1 %1194  ;;  %v4953_v57 = vcombine.low %v1399_v55, %v1400_v10  ;;  %v1362_v44 = vsel %vm965_vm10, %v6716_v24, %v1197_v5 }
 0x92c   :  { %v1454_v61 = vpack.c.bf16 %v4953_v57, %v4951_v54  ;;  %v1440_v54 = vcombine.low %v8728_v60, %v1355_v48 }
 0x92d   :  { %v1229_v2 = vpop.permute.xlu0 %1228 }
 0x92e   :  { %1611 = vmatprep.mubr.bf16.mxu1 %v1454_v61  ;;  %v1199_v1 = vpop.permute.xlu1 %1198  ;;  %v1370_v24 = vsel %vm197_vm2, %v1362_v44, %v1229_v2 }
 0x92f   :  { %1612 = vmatmul.mubr.bf16.vlgmr.msra.gmra.mxu1 %v1453_v47  ;;  %v1363_v33 = vsel %vm965_vm10, %v6704_v17, %v1199_v1 }
 0x930   :  { %5420 = vmatpush3.bf16.msra.mxu1 %v6761_v36  ;;  %v8726_v36 = vrot.slane %v6678_v56, 1 }
 0x931   :  { %5421 = vmatprep.subr.bf16.mxu1 %v6093_v63  ;;  %v1339_v11 = vpop.permute.xlu0 %1338 }
 0x932   :  { %v1227_v6 = vpop.permute.xlu1 %1226  ;;  %v1385_v40 = vsel %vm965_vm10, %v8726_v36, %v1287_v19 }
 0x933   :  { %v1393_v37 = vsel %vm197_vm2, %v1385_v40, %v1313_v50 }
 0x934   :  { %5422 = vmatpush3.bf16.msra.mxu1 %v6093_v63 }
 0x935   :  { %v1343_v15 = vpop.permute.xlu0 %1342 }
 0x936   :  { %v1231_v8 = vpop.permute.xlu1 %1230  ;;  %v1403_v35 = vsel %vm1372_vm3, %v1395_v31, %v1343_v15 }
 0x937   :  { %v1371_v22 = vsel %vm197_vm2, %v1363_v33, %v1231_v8 }
 0x939   :  { %v1255_v23 = vpop.permute.xlu0 %1254 }
 0x93a   :  { %v1341_v45 = vpop.permute.xlu1 %1340 }
 0x93e   :  { %v1253_v14 = vpop.permute.xlu1 %1252 }
 0x942   :  { %v1289_v18 = vpop.permute.xlu1 %1288 }
 0x943   :  { %v1386_v27 = vsel %vm965_vm10, %v6731_v32, %v1289_v18  ;;  %v1361_v32 = vsel %vm965_vm10, %v6678_v56, %v1195_v52  ;;  %v1401_v56 = vsel %vm1372_vm3, %v1393_v37, %v1339_v11  ;;  %v1437_v52 = vcombine.low %v6742_v34, %v6710_v20  ;;  %v4958_v20 = vld [vmem:[%s8672_s7] ss:$0 sm:$0xff] }
 0x944   :  { %v1394_v62 = vsel %vm197_vm2, %v1386_v27, %v1315_v21  ;;  %v8727_v21 = vrot.slane %v6722_v26, 1  ;;  %v1369_v50 = vsel %vm197_vm2, %v1361_v32, %v1227_v6 }
 0x945   :  { %v1402_v41 = vsel %vm1372_vm3, %v1394_v62, %v1341_v45  ;;  %v1378_v30 = vsel %vm1372_vm3, %v1369_v50, %v1253_v14  ;;  %v1458_v57 = vpack.c.bf16 %v1440_v54, %v1437_v52 }
 0x946   :  { %v1293_v46 = vpop.permute.xlu1 %1292  ;;  %v4955_v39 = vcombine.low %v1401_v56, %v1402_v41  ;;  %v4954_v53 = vcombine.low %v1377_v38, %v1378_v30 }
 0x947   :  { %v1388_v19 = vsel %vm965_vm10, %v8727_v21, %v1293_v46 }
 0x948   :  { %v1396_v12 = vsel %vm197_vm2, %v1388_v19, %v6615_v3  ;;  %v1379_v3 = vsel %vm1372_vm3, %v1370_v24, %v1255_v23 }
 0x949   :  { %v1404_v4 = vsel %vm1372_vm3, %v1396_v12, %v6617_v9 }
 0x94a   :  { %v1257_v17 = vpop.permute.xlu1 %1256  ;;  %v4957_v29 = vcombine.low %v1403_v35, %v1404_v4 }
 0x94b   :  { %v1380_v55 = vsel %vm1372_vm3, %v1371_v22, %v1257_v17 }
 0x94c   :  { %v4956_v10 = vcombine.low %v1379_v3, %v1380_v55  ;;  %v1457_v43 = vpack.c.bf16 %v4957_v29, %v4955_v39 }
 0x94e   :  { %1619 = vmatprep.mubr.bf16.mxu1 %v1457_v43  ;;  %v1456_v9 = vpack.c.bf16 %v4956_v10, %v4954_v53 }
 0x950   :  { %1620 = vmatmul.mubr.bf16.gmra.mxu1 %v1456_v9 }
 0x951   :  { %5423 = vmatprep.mubr.msk.bf16.mxu1 %vm965_vm10, %v6664_v49 }
 0x958   :  { %5424 = vmatmul.mubr.msk.bf16.vlgmr.msra.gmra.mxu1 %vm965_vm10, %v1458_v57 }
 0x9ef   :  { %v5122_v58 = vpop.f32.mrf.mxu1 }
 0x9f1   :  { %v5123_v61 = vpop.f32.mrf.mxu1 }
 0x9f2   :  { %v5124_v8 = vadd.f32 %v5123_v61, %v5122_v58 }
 0x9f3   :  { %v5125_v47 = vpop.f32.mrf.mxu1 }
 0x9f4   :  { %v1614_v15 = vadd.f32 %v5124_v8, %v4958_v20 }
 0x9f5   :  { %v5126_v63 = vpop.f32.mrf.mxu1 }
 0x9f6   :  { %v5127_v34 = vadd.f32 %v5126_v63, %v5125_v47 }
 0x9f8   :  { %v1617_v36 = vadd.f32 %v5127_v34, %v4958_v20 }
 0xa10   :  { %v5128_v0 = vpop.f32.mrf.mxu1 }
 0xa12   :  { %v5129_v1 = vpop.f32.mrf.mxu1 }
 0xa13   :  { %v5130_v6 = vadd.f32 %v5129_v1, %v5128_v0 }
 0xa14   :  { %v5131_v5 = vpop.f32.mrf.mxu1 }
 0xa15   :  { %v1622_v45 = vadd.f32 %v5130_v6, %v4958_v20 }
 0xa16   :  { %v5132_v2 = vpop.f32.mrf.mxu1 }
 0xa17   :  { %v5133_v49 = vadd.f32 %v5132_v2, %v5131_v5 }
 0xa18   :  { %v5425_v26 = vpop.f32.mrf.mxu1 }
 0xa19   :  { %v1671_v14 = vadd.f32 %v5425_v26, %v1622_v45  ;;  %v1625_v18 = vadd.f32 %v5133_v49, %v4958_v20 }
 0xa1a   :  { %v1662_v11 = vpop.f32.mrf.mxu1 }
 0xa1b   :  { %v1663_v27 = vadd.f32 %v1662_v11, %v1614_v15  ;;  %v1686_v42 = vsel %vm965_vm10, %v1671_v14, 0.0 }
 0xa1c   :  { %v5426_v51 = vpop.f32.mrf.mxu1 }
 0xa1d   :  { %v1674_v62 = vadd.f32 %v5426_v51, %v1625_v18  ;;  %v1677_v31 = vsel %vm965_vm10, %v1663_v27, 0.0 }
 0xa1e   :  { %v1665_v40 = vpop.f32.mrf.mxu1 }
 0xa1f   :  { %v1687_v59 = vsel %vm965_vm10, %v1674_v62, 0.0  ;;  %v1666_v37 = vadd.f32 %v1665_v40, %v1617_v36 }
 0xa20   :  { %v1688_v46 = vadd.f32 %v1687_v59, %v1686_v42 }
 0xa21   :  { %v1678_v32 = vsel %vm965_vm10, %v1666_v37, 0.0 }
 0xa22   :  { %v1689_v41 = vrot.slane %v1688_v46, 4  ;;  %v1679_v21 = vadd.f32 %v1678_v32, %v1677_v31 }
 0xa24   :  { %v1690_v19 = vadd.f32 %v1689_v41, %v1688_v46  ;;  %v1680_v44 = vrot.slane %v1679_v21, 4 }
 0xa26   :  { %v1691_v33 = vrot.slane %v1690_v19, 2  ;;  %v1681_v50 = vadd.f32 %v1680_v44, %v1679_v21 }
 0xa28   :  { %v1692_v23 = vadd.f32 %v1691_v33, %v1690_v19  ;;  %v1682_v12 = vrot.slane %v1681_v50, 2 }
 0xa2a   :  { %v1693_v56 = vrot.slane %v1692_v23, 1  ;;  %v1683_v35 = vadd.f32 %v1682_v12, %v1681_v50 }
 0xa2c   :  { %v1694_v30 = vadd.f32 %v1693_v56, %v1692_v23  ;;  %v1684_v4 = vrot.slane %v1683_v35, 1 }
 0xa2e   :  { %v1696_v24 = vmul.f32 0.0625, %v1694_v30  ;;  %v1685_v22 = vadd.f32 %v1684_v4, %v1683_v35  ;;  %v8729_v30 = vmov 0.0  }
 0xa2f   :  { %972 = vst.msk [vmem:[#allocation2 + $0x28] sm:$0x3] %vm967_vm8, %v8729_v30  ;;  %968 = vst.msk [vmem:[#allocation2 + $0x8] sm:$0x3] %vm967_vm8, %v8729_v30 }
 0xa30   :  { %v1699_v17 = vsub.f32 %v1671_v14, %v1696_v24  ;;  %v1700_v39 = vsub.f32 %v1674_v62, %v1696_v24  ;;  %v1695_v29 = vmul.f32 0.0625, %v1685_v22  ;;  %970 = vst.msk [vmem:[#allocation2 + $0x18] sm:$0x3] %vm967_vm8, %v8729_v30  ;;  %974 = vst.msk [vmem:[#allocation2 + $0x38] sm:$0x3] %vm967_vm8, %v8729_v30 }
 0xa31   :  { %976 = vst.msk [vmem:[#allocation2 + $0x48] sm:$0x3] %vm967_vm8, %v8729_v30  ;;  %978 = vst.msk [vmem:[#allocation2 + $0x58] sm:$0x3] %vm967_vm8, %v8729_v30 }
 0xa32   :  { %v1703_v38 = vmul.f32 %v1699_v17, %v1699_v17  ;;  %v1704_v3 = vmul.f32 %v1700_v39, %v1700_v39  ;;  %v1697_v55 = vsub.f32 %v1663_v27, %v1695_v29  ;;  %v1698_v53 = vsub.f32 %v1666_v37, %v1695_v29  ;;  %v1769_v37 = vld [vmem:[#allocation12] sm:$0xff]  ;;  %980 = vst.msk [vmem:[#allocation2 + $0x68] sm:$0x3] %vm967_vm8, %v8729_v30  ;;  %v1772_v29 = vld [vmem:[#allocation12 + $0x18] sm:$0xff] }
 0xa33   :  { %5435 = vmatprep.mubr.msk.f32.mxu0 %vm965_vm10, %v1769_v37  ;;  %982 = vst.msk [vmem:[#allocation2 + $0x78] sm:$0x3] %vm967_vm8, %v8729_v30  ;;  %984 = vst.msk [vmem:[#allocation2 + $0x88] sm:$0x3] %vm967_vm8, %v8729_v30 }
 0xa34   :  { %v1714_v10 = vsel %vm965_vm10, %v1703_v38, 0.0  ;;  %v1715_v43 = vsel %vm965_vm10, %v1704_v3, 0.0  ;;  %v1701_v48 = vmul.f32 %v1697_v55, %v1697_v55  ;;  %v1702_v9 = vmul.f32 %v1698_v53, %v1698_v53  ;;  %986 = vst.msk [vmem:[#allocation2 + $0x98] sm:$0x3] %vm967_vm8, %v8729_v30  ;;  %988 = vst.msk [vmem:[#allocation2 + $0xa8] sm:$0x3] %vm967_vm8, %v8729_v30 }
 0xa35   :  { %v1716_v52 = vadd.f32 %v1715_v43, %v1714_v10  ;;  %990 = vst.msk [vmem:[#allocation2 + $0xb8] sm:$0x3] %vm967_vm8, %v8729_v30  ;;  %992 = vst.msk [vmem:[#allocation2 + $0xc8] sm:$0x3] %vm967_vm8, %v8729_v30  ;;  %v1773_v38 = vld [vmem:[#allocation12 + $0x20] sm:$0xff]  ;;  %v1774_v3 = vld [vmem:[#allocation12 + $0x28] sm:$0xff] }
 0xa36   :  { %v1705_v60 = vsel %vm965_vm10, %v1701_v48, 0.0  ;;  %v1706_v54 = vsel %vm965_vm10, %v1702_v9, 0.0  ;;  %994 = vst.msk [vmem:[#allocation2 + $0xd8] sm:$0x3] %vm967_vm8, %v8729_v30  ;;  %996 = vst.msk [vmem:[#allocation2 + $0xe8] sm:$0x3] %vm967_vm8, %v8729_v30 }
 0xa37   :  { %v1717_v57 = vrot.slane %v1716_v52, 4  ;;  %v1707_v58 = vadd.f32 %v1706_v54, %v1705_v60  ;;  %998 = vst.msk [vmem:[#allocation2 + $0xf8] sm:$0x3] %vm967_vm8, %v8729_v30  ;;  %1000 = vst.msk [vmem:[#allocation2 + $0x108] sm:$0x3] %vm967_vm8, %v8729_v30  ;;  %v1777_v10 = vld [vmem:[#allocation12 + $0x40] sm:$0xff] }
 0xa38   :  { %1002 = vst.msk [vmem:[#allocation2 + $0x118] sm:$0x3] %vm967_vm8, %v8729_v30  ;;  %1004 = vst.msk [vmem:[#allocation2 + $0x128] sm:$0x3] %vm967_vm8, %v8729_v30  ;;  %v1778_v43 = vld [vmem:[#allocation12 + $0x48] sm:$0xff]  ;;  %v1779_v48 = vld [vmem:[#allocation12 + $0x50] sm:$0xff] }
 0xa39   :  { %v1718_v61 = vadd.f32 %v1717_v57, %v1716_v52  ;;  %v1708_v47 = vrot.slane %v1707_v58, 4  ;;  %1006 = vst.msk [vmem:[#allocation2 + $0x138] sm:$0x3] %vm967_vm8, %v8729_v30  ;;  %v1780_v9 = vld [vmem:[#allocation12 + $0x58] sm:$0xff]  ;;  %v1781_v52 = vld [vmem:[#allocation12 + $0x60] sm:$0xff]  ;;  %v1782_v60 = vld [vmem:[#allocation12 + $0x68] sm:$0xff] }
 0xa3a   :  { %v1783_v54 = vld [vmem:[#allocation12 + $0x70] sm:$0xff]  ;;  %v1784_v57 = vld [vmem:[#allocation12 + $0x78] sm:$0xff] }
 0xa3b   :  { %v1719_v63 = vrot.slane %v1718_v61, 2  ;;  %v1709_v0 = vadd.f32 %v1708_v47, %v1707_v58  ;;  %v6094_v58 = vld [vmem:[#allocation8 + $0x88] sm:$0xff]   ;;  %v6096_v47 = vld [vmem:[#allocation8 + $0x78] sm:$0xff]  }
 0xa3c   :  { %5459 = vmatprep.subr.bf16.mxu1 %v6094_v58 }
 0xa3d   :  { %v1720_v1 = vadd.f32 %v1719_v63, %v1718_v61  ;;  %v1710_v5 = vrot.slane %v1709_v0, 2  ;;  %5460 = vmatpush3.bf16.msra.mxu1 %v6094_v58  ;;  %v6095_v61 = vld [vmem:[#allocation8 + $0x80] sm:$0xff]   ;;  %v6097_v63 = vld [vmem:[#allocation8 + $0x38] sm:$0xff]  }
 0xa3e   :  { %5461 = vmatprep.subr.bf16.mxu1 %v6095_v61 }
 0xa3f   :  { %v1721_v6 = vrot.slane %v1720_v1, 1  ;;  %v1711_v2 = vadd.f32 %v1710_v5, %v1709_v0  ;;  %v6098_v0 = vld [vmem:[#allocation8 + $0x70] sm:$0xff]   ;;  %v6100_v5 = vld [vmem:[#allocation8 + $0x68] sm:$0xff]  }
 0xa41   :  { %v1722_v8 = vadd.f32 %v1721_v6, %v1720_v1  ;;  %v1712_v49 = vrot.slane %v1711_v2, 1  ;;  %5462 = vmatpush3.bf16.msra.mxu1 %v6095_v61  ;;  %v6099_v1 = vld [vmem:[#allocation8 + $0x30] sm:$0xff]   ;;  %v6101_v6 = vld [vmem:[#allocation8 + $0x28] sm:$0xff]  }
 0xa43   :  { %v1724_v20 = vmul.f32 0.0625, %v1722_v8  ;;  %v1713_v26 = vadd.f32 %v1712_v49, %v1711_v2  ;;  %v6102_v2 = vld [vmem:[#allocation8 + $0x60] sm:$0xff]  }
 0xa44   :  { %v6103_v8 = vld [vmem:[#allocation8 + $0x20] sm:$0xff]  }
 0xa45   :  { %v1726_v34 = vadd.f32 1e-08, %v1724_v20  ;;  %v1723_v45 = vmul.f32 0.0625, %v1713_v26  ;;  %v6104_v20 = vld [vmem:[#allocation8 + $0x58] sm:$0xff]  }
 0xa46   :  { %v6105_v26 = vld [vmem:[#allocation8 + $0x18] sm:$0xff]  }
 0xa47   :  { %6134 = vrsqrt.f32 %v1726_v34  ;;  %v1725_v11 = vadd.f32 1e-08, %v1723_v45 }
 0xa49   :  { %6136 = vrsqrt.f32 %v1725_v11  ;;  %v6960_v11 = vld [vmem:[#allocation2] sm:$0xff] }
 0xa54   :  { %v6135_v14 = vpop.eup %6134 }
 0xa55   :  { %v1732_v15 = vmul.f32 %v6135_v14, %v1700_v39  ;;  %v1731_v18 = vmul.f32 %v6135_v14, %v1699_v17  ;;  %v1770_v17 = vld [vmem:[#allocation12 + $0x8] sm:$0xff]  ;;  %v1771_v39 = vld [vmem:[#allocation12 + $0x10] sm:$0xff]  ;;  %v2011_v14 = vld [vmem:[#allocation2 + $0x8] sm:$0x3] }
 0xa56   :  { %v6137_v51 = vpop.eup %6136 }
 0xa57   :  { %1743 = vrot.lane.b32.xlu0 %v1732_v15, %s6276_s1  ;;  %1741 = vrot.lane.b32.xlu1 %v1731_v18, %s6276_s1  ;;  %v1730_v27 = vmul.f32 %v6137_v51, %v1698_v53  ;;  %v1729_v62 = vmul.f32 %v6137_v51, %v1697_v55  ;;  %v1775_v55 = vld [vmem:[#allocation12 + $0x30] sm:$0xff]  ;;  %v1776_v53 = vld [vmem:[#allocation12 + $0x38] sm:$0xff] }
 0xa58   :  { %v6106_v18 = vld [vmem:[#allocation8 + $0x50] sm:$0xff]  }
 0xa59   :  { %v6107_v51 = vld [vmem:[#allocation8 + $0x10] sm:$0xff]  }
 0xa5b   :  { %1739 = vrot.lane.b32.xlu0 %v1730_v27, %s6276_s1  ;;  %1737 = vrot.lane.b32.xlu1 %v1729_v62, %s6276_s1 }
 0xac9   :  { %v1744_v36 = vpop.permute.xlu0 %1743  ;;  %v1742_v40 = vpop.permute.xlu1 %1741 }
 0xaca   :  { %v1752_v42 = vmul.f32 %v1744_v36, %v6582_v28  ;;  %v1751_v59 = vmul.f32 %v1742_v40, %v6582_v28  ;;  %v2120_v40 = vrot.slane %v6960_v11, 1 }
 0xacc   :  { %v1756_v46 = vadd.f32 %v1752_v42, %v6625_v16  ;;  %v1755_v31 = vadd.f32 %v1751_v59, %v6625_v16  ;;  %v2121_v42 = vrot.slane %v2011_v14, 1 }
 0xacd   :  { %v1740_v32 = vpop.permute.xlu0 %1739  ;;  %v1738_v41 = vpop.permute.xlu1 %1737 }
 0xace   :  { %v1750_v21 = vmul.f32 %v1740_v32, %v6575_v25  ;;  %v1749_v19 = vmul.f32 %v1738_v41, %v6575_v25  ;;  %vm1760_vm4 = vcmp.ge.f32.partialorder %v1756_v46, 0.0  ;;  %v1764_v44 = vmul.f32 0.2, %v1756_v46 }
 0xacf   :  { %vm1759_vm5 = vcmp.ge.f32.partialorder %v1755_v31, 0.0  ;;  %v1763_v33 = vmul.f32 0.2, %v1755_v31  ;;  %v2217_v41 = vrot.slane %v6960_v11, 2 }
 0xad0   :  { %v1754_v50 = vadd.f32 %v1750_v21, %v6621_v13  ;;  %v1753_v28 = vadd.f32 %v1749_v19, %v6621_v13  ;;  %v1768_v23 = vsel %vm1760_vm4, %v1756_v46, %v1764_v44  ;;  %v2218_v21 = vrot.slane %v2011_v14, 2  ;;  %v6108_v19 = vld [vmem:[#allocation8 + $0x48] sm:$0xff]  }
 0xad1   :  { %1795 = vrot.lane.b32.xlu0 %v1768_v23, %s6276_s1  ;;  %v1767_v16 = vsel %vm1759_vm5, %v1755_v31, %v1763_v33  ;;  %v2122_v23 = vsel %vm2119_vm11, %v2120_v40, %v2121_v42 }
 0xad2   :  { %1793 = vrot.lane.b32.xlu1 %v1767_v16, %s6276_s1  ;;  %vm1758_vm6 = vcmp.ge.f32.partialorder %v1754_v50, 0.0  ;;  %v1762_v12 = vmul.f32 0.2, %v1754_v50  ;;  %vm1757_vm7 = vcmp.ge.f32.partialorder %v1753_v28, 0.0  ;;  %v1761_v56 = vmul.f32 0.2, %v1753_v28 }
 0xad4   :  { %v1766_v35 = vsel %vm1758_vm6, %v1754_v50, %v1762_v12  ;;  %v1765_v25 = vsel %vm1757_vm7, %v1753_v28, %v1761_v56  ;;  %v6109_v28 = vld [vmem:[#allocation8 + $0x8] sm:$0xff]  }
 0xad5   :  { %1791 = vrot.lane.b32.xlu0 %v1766_v35, %s6276_s1  ;;  %v6110_v35 = vld [vmem:[#allocation8 + $0x40] sm:$0xff]  }
 0xad6   :  { %1789 = vrot.lane.b32.xlu1 %v1765_v25, %s6276_s1 }
 0xb43   :  { %v1796_v13 = vpop.permute.xlu0 %1795 }
 0xb44   :  { %v1794_v4 = vpop.permute.xlu1 %1793  ;;  %5427 = vmatprep.subr.mxu0 %v1796_v13 }
 0xb45   :  { %5428 = vmatpush3.msra.mxu0 %v1796_v13 }
 0xb46   :  { %5429 = vmatprep.subr.mxu0 %v1794_v4 }
 0xb47   :  { %v1792_v24 = vpop.permute.xlu0 %1791  ;;  %5430 = vmatpush3.msra.mxu0 %v1794_v4 }
 0xb48   :  { %5431 = vmatprep.subr.mxu0 %v1792_v24  ;;  %v1790_v22 = vpop.permute.xlu1 %1789 }
 0xb49   :  { %5432 = vmatpush3.msra.mxu0 %v1792_v24  ;;  %v6111_v24 = vld [vmem:[#allocation8] sm:$0xff]  }
 0xb4a   :  { %5433 = vmatprep.subr.mxu0 %v1790_v22 }
 0xb4b   :  { %5434 = vmatpush3.msra.mxu0 %v1790_v22 }
 0xb4c   :  { %5436 = vmatmul.mubr.msk.f32.vlgmr.msra.gmra.mxu0 %vm965_vm10, %v1770_v17  ;;  %5158 = vmatprep.subr.bf16.mxu0 %v6096_v47 }
 0xb4d   :  { %5438 = vmatprep.mubr.msk.f32.mxu0 %vm965_vm10, %v1771_v39  ;;  %5159 = vmatpush3.bf16.msra.mxu0 %v6097_v63 }
 0xb4e   :  { %5160 = vmatprep.subr.bf16.mxu0 %v6098_v0  ;;  %v7031_v0 = vld [vmem:[#allocation2 + $0x90] sm:$0xff] }
 0xb50   :  { %5439 = vmatmul.mubr.msk.f32.gmra.mxu0 %vm965_vm10, %v1772_v29 }
 0xb51   :  { %5441 = vmatprep.mubr.msk.f32.mxu0 %vm965_vm10, %v1773_v38  ;;  %5161 = vmatpush3.bf16.msra.mxu0 %v6099_v1  ;;  %v7033_v1 = vld [vmem:[#allocation2 + $0x98] sm:$0x3] }
 0xb52   :  { %5162 = vmatprep.subr.bf16.mxu0 %v6100_v5 }
 0xb54   :  { %5442 = vmatmul.mubr.msk.f32.gmra.mxu0 %vm965_vm10, %v1774_v3  ;;  %v2219_v3 = vsel %vm2216_vm9, %v2217_v41, %v2218_v21  ;;  %v2548_v41 = vrot.slane %v7033_v1, 2 }
 0xb55   :  { %5444 = vmatprep.mubr.msk.f32.mxu0 %vm965_vm10, %v1775_v55  ;;  %5163 = vmatpush3.bf16.msra.mxu0 %v6101_v6 }
 0xb56   :  { %5164 = vmatprep.subr.bf16.mxu0 %v6102_v2 }
 0xb58   :  { %5445 = vmatmul.mubr.msk.f32.gmra.mxu0 %vm965_vm10, %v1776_v53 }
 0xb59   :  { %5447 = vmatprep.mubr.msk.f32.mxu0 %vm965_vm10, %v1777_v10  ;;  %5165 = vmatpush3.bf16.msra.mxu0 %v6103_v8 }
 0xb5a   :  { %5166 = vmatprep.subr.bf16.mxu0 %v6104_v20 }
 0xb5c   :  { %5448 = vmatmul.mubr.msk.f32.gmra.mxu0 %vm965_vm10, %v1778_v43 }
 0xb5d   :  { %5450 = vmatprep.mubr.msk.f32.mxu0 %vm965_vm10, %v1779_v48  ;;  %5167 = vmatpush3.bf16.msra.mxu0 %v6105_v26 }
 0xb5e   :  { %5168 = vmatprep.subr.bf16.mxu0 %v6106_v18 }
 0xb60   :  { %5451 = vmatmul.mubr.msk.f32.gmra.mxu0 %vm965_vm10, %v1780_v9 }
 0xb61   :  { %5453 = vmatprep.mubr.msk.f32.mxu0 %vm965_vm10, %v1781_v52  ;;  %5169 = vmatpush3.bf16.msra.mxu0 %v6107_v51 }
 0xb62   :  { %5170 = vmatprep.subr.bf16.mxu0 %v6108_v19 }
 0xb64   :  { %5454 = vmatmul.mubr.msk.f32.gmra.mxu0 %vm965_vm10, %v1782_v60 }
 0xb65   :  { %5456 = vmatprep.mubr.msk.f32.mxu0 %vm965_vm10, %v1783_v54  ;;  %5171 = vmatpush3.bf16.msra.mxu0 %v6109_v28 }
 0xb66   :  { %5172 = vmatprep.subr.bf16.mxu0 %v6110_v35 }
 0xb68   :  { %5457 = vmatmul.mubr.msk.f32.gmra.mxu0 %vm965_vm10, %v1784_v57 }
 0xb69   :  { %5173 = vmatpush3.bf16.msra.mxu0 %v6111_v24 }
 0xc0c   :  { %v6948_v49 = vpop.f32.mrf.mxu0 }
 0xc0d   :  { %8730 = vst [vmem:[#allocation21_spill] sm:$0xff] %v6948_v49  ;;  %1995 = vst.msk [vmem:[#allocation2 + $0x21] sm:$0xff] %vm965_vm10, %v6948_v49 }
 0xc0e   :  { %v6952_v34 = vpop.f32.mrf.mxu0 }
 0xc0f   :  { %8731 = vst [vmem:[#allocation22_spill] sm:$0xff] %v6952_v34  ;;  %1994 = vst.msk [vmem:[#allocation2 + $0x11] sm:$0xff] %vm965_vm10, %v6952_v34 }
 0xc10   :  { %v6956_v45 = vpop.f32.mrf.mxu0 }
 0xc11   :  { %8732 = vst [vmem:[#allocation23_spill] sm:$0xff] %v6956_v45  ;;  %1997 = vst.msk [vmem:[#allocation2 + $0x41] sm:$0xff] %vm965_vm10, %v6956_v45 }
 0xc12   :  { %v6962_v15 = vpop.f32.mrf.mxu0 }
 0xc13   :  { %8733 = vst [vmem:[#allocation24_spill] sm:$0xff] %v6962_v15  ;;  %1996 = vst.msk [vmem:[#allocation2 + $0x31] sm:$0xff] %vm965_vm10, %v6962_v15 }
 0xc14   :  { %v6966_v27 = vpop.f32.mrf.mxu0  ;;  %v6968_v62 = vld [vmem:[#allocation2 + $0x20] sm:$0xff]  ;;  %v6970_v36 = vld [vmem:[#allocation2 + $0x28] sm:$0x3] }
 0xc15   :  { %8734 = vst [vmem:[#allocation25_spill] sm:$0xff] %v6966_v27  ;;  %1999 = vst.msk [vmem:[#allocation2 + $0x61] sm:$0xff] %vm965_vm10, %v6966_v27  ;;  %v2223_v59 = vrot.slane %v6968_v62, 2  ;;  %v2224_v37 = vrot.slane %v6970_v36, 2  ;;  %v2126_v48 = vrot.slane %v6968_v62, 1  ;;  %v2127_v9 = vrot.slane %v6970_v36, 1 }
 0xc16   :  { %v6977_v46 = vpop.f32.mrf.mxu0  ;;  %v6979_v31 = vld [vmem:[#allocation2 + $0x10] sm:$0xff]  ;;  %v2013_v32 = vld [vmem:[#allocation2 + $0x18] sm:$0x3] }
 0xc17   :  { %8735 = vst [vmem:[#allocation26_spill] sm:$0xff] %v6977_v46  ;;  %1998 = vst.msk [vmem:[#allocation2 + $0x51] sm:$0xff] %vm965_vm10, %v6977_v46  ;;  %v5550_v44 = vpack.i.bf16 %v6968_v62, %v6979_v31  ;;  %v2220_v33 = vrot.slane %v6979_v31, 2  ;;  %v2221_v50 = vrot.slane %v2013_v32, 2  ;;  %v2123_v16 = vrot.slane %v6979_v31, 1 }
 0xc18   :  { %v2124_v12 = vrot.slane %v2013_v32, 1  ;;  %v6989_v56 = vpop.f32.mrf.mxu0  ;;  %v6994_v13 = vsel %vm2216_vm9, %v2223_v59, %v2224_v37  ;;  %v6998_v4 = vld [vmem:[#allocation2 + $0x40] sm:$0xff]  ;;  %v7009_v55 = vld [vmem:[#allocation2 + $0x48] sm:$0x3]  ;;  %v7059_v42 = vsel %vm2119_vm11, %v2126_v48, %v2127_v9  ;;  %v2547_v32 = vrot.slane %v7031_v0, 2 }
 0xc19   :  { %8736 = vst [vmem:[#allocation27_spill] sm:$0xff] %v6989_v56  ;;  %5551 = vrot.lane.b32.xlu1 %v5550_v44, %s6288_s4  ;;  %v2222_v25 = vsel %vm2216_vm9, %v2220_v33, %v2221_v50  ;;  %2001 = vst.msk [vmem:[#allocation2 + $0x81] sm:$0xff] %vm965_vm10, %v6989_v56  ;;  %v2229_v47 = vrot.slane %v6998_v4, 2  ;;  %v2230_v63 = vrot.slane %v7009_v55, 2 }
 0xc1a   :  { %v5555_v22 = vpack.i.bf16 %v6994_v13, %v2222_v25  ;;  %v7002_v17 = vsel %vm2119_vm11, %v2123_v16, %v2124_v12  ;;  %v7004_v39 = vpop.f32.mrf.mxu0  ;;  %v7006_v29 = vld [vmem:[#allocation2 + $0x30] sm:$0xff]  ;;  %v2017_v38 = vld [vmem:[#allocation2 + $0x38] sm:$0x3]  ;;  %v5565_v2 = vpack.i.bf16 %v2222_v25, %v2219_v3 }
 0xc1b   :  { %8737 = vst [vmem:[#allocation28_spill] sm:$0xff] %v7004_v39  ;;  %v5560_v53 = vpack.i.bf16 %v7002_v17, %v2122_v23  ;;  %2000 = vst.msk [vmem:[#allocation2 + $0x71] sm:$0xff] %vm965_vm10, %v7004_v39  ;;  %v2226_v10 = vrot.slane %v7006_v29, 2  ;;  %v2227_v43 = vrot.slane %v2017_v38, 2  ;;  %v2129_v52 = vrot.slane %v7006_v29, 1 }
 0xc1c   :  { %5556 = vrot.lane.b32.xlu0 %v5555_v22, %s6287_s21  ;;  %v2130_v60 = vrot.slane %v2017_v38, 1  ;;  %v7019_v54 = vld [vmem:[#allocation2 + $0x60] sm:$0xff]  ;;  %v7021_v57 = vld [vmem:[#allocation2 + $0x68] sm:$0x3]  ;;  %v7023_v58 = vpop.f32.mrf.mxu0  ;;  %v5570_v5 = vpack.i.bf16 %v7006_v29, %v6968_v62  ;;  %v7071_v19 = vsel %vm2216_vm9, %v2229_v47, %v2230_v63  ;;  %v5575_v25 = vpack.i.bf16 %v6998_v4, %v7006_v29 }
 0xc1d   :  { %8738 = vst [vmem:[#allocation29_spill] sm:$0xff] %v7023_v58  ;;  %5561 = vrot.lane.b32.xlu1 %v5560_v53, %s6287_s21  ;;  %v7027_v61 = vsel %vm2216_vm9, %v2226_v10, %v2227_v43  ;;  %2003 = vst.msk [vmem:[#allocation2 + $0xc1] sm:$0xff] %vm965_vm10, %v7023_v58  ;;  %v2235_v26 = vrot.slane %v7019_v54, 2  ;;  %v2236_v40 = vrot.slane %v7021_v57, 2  ;;  %v2549_v43 = vsel %vm2216_vm9, %v2547_v32, %v2548_v41 }
 0xc1e   :  { %v2667_v6 = vpack.c.bf16 %v7027_v61, %v6994_v13  ;;  %v7041_v8 = vld [vmem:[#allocation2 + $0x50] sm:$0xff]  ;;  %v7043_v20 = vld [vmem:[#allocation2 + $0x58] sm:$0x3]  ;;  %v7046_v14 = vpop.f32.mrf.mxu0  ;;  %v7049_v18 = vsel %vm2119_vm11, %v2129_v52, %v2130_v60  ;;  %v5585_v48 = vpack.i.bf16 %v7071_v19, %v7027_v61 }
 0xc1f   :  { %8739 = vst [vmem:[#allocation30_spill] sm:$0xff] %v7046_v14  ;;  %v2232_v51 = vrot.slane %v7041_v8, 2  ;;  %v2233_v36 = vrot.slane %v7043_v20, 2  ;;  %2002 = vst.msk [vmem:[#allocation2 + $0xb1] sm:$0xff] %vm965_vm10, %v7046_v14  ;;  %v5580_v28 = vpack.i.bf16 %v7049_v18, %v7059_v42  ;;  %v7093_v24 = vsel %vm2216_vm9, %v2235_v26, %v2236_v40 }
 0xc20   :  { %5571 = vrot.lane.b32.xlu0 %v5570_v5, %s6276_s1  ;;  %5463 = vmatprep.mubr.msk.bf16.mxu1 %vm965_vm10, %v2667_v6  ;;  %v7061_v59 = vld [vmem:[#allocation2 + $0x80] sm:$0xff]  ;;  %v7063_v37 = vld [vmem:[#allocation2 + $0x88] sm:$0x3]  ;;  %v7067_v21 = vpop.f32.mrf.mxu0  ;;  %v2493_v14 = vrot.slane %v7031_v0, 1 }
 0xc21   :  { %8740 = vst [vmem:[#allocation31_spill] sm:$0xff] %v7067_v21  ;;  %5566 = vrot.lane.b32.xlu1 %v5565_v2, %s6276_s1  ;;  %v7074_v44 = vsel %vm2216_vm9, %v2232_v51, %v2233_v36  ;;  %v2387_v33 = vrot.slane %v7061_v59, 2  ;;  %v2388_v50 = vrot.slane %v7063_v37, 2  ;;  %2005 = vst.msk [vmem:[#allocation2 + $0xe1] sm:$0xff] %vm965_vm10, %v7067_v21  ;;  %v5600_v51 = vpack.i.bf16 %v7041_v8, %v6998_v4 }
 0xc22   :  { %v2670_v23 = vpack.c.bf16 %v7074_v44, %v7071_v19  ;;  %v7084_v16 = vld [vmem:[#allocation2 + $0x70] sm:$0xff]  ;;  %v7086_v12 = vld [vmem:[#allocation2 + $0x78] sm:$0x3]  ;;  %v7088_v35 = vpop.f32.mrf.mxu0  ;;  %v5595_v36 = vpack.i.bf16 %v7027_v61, %v6994_v13  ;;  %v5610_v13 = vpack.i.bf16 %v7031_v0, %v7061_v59  ;;  %v2132_v61 = vrot.slane %v6998_v4, 1 }
 0xc23   :  { %8741 = vst [vmem:[#allocation32_spill] sm:$0xff] %v7088_v35  ;;  %v2238_v22 = vrot.slane %v7084_v16, 2  ;;  %v2239_v38 = vrot.slane %v7086_v12, 2  ;;  %2004 = vst.msk [vmem:[#allocation2 + $0xd1] sm:$0xff] %vm965_vm10, %v7088_v35  ;;  %v7108_v10 = vsel %vm2216_vm9, %v2387_v33, %v2388_v50  ;;  %v2135_v50 = vrot.slane %v7041_v8, 1 }
 0xc24   :  { %5581 = vrot.lane.b32.xlu0 %v5580_v28, %s6288_s4  ;;  %5464 = vmatmul.mubr.msk.bf16.vlgmr.msra.gmra.mxu1 %vm965_vm10, %v2670_v23  ;;  %v7101_v3 = vpop.f32.mrf.mxu0  ;;  %v7119_v60 = vld [vmem:[#allocation2 + $0xc0] sm:$0xff]  ;;  %v7121_v47 = vld [vmem:[#allocation2 + $0xc8] sm:$0x3]  ;;  %v2676_v63 = vpack.c.bf16 %v2549_v43, %v7108_v10  ;;  %v5630_v0 = vpack.i.bf16 %v7074_v44, %v7071_v19 }
 0xc25   :  { %8742 = vst [vmem:[#allocation33_spill] sm:$0xff] %v7101_v3  ;;  %5576 = vrot.lane.b32.xlu1 %v5575_v25, %s6288_s4  ;;  %v7105_v53 = vsel %vm2216_vm9, %v2238_v22, %v2239_v38  ;;  %2007 = vst.msk [vmem:[#allocation2 + $0x101] sm:$0xff] %vm965_vm10, %v7101_v3  ;;  %v2247_v6 = vrot.slane %v7119_v60, 2  ;;  %v2248_v2 = vrot.slane %v7121_v47, 2 }
 0xc26   :  { %v2673_v9 = vpack.c.bf16 %v7105_v53, %v7093_v24  ;;  %v7117_v52 = vpop.f32.mrf.mxu0 }
 0xc27   :  { %8743 = vst [vmem:[#allocation34_spill] sm:$0xff] %v7117_v52  ;;  %2006 = vst.msk [vmem:[#allocation2 + $0xf1] sm:$0xff] %vm965_vm10, %v7117_v52  ;;  %v7164_v38 = vsel %vm2216_vm9, %v2247_v6, %v2248_v2  ;;  %v5620_v52 = vpack.i.bf16 %v7093_v24, %v7074_v44 }
 0xc28   :  { %5586 = vrot.lane.b32.xlu0 %v5585_v48, %s6287_s21  ;;  %5467 = vmatprep.mubr.msk.bf16.mxu1 %vm965_vm10, %v2673_v9  ;;  %v7128_v5 = vpop.f32.mrf.mxu0  ;;  %v7133_v26 = vld [vmem:[#allocation2 + $0xe0] sm:$0xff]  ;;  %v7145_v41 = vld [vmem:[#allocation2 + $0xe8] sm:$0x3]  ;;  %v7170_v9 = vld [vmem:[#allocation2 + $0x130] sm:$0xff] }
 0xc29   :  { %5591 = vrot.lane.b32.xlu1 %v5580_v28, %s6287_s21  ;;  %2009 = vst.msk [vmem:[#allocation2 + $0x121] sm:$0xff] %vm965_vm10, %v7128_v5  ;;  %v2136_v28 = vrot.slane %v7043_v20, 1  ;;  %v2253_v22 = vrot.slane %v7133_v26, 2  ;;  %v2133_v20 = vrot.slane %v7009_v55, 1  ;;  %v2254_v48 = vrot.slane %v7145_v41, 2 }
 0xc2a   :  { %v7141_v40 = vld [vmem:[#allocation2 + $0xd0] sm:$0xff]  ;;  %v7143_v32 = vld [vmem:[#allocation2 + $0xd8] sm:$0x3]  ;;  %v7147_v33 = vpop.f32.mrf.mxu0  ;;  %v2550_v15 = vrot.slane %v7170_v9, 2 }
 0xc2b   :  { %v2250_v23 = vrot.slane %v7141_v40, 2  ;;  %v2251_v25 = vrot.slane %v7143_v32, 2  ;;  %2008 = vst.msk [vmem:[#allocation2 + $0x111] sm:$0xff] %vm965_vm10, %v7147_v33  ;;  %v7185_v2 = vsel %vm2119_vm11, %v2135_v50, %v2136_v28  ;;  %v7199_v50 = vsel %vm2119_vm11, %v2132_v61, %v2133_v20 }
 0xc2c   :  { %5601 = vrot.lane.b32.xlu0 %v5600_v51, %s6276_s1  ;;  %5468 = vmatmul.mubr.msk.bf16.gmra.mxu1 %vm965_vm10, %v2676_v63  ;;  %v7172_v63 = vld [vmem:[#allocation2 + $0x138] sm:$0x3]  ;;  %v5605_v51 = vpack.i.bf16 %v7019_v54, %v7041_v8  ;;  %v7182_v6 = vld [vmem:[#allocation2 + $0x100] sm:$0xff]  ;;  %v7195_v45 = vld [vmem:[#allocation2 + $0x108] sm:$0x3] }
 0xc2d   :  { %5596 = vrot.lane.b32.xlu1 %v5595_v36, %s6276_s1  ;;  %v7167_v43 = vsel %vm2216_vm9, %v2250_v23, %v2251_v25  ;;  %v7188_v23 = vsel %vm2216_vm9, %v2253_v22, %v2254_v48  ;;  %v2259_v48 = vrot.slane %v7182_v6, 2 }
 0xc2e   :  { %v2679_v36 = vpack.c.bf16 %v7167_v43, %v7164_v38  ;;  %v7178_v34 = vld [vmem:[#allocation2 + $0xf0] sm:$0xff]  ;;  %v7180_v55 = vld [vmem:[#allocation2 + $0xf8] sm:$0x3] }
 0xc2f   :  { %v2256_v25 = vrot.slane %v7178_v34, 2  ;;  %v2257_v49 = vrot.slane %v7180_v55, 2 }
 0xc30   :  { %5611 = vrot.lane.b32.xlu0 %v5610_v13, %s6276_s1  ;;  %5471 = vmatprep.mubr.msk.bf16.mxu1 %vm965_vm10, %v2679_v36  ;;  %v7204_v22 = vld [vmem:[#allocation2 + $0x120] sm:$0xff]  ;;  %v7207_v46 = vld [vmem:[#allocation2 + $0x128] sm:$0x3]  ;;  %v2551_v13 = vrot.slane %v7172_v63, 2  ;;  %v5615_v36 = vpack.i.bf16 %v7185_v2, %v7199_v50 }
 0xc31   :  { %5606 = vrot.lane.b32.xlu1 %v5605_v51, %s6288_s4  ;;  %v7202_v28 = vsel %vm2216_vm9, %v2256_v25, %v2257_v49  ;;  %v2260_v49 = vrot.slane %v7195_v45, 2  ;;  %v2390_v39 = vrot.slane %v7204_v22, 2  ;;  %v2391_v56 = vrot.slane %v7207_v46, 2 }
 0xc32   :  { %v2682_v51 = vpack.c.bf16 %v7202_v28, %v7188_v23  ;;  %v7214_v27 = vld [vmem:[#allocation2 + $0x110] sm:$0xff]  ;;  %v7216_v61 = vld [vmem:[#allocation2 + $0x118] sm:$0x3]  ;;  %v2552_v21 = vsel %vm2216_vm9, %v2550_v15, %v2551_v13  ;;  %v2138_v15 = vrot.slane %v7019_v54, 1  ;;  %v2139_v13 = vrot.slane %v7021_v57, 1 }
 0xc33   :  { %v2262_v20 = vrot.slane %v7214_v27, 2  ;;  %v2263_v25 = vrot.slane %v7216_v61, 2  ;;  %v7228_v58 = vsel %vm2216_vm9, %v2259_v48, %v2260_v49  ;;  %v2365_v48 = vrot.slane %v7061_v59, 1 }
 0xc34   :  { %5616 = vrot.lane.b32.xlu0 %v5615_v36, %s6288_s4  ;;  %5472 = vmatmul.mubr.msk.bf16.gmra.mxu1 %vm965_vm10, %v2682_v51  ;;  %v2494_v51 = vrot.slane %v7033_v1, 1  ;;  %v2366_v49 = vrot.slane %v7063_v37, 1  ;;  %v2141_v1 = vrot.slane %v7084_v16, 1  ;;  %v5640_v37 = vpack.i.bf16 %v7061_v59, %v7084_v16  ;;  %v7272_v59 = vld [vmem:[#allocation2 + $0xb0] sm:$0xff] }
 0xc35   :  { %5626 = vrot.lane.b32.xlu1 %v5615_v36, %s6287_s21  ;;  %v7231_v35 = vsel %vm2216_vm9, %v2262_v20, %v2263_v25  ;;  %v7240_v36 = vsel %vm2216_vm9, %v2390_v39, %v2391_v56  ;;  %v2142_v20 = vrot.slane %v7086_v12, 1  ;;  %v5635_v39 = vpack.i.bf16 %v7084_v16, %v7019_v54  ;;  %v2031_v25 = vld [vmem:[#allocation2 + $0xa8] sm:$0x3] }
 0xc36   :  { %v2685_v3 = vpack.c.bf16 %v7231_v35, %v7228_v58  ;;  %v2688_v56 = vpack.c.bf16 %v2552_v21, %v7240_v36  ;;  %v7259_v19 = vsel %vm2119_vm11, %v2365_v48, %v2366_v49  ;;  %v2495_v57 = vsel %vm2119_vm11, %v2493_v14, %v2494_v51 }
 0xc37   :  { %v7264_v44 = vsel %vm2119_vm11, %v2138_v15, %v2139_v13  ;;  %v7267_v21 = vsel %vm2119_vm11, %v2141_v1, %v2142_v20  ;;  %v5645_v12 = vpack.i.bf16 %v2495_v57, %v7259_v19  ;;  %v2244_v51 = vrot.slane %v7272_v59, 2 }
 0xc38   :  { %5621 = vrot.lane.b32.xlu0 %v5620_v52, %s6287_s21  ;;  %5475 = vmatprep.mubr.msk.bf16.mxu1 %vm965_vm10, %v2685_v3  ;;  %v2033_v3 = vld [vmem:[#allocation2 + $0xb8] sm:$0x3]  ;;  %v7274_v52 = vld [vmem:[#allocation2 + $0xa0] sm:$0xff]  ;;  %v5660_v14 = vpack.i.bf16 %v7267_v21, %v7264_v44  ;;  %v2145_v49 = vrot.slane %v2031_v25, 1  ;;  %v2147_v15 = vrot.slane %v7272_v59, 1  ;;  %v5665_v1 = vpack.i.bf16 %v7105_v53, %v7093_v24 }
 0xc39   :  { %5631 = vrot.lane.b32.xlu1 %v5630_v0, %s6276_s1  ;;  %v2245_v0 = vrot.slane %v2033_v3, 2  ;;  %v2144_v48 = vrot.slane %v7274_v52, 1  ;;  %v2148_v13 = vrot.slane %v2033_v3, 1  ;;  %v5670_v20 = vpack.i.bf16 %v7119_v60, %v7272_v59 }
 0xc3a   :  { %v2242_v3 = vrot.slane %v2031_v25, 2  ;;  %v5690_v25 = vpack.i.bf16 %v7141_v40, %v7119_v60 }
 0xc3b   :  { %v7294_v57 = vsel %vm2119_vm11, %v2147_v15, %v2148_v13 }
 0xc3c   :  { %5636 = vrot.lane.b32.xlu0 %v5635_v39, %s6276_s1  ;;  %5476 = vmatmul.mubr.msk.bf16.gmra.mxu1 %vm965_vm10, %v2688_v56  ;;  %v2246_v56 = vsel %vm2216_vm9, %v2244_v51, %v2245_v0  ;;  %v5655_v39 = vpack.i.bf16 %v7108_v10, %v7105_v53  ;;  %v2150_v51 = vrot.slane %v7119_v60, 1  ;;  %v2151_v53 = vrot.slane %v7121_v47, 1 }
 0xc3d   :  { %5641 = vrot.lane.b32.xlu1 %v5640_v37, %s6288_s4  ;;  %v2146_v37 = vsel %vm2119_vm11, %v2144_v48, %v2145_v49  ;;  %v5675_v24 = vpack.i.bf16 %v7164_v38, %v2246_v56  ;;  %v2153_v10 = vrot.slane %v7141_v40, 1  ;;  %v2154_v0 = vrot.slane %v7143_v32, 1 }
 0xc3e   :  { %v7311_v15 = vsel %vm2119_vm11, %v2150_v51, %v2151_v53  ;;  %v5695_v32 = vpack.i.bf16 %v7133_v26, %v7141_v40  ;;  %v2163_v51 = vrot.slane %v7195_v45, 1  ;;  %v2165_v53 = vrot.slane %v7214_v27, 1 }
 0xc3f   :  { %v7314_v13 = vsel %vm2119_vm11, %v2153_v10, %v2154_v0  ;;  %v2166_v10 = vrot.slane %v7216_v61, 1  ;;  %v5740_v0 = vpack.i.bf16 %v7228_v58, %v7202_v28  ;;  %v5755_v45 = vpack.i.bf16 %v7214_v27, %v7182_v6 }
 0xc40   :  { %5646 = vrot.lane.b32.xlu0 %v5645_v12, %s6288_s4  ;;  %v2241_v12 = vrot.slane %v7274_v52, 2  ;;  %v5700_v47 = vpack.i.bf16 %v7314_v13, %v7311_v15 }
 0xc41   :  { %5661 = vrot.lane.b32.xlu1 %v5660_v14, %s6287_s21 }
 0xc42   :  { %v2243_v48 = vsel %vm2216_vm9, %v2241_v12, %v2242_v3  ;;  %v2160_v12 = vrot.slane %v7180_v55, 1  ;;  %v5730_v3 = vpack.i.bf16 %v7170_v9, %v7204_v22  ;;  %v2162_v55 = vrot.slane %v7182_v6, 1 }
 0xc43   :  { %v5685_v49 = vpack.i.bf16 %v2246_v56, %v2243_v48  ;;  %v5715_v56 = vpack.i.bf16 %v7167_v43, %v7164_v38  ;;  %v5750_v48 = vpack.i.bf16 %v7202_v28, %v7188_v23  ;;  %v5780_v28 = vpack.i.bf16 %v7231_v35, %v7228_v58 }
 0xc44   :  { %5651 = vrot.lane.b32.xlu0 %v5660_v14, %s6288_s4  ;;  %v5680_v14 = vpack.i.bf16 %v7294_v57, %v2146_v37  ;;  %v2157_v37 = vrot.slane %v7145_v41, 1 }
 0xc45   :  { %5666 = vrot.lane.b32.xlu1 %v5665_v1, %s6276_s1  ;;  %v5705_v1 = vpack.i.bf16 %v7188_v23, %v7167_v43  ;;  %v2496_v23 = vrot.slane %v7170_v9, 1 }
 0xc48   :  { %5656 = vrot.lane.b32.xlu0 %v5655_v39, %s6287_s21  ;;  %v2156_v39 = vrot.slane %v7133_v26, 1 }
 0xc49   :  { %5671 = vrot.lane.b32.xlu1 %v5670_v20, %s6288_s4  ;;  %v5720_v20 = vpack.i.bf16 %v7178_v34, %v7133_v26 }
 0xc4a   :  { %v7343_v38 = vsel %vm2119_vm11, %v2156_v39, %v2157_v37 }
 0xc4c   :  { %5676 = vrot.lane.b32.xlu0 %v5675_v24, %s6287_s21  ;;  %v2159_v24 = vrot.slane %v7178_v34, 1 }
 0xc4d   :  { %5681 = vrot.lane.b32.xlu1 %v5680_v14, %s6287_s21  ;;  %v5725_v14 = vpack.i.bf16 %v7182_v6, %v7178_v34 }
 0xc4e   :  { %v7346_v43 = vsel %vm2119_vm11, %v2159_v24, %v2160_v12 }
 0xc4f   :  { %v5735_v41 = vpack.i.bf16 %v7346_v43, %v7343_v38 }
 0xc50   :  { %5691 = vrot.lane.b32.xlu0 %v5690_v25, %s6276_s1  ;;  %v7364_v25 = vsel %vm2119_vm11, %v2162_v55, %v2163_v51 }
 0xc51   :  { %5686 = vrot.lane.b32.xlu1 %v5685_v49, %s6276_s1  ;;  %v7367_v49 = vsel %vm2119_vm11, %v2165_v53, %v2166_v10 }
 0xc52   :  { %v5775_v61 = vpack.i.bf16 %v7367_v49, %v7364_v25 }
 0xc54   :  { %5701 = vrot.lane.b32.xlu0 %v5700_v47, %s6288_s4 }
 0xc55   :  { %5696 = vrot.lane.b32.xlu1 %v5695_v32, %s6288_s4  ;;  %v2369_v32 = vrot.slane %v7207_v46, 1 }
 0xc58   :  { %5706 = vrot.lane.b32.xlu0 %v5705_v1, %s6287_s21  ;;  %v2497_v1 = vrot.slane %v7172_v63, 1  ;;  %v8744_v63 = vld [vmem:[#allocation20_spill] sm:$0xff] }
 0xc59   :  { %5711 = vrot.lane.b32.xlu1 %v5700_v47, %s6287_s21  ;;  %v2368_v47 = vrot.slane %v7204_v22, 1  ;;  %v7397_v39 = vrot.slane %v8744_v63, %v6560_v7 }
 0xc5a   :  { %v2498_v58 = vsel %vm2119_vm11, %v2496_v23, %v2497_v1 }
 0xc5b   :  { %v7389_v9 = vsel %vm2119_vm11, %v2368_v47, %v2369_v32 }
 0xc5c   :  { %5721 = vrot.lane.b32.xlu0 %v5720_v20, %s6276_s1  ;;  %v5765_v20 = vpack.i.bf16 %v7240_v36, %v7231_v35  ;;  %v5770_v46 = vpack.i.bf16 %v2498_v58, %v7389_v9  ;;  %v8745_v35 = vld [vmem:[#allocation19_spill] sm:$0xff] }
 0xc5d   :  { %5716 = vrot.lane.b32.xlu1 %v5715_v56, %s6276_s1  ;;  %v5785_v56 = vpack.i.bf16 %v7204_v22, %v7214_v27  ;;  %v8746_v22 = vld [vmem:[#allocation18_spill] sm:$0xff] }
 0xc5e   :  { %v8747_v36 = vrot.slane %v8745_v35, %v8746_v22 }
 0xc60   :  { %5731 = vrot.lane.b32.xlu0 %v5730_v3, %s6276_s1  ;;  %v7406_v37 = vrot.slane %v8747_v36, %v6560_v7 }
 0xc61   :  { %5726 = vrot.lane.b32.xlu1 %v5725_v14, %s6288_s4 }
 0xc62   :  { %8748 = vst [vmem:[#allocation20_spill] sm:$0xff] %v7406_v37 }
 0xc64   :  { %5736 = vrot.lane.b32.xlu0 %v5735_v41, %s6288_s4 }
 0xc65   :  { %5746 = vrot.lane.b32.xlu1 %v5735_v41, %s6287_s21 }
 0xc68   :  { %5741 = vrot.lane.b32.xlu0 %v5740_v0, %s6287_s21 }
 0xc69   :  { %5751 = vrot.lane.b32.xlu1 %v5750_v48, %s6276_s1 }
 0xc6c   :  { %5756 = vrot.lane.b32.xlu0 %v5755_v45, %s6276_s1 }
 0xc6d   :  { %5776 = vrot.lane.b32.xlu1 %v5775_v61, %s6287_s21 }
 0xc70   :  { %5761 = vrot.lane.b32.xlu0 %v5775_v61, %s6288_s4 }
 0xc71   :  { %5781 = vrot.lane.b32.xlu1 %v5780_v28, %s6276_s1 }
 0xc74   :  { %5766 = vrot.lane.b32.xlu0 %v5765_v20, %s6287_s21 }
 0xc75   :  { %5786 = vrot.lane.b32.xlu1 %v5785_v56, %s6288_s4 }
 0xc78   :  { %5771 = vrot.lane.b32.xlu0 %v5770_v46, %s6288_s4 }
 0xc79   :  { %3212 = vrot.lane.b32.xlu1 %v7397_v39, %s6288_s4 }
 0xc7c   :  { %3210 = vrot.lane.b32.xlu0 %v7406_v37, %s6288_s4 }
 0xc8b   :  { %v5552_v24 = vpop.permute.xlu1 %5551 }
 0xc8c   :  { %v5554_v28 = vunpack.i.h.bf16 %v5552_v24  ;;  %v5553_v47 = vunpack.i.l.bf16 %v5552_v24 }
 0xc8e   :  { %v5557_v12 = vpop.permute.xlu0 %5556 }
 0xc8f   :  { %v5562_v3 = vpop.permute.xlu1 %5561  ;;  %v5559_v51 = vunpack.i.h.bf16 %v5557_v12  ;;  %v5558_v53 = vunpack.i.l.bf16 %v5557_v12 }
 0xc90   :  { %v5564_v14 = vunpack.i.h.bf16 %v5562_v3  ;;  %v5563_v41 = vunpack.i.l.bf16 %v5562_v3 }
 0xc91   :  { %v2618_v56 = vsel %vm965_vm10, %v7059_v42, %v5559_v51  ;;  %v2617_v58 = vsel %vm965_vm10, %v7002_v17, %v5558_v53 }
 0xc92   :  { %v5572_v55 = vpop.permute.xlu0 %5571  ;;  %v2570_v7 = vsel %vm965_vm10, %v6979_v31, %v5564_v14  ;;  %v2569_v23 = vsel %vm965_vm10, %v6960_v11, %v5563_v41 }
 0xc93   :  { %v5567_v10 = vpop.permute.xlu1 %5566  ;;  %v5574_v0 = vunpack.i.h.bf16 %v5572_v55  ;;  %v5573_v48 = vunpack.i.l.bf16 %v5572_v55 }
 0xc94   :  { %v5569_v45 = vunpack.i.h.bf16 %v5567_v10  ;;  %v5568_v61 = vunpack.i.l.bf16 %v5567_v10 }
 0xc95   :  { %v2633_v22 = vsel %vm197_vm2, %v2617_v58, %v5573_v48  ;;  %v2634_v36 = vsel %vm197_vm2, %v2618_v56, %v5574_v0 }
 0xc96   :  { %v2585_v32 = vsel %vm197_vm2, %v2569_v23, %v5568_v61  ;;  %v2586_v1 = vsel %vm197_vm2, %v2570_v7, %v5569_v45  ;;  %v5582_v20 = vpop.permute.xlu0 %5581 }
 0xc97   :  { %v5584_v46 = vunpack.i.h.bf16 %v5582_v20  ;;  %v5583_v63 = vunpack.i.l.bf16 %v5582_v20  ;;  %v5577_v35 = vpop.permute.xlu1 %5576  ;;  %v2601_v31 = vsel %vm1372_vm3, %v2585_v32, %v5553_v47  ;;  %v2602_v11 = vsel %vm1372_vm3, %v2586_v1, %v5554_v28 }
 0xc98   :  { %v2665_v14 = vpack.c.bf16 %v2602_v11, %v2601_v31  ;;  %v5579_v56 = vunpack.i.h.bf16 %v5577_v35  ;;  %v5578_v58 = vunpack.i.l.bf16 %v5577_v35 }
 0xc99   :  { %v2649_v24 = vsel %vm1372_vm3, %v2633_v22, %v5583_v63  ;;  %v2650_v12 = vsel %vm1372_vm3, %v2634_v36, %v5584_v46 }
 0xc9a   :  { %v5587_v3 = vpop.permute.xlu0 %5586  ;;  %v2666_v42 = vpack.c.bf16 %v2650_v12, %v2649_v24 }
 0xc9b   :  { %v5592_v41 = vpop.permute.xlu1 %5591  ;;  %v5589_v48 = vunpack.i.h.bf16 %v5587_v3  ;;  %v5588_v0 = vunpack.i.l.bf16 %v5587_v3 }
 0xc9c   :  { %2859 = vmatprep.mubr.bf16.mxu0 %v2666_v42  ;;  %v5594_v51 = vunpack.i.h.bf16 %v5592_v41  ;;  %v5593_v53 = vunpack.i.l.bf16 %v5592_v41 }
 0xc9d   :  { %2860 = vmatmul.mubr.bf16.vlgmr.msra.gmra.mxu0 %v2665_v14  ;;  %v2620_v63 = vsel %vm965_vm10, %v7199_v50, %v5589_v48  ;;  %v2619_v31 = vsel %vm965_vm10, %v7049_v18, %v5588_v0 }
 0xc9e   :  { %v5602_v17 = vpop.permute.xlu0 %5601  ;;  %v2572_v23 = vsel %vm965_vm10, %v7006_v29, %v5594_v51  ;;  %v2571_v28 = vsel %vm965_vm10, %v6968_v62, %v5593_v53 }
 0xc9f   :  { %v5597_v55 = vpop.permute.xlu1 %5596  ;;  %v5604_v47 = vunpack.i.h.bf16 %v5602_v17  ;;  %v5603_v32 = vunpack.i.l.bf16 %v5602_v17 }
 0xca0   :  { %v5599_v10 = vunpack.i.h.bf16 %v5597_v55  ;;  %v5598_v45 = vunpack.i.l.bf16 %v5597_v55 }
 0xca1   :  { %v2635_v62 = vsel %vm197_vm2, %v2619_v31, %v5603_v32  ;;  %v2636_v36 = vsel %vm197_vm2, %v2620_v63, %v5604_v47 }
 0xca2   :  { %v7426_v61 = vpop.permute.xlu0 %5611  ;;  %v2587_v1 = vsel %vm197_vm2, %v2571_v28, %v5598_v45  ;;  %v2588_v20 = vsel %vm197_vm2, %v2572_v23, %v5599_v10 }
 0xca3   :  { %v5607_v7 = vpop.permute.xlu1 %5606  ;;  %v2603_v24 = vsel %vm1372_vm3, %v2587_v1, %v5578_v58  ;;  %v2604_v12 = vsel %vm1372_vm3, %v2588_v20, %v5579_v56 }
 0xca4   :  { %v2668_v41 = vpack.c.bf16 %v2604_v12, %v2603_v24  ;;  %v5609_v58 = vunpack.i.h.bf16 %v5607_v7 }
 0xca6   :  { %v5617_v46 = vpop.permute.xlu0 %5616 }
 0xca7   :  { %v5619_v11 = vunpack.i.h.bf16 %v5617_v46  ;;  %v5618_v29 = vunpack.i.l.bf16 %v5617_v46  ;;  %v5627_v22 = vpop.permute.xlu1 %5626  ;;  %v5608_v46 = vunpack.i.l.bf16 %v5607_v7 }
 0xca8   :  { %v5629_v17 = vunpack.i.h.bf16 %v5627_v22  ;;  %v5628_v55 = vunpack.i.l.bf16 %v5627_v22 }
 0xca9   :  { %v2651_v35 = vsel %vm1372_vm3, %v2635_v62, %v5618_v29  ;;  %v2652_v3 = vsel %vm1372_vm3, %v2636_v36, %v5619_v11 }
 0xcaa   :  { %v5622_v42 = vpop.permute.xlu0 %5621  ;;  %v2669_v50 = vpack.c.bf16 %v2652_v3, %v2651_v35  ;;  %v2574_v23 = vsel %vm965_vm10, %v7041_v8, %v5629_v17  ;;  %v2573_v28 = vsel %vm965_vm10, %v6998_v4, %v5628_v55 }
 0xcab   :  { %v5632_v14 = vpop.permute.xlu1 %5631  ;;  %v5624_v45 = vunpack.i.h.bf16 %v5622_v42  ;;  %v5623_v48 = vunpack.i.l.bf16 %v5622_v42  ;;  %v5614_v42 = vunpack.i.h.bf16 %v7426_v61 }
 0xcac   :  { %2867 = vmatprep.mubr.bf16.mxu0 %v2669_v50  ;;  %v5634_v53 = vunpack.i.h.bf16 %v5632_v14  ;;  %v5633_v10 = vunpack.i.l.bf16 %v5632_v14 }
 0xcad   :  { %2868 = vmatmul.mubr.bf16.gmra.mxu0 %v2668_v41  ;;  %v2622_v63 = vsel %vm965_vm10, %v7264_v44, %v5624_v45  ;;  %v2621_v31 = vsel %vm965_vm10, %v7185_v2, %v5623_v48  ;;  %v5613_v41 = vunpack.i.l.bf16 %v7426_v61 }
 0xcae   :  { %v5637_v18 = vpop.permute.xlu0 %5636  ;;  %v2589_v20 = vsel %vm197_vm2, %v2573_v28, %v5633_v10  ;;  %v2590_v56 = vsel %vm197_vm2, %v2574_v23, %v5634_v53 }
 0xcaf   :  { %v5642_v51 = vpop.permute.xlu1 %5641  ;;  %v5639_v32 = vunpack.i.h.bf16 %v5637_v18  ;;  %v5638_v1 = vunpack.i.l.bf16 %v5637_v18  ;;  %v2605_v4 = vsel %vm1372_vm3, %v2589_v20, %v5608_v46  ;;  %v2606_v62 = vsel %vm1372_vm3, %v2590_v56, %v5609_v58 }
 0xcb0   :  { %v2671_v53 = vpack.c.bf16 %v2606_v62, %v2605_v4 }
 0xcb1   :  { %v2637_v12 = vsel %vm197_vm2, %v2621_v31, %v5638_v1  ;;  %v2638_v7 = vsel %vm197_vm2, %v2622_v63, %v5639_v32  ;;  %v5644_v1 = vunpack.i.h.bf16 %v5642_v51 }
 0xcb2   :  { %v5647_v0 = vpop.permute.xlu0 %5646 }
 0xcb3   :  { %v5662_v47 = vpop.permute.xlu1 %5661  ;;  %v5649_v10 = vunpack.i.h.bf16 %v5647_v0  ;;  %v5648_v45 = vunpack.i.l.bf16 %v5647_v0  ;;  %v5643_v0 = vunpack.i.l.bf16 %v5642_v51 }
 0xcb4   :  { %v5664_v36 = vunpack.i.h.bf16 %v5662_v47  ;;  %v5663_v24 = vunpack.i.l.bf16 %v5662_v47 }
 0xcb6   :  { %v5652_v11 = vpop.permute.xlu0 %5651  ;;  %v2576_v48 = vsel %vm965_vm10, %v7084_v16, %v5664_v36  ;;  %v2575_v23 = vsel %vm965_vm10, %v7019_v54, %v5663_v24 }
 0xcb7   :  { %v5654_v8 = vunpack.i.h.bf16 %v5652_v11  ;;  %v5653_v29 = vunpack.i.l.bf16 %v5652_v11  ;;  %v5667_v22 = vpop.permute.xlu1 %5666 }
 0xcb8   :  { %v5669_v35 = vunpack.i.h.bf16 %v5667_v22  ;;  %v5668_v3 = vunpack.i.l.bf16 %v5667_v22 }
 0xcb9   :  { %v2653_v44 = vsel %vm1372_vm3, %v2637_v12, %v5653_v29  ;;  %v2654_v2 = vsel %vm1372_vm3, %v2638_v7, %v5654_v8 }
 0xcba   :  { %v5657_v50 = vpop.permute.xlu0 %5656  ;;  %v2672_v14 = vpack.c.bf16 %v2654_v2, %v2653_v44  ;;  %v2591_v61 = vsel %vm197_vm2, %v2575_v23, %v5668_v3  ;;  %v2592_v32 = vsel %vm197_vm2, %v2576_v48, %v5669_v35 }
 0xcbb   :  { %v5659_v18 = vunpack.i.h.bf16 %v5657_v50  ;;  %v5658_v17 = vunpack.i.l.bf16 %v5657_v50  ;;  %v5672_v55 = vpop.permute.xlu1 %5671  ;;  %v2608_v63 = vsel %vm1372_vm3, %v2592_v32, %v5644_v1 }
 0xcbc   :  { %2875 = vmatprep.mubr.bf16.mxu0 %v2672_v14  ;;  %v5674_v3 = vunpack.i.h.bf16 %v5672_v55  ;;  %v5673_v44 = vunpack.i.l.bf16 %v5672_v55 }
 0xcbd   :  { %v2624_v28 = vsel %vm965_vm10, %v7259_v19, %v5659_v18  ;;  %v2623_v47 = vsel %vm965_vm10, %v7267_v21, %v5658_v17  ;;  %2876 = vmatmul.mubr.bf16.gmra.mxu0 %v2671_v53  ;;  %v2607_v21 = vsel %vm1372_vm3, %v2591_v61, %v5643_v0 }
 0xcbe   :  { %v5677_v20 = vpop.permute.xlu0 %5676  ;;  %v2639_v16 = vsel %vm197_vm2, %v2623_v47, %v5613_v41  ;;  %v2640_v56 = vsel %vm197_vm2, %v2624_v28, %v5614_v42  ;;  %v2674_v4 = vpack.c.bf16 %v2608_v63, %v2607_v21 }
 0xcbf   :  { %v5682_v54 = vpop.permute.xlu1 %5681  ;;  %v2655_v58 = vsel %vm1372_vm3, %v2639_v16, %v5648_v45  ;;  %v2656_v19 = vsel %vm1372_vm3, %v2640_v56, %v5649_v10  ;;  %v5679_v51 = vunpack.i.h.bf16 %v5677_v20  ;;  %v5678_v29 = vunpack.i.l.bf16 %v5677_v20 }
 0xcc0   :  { %v2675_v46 = vpack.c.bf16 %v2656_v19, %v2655_v58  ;;  %v5684_v31 = vunpack.i.h.bf16 %v5682_v54  ;;  %v5683_v11 = vunpack.i.l.bf16 %v5682_v54 }
 0xcc1   :  { %v2626_v14 = vsel %vm965_vm10, %v7311_v15, %v5679_v51  ;;  %v2625_v41 = vsel %vm965_vm10, %v7294_v57, %v5678_v29 }
 0xcc2   :  { %2883 = vmatprep.mubr.bf16.mxu0 %v2675_v46  ;;  %v5692_v8 = vpop.permute.xlu0 %5691  ;;  %v2578_v7 = vsel %vm965_vm10, %v7272_v59, %v5684_v31  ;;  %v2577_v35 = vsel %vm965_vm10, %v7274_v52, %v5683_v11 }
 0xcc3   :  { %v5687_v22 = vpop.permute.xlu1 %5686  ;;  %v5694_v62 = vunpack.i.h.bf16 %v5692_v8  ;;  %v5693_v36 = vunpack.i.l.bf16 %v5692_v8 }
 0xcc4   :  { %v5689_v24 = vunpack.i.h.bf16 %v5687_v22  ;;  %v5688_v12 = vunpack.i.l.bf16 %v5687_v22 }
 0xcc5   :  { %2884 = vmatmul.mubr.bf16.gmra.mxu0 %v2674_v4  ;;  %v2641_v53 = vsel %vm197_vm2, %v2625_v41, %v5693_v36  ;;  %v2642_v52 = vsel %vm197_vm2, %v2626_v14, %v5694_v62 }
 0xcc6   :  { %v5702_v2 = vpop.permute.xlu0 %5701  ;;  %v2593_v42 = vsel %vm197_vm2, %v2577_v35, %v5688_v12  ;;  %v2594_v50 = vsel %vm197_vm2, %v2578_v7, %v5689_v24 }
 0xcc7   :  { %v5704_v18 = vunpack.i.h.bf16 %v5702_v2  ;;  %v5703_v17 = vunpack.i.l.bf16 %v5702_v2  ;;  %v5697_v59 = vpop.permute.xlu1 %5696  ;;  %v2609_v55 = vsel %vm1372_vm3, %v2593_v42, %v5673_v44  ;;  %v2610_v10 = vsel %vm1372_vm3, %v2594_v50, %v5674_v3 }
 0xcc8   :  { %v2677_v47 = vpack.c.bf16 %v2610_v10, %v2609_v55  ;;  %v5699_v8 = vunpack.i.h.bf16 %v5697_v59  ;;  %v5698_v51 = vunpack.i.l.bf16 %v5697_v59 }
 0xcc9   :  { %v2657_v45 = vsel %vm1372_vm3, %v2641_v53, %v5703_v17  ;;  %v2658_v48 = vsel %vm1372_vm3, %v2642_v52, %v5704_v18 }
 0xcca   :  { %v5707_v23 = vpop.permute.xlu0 %5706  ;;  %v2678_v15 = vpack.c.bf16 %v2658_v48, %v2657_v45 }
 0xccb   :  { %v5712_v28 = vpop.permute.xlu1 %5711  ;;  %v5709_v56 = vunpack.i.h.bf16 %v5707_v23  ;;  %v5708_v54 = vunpack.i.l.bf16 %v5707_v23 }
 0xccc   :  { %2891 = vmatprep.mubr.bf16.mxu0 %v2678_v15  ;;  %v5714_v32 = vunpack.i.h.bf16 %v5712_v28  ;;  %v5713_v1 = vunpack.i.l.bf16 %v5712_v28 }
 0xccd   :  { %2892 = vmatmul.mubr.bf16.gmra.mxu0 %v2677_v47  ;;  %v2628_v22 = vsel %vm965_vm10, %v7343_v38, %v5709_v56  ;;  %v2627_v4 = vsel %vm965_vm10, %v7314_v13, %v5708_v54 }
 0xcce   :  { %v5722_v57 = vpop.permute.xlu0 %5721  ;;  %v2580_v19 = vsel %vm965_vm10, %v7141_v40, %v5714_v32  ;;  %v2579_v46 = vsel %vm965_vm10, %v7119_v60, %v5713_v1 }
 0xccf   :  { %v5717_v61 = vpop.permute.xlu1 %5716  ;;  %v5724_v21 = vunpack.i.h.bf16 %v5722_v57  ;;  %v5723_v63 = vunpack.i.l.bf16 %v5722_v57 }
 0xcd0   :  { %v5719_v0 = vunpack.i.h.bf16 %v5717_v61  ;;  %v5718_v20 = vunpack.i.l.bf16 %v5717_v61 }
 0xcd1   :  { %v2643_v60 = vsel %vm197_vm2, %v2627_v4, %v5723_v63  ;;  %v2644_v24 = vsel %vm197_vm2, %v2628_v22, %v5724_v21 }
 0xcd2   :  { %v7494_v16 = vpop.permute.xlu0 %5731  ;;  %v2595_v31 = vsel %vm197_vm2, %v2579_v46, %v5718_v20  ;;  %v2596_v11 = vsel %vm197_vm2, %v2580_v19, %v5719_v0 }
 0xcd3   :  { %v5727_v58 = vpop.permute.xlu1 %5726  ;;  %v2611_v12 = vsel %vm1372_vm3, %v2595_v31, %v5698_v51  ;;  %v2612_v7 = vsel %vm1372_vm3, %v2596_v11, %v5699_v8 }
 0xcd4   :  { %v2680_v50 = vpack.c.bf16 %v2612_v7, %v2611_v12  ;;  %v5729_v15 = vunpack.i.h.bf16 %v5727_v58  ;;  %v5728_v28 = vunpack.i.l.bf16 %v5727_v58 }
 0xcd6   :  { %v5737_v29 = vpop.permute.xlu0 %5736 }
 0xcd7   :  { %v5739_v62 = vunpack.i.h.bf16 %v5737_v29  ;;  %v5738_v40 = vunpack.i.l.bf16 %v5737_v29  ;;  %v5747_v36 = vpop.permute.xlu1 %5746 }
 0xcd8   :  { %v5749_v2 = vunpack.i.h.bf16 %v5747_v36  ;;  %v5748_v42 = vunpack.i.l.bf16 %v5747_v36  ;;  %v5733_v36 = vunpack.i.l.bf16 %v7494_v16 }
 0xcd9   :  { %v2659_v35 = vsel %vm1372_vm3, %v2643_v60, %v5738_v40  ;;  %v2660_v3 = vsel %vm1372_vm3, %v2644_v24, %v5739_v62  ;;  %v5734_v40 = vunpack.i.h.bf16 %v7494_v16 }
 0xcda   :  { %v5742_v44 = vpop.permute.xlu0 %5741  ;;  %v2681_v38 = vpack.c.bf16 %v2660_v3, %v2659_v35  ;;  %v2582_v53 = vsel %vm965_vm10, %v7178_v34, %v5749_v2  ;;  %v2581_v52 = vsel %vm965_vm10, %v7133_v26, %v5748_v42 }
 0xcdb   :  { %v5752_v13 = vpop.permute.xlu1 %5751  ;;  %v5744_v18 = vunpack.i.h.bf16 %v5742_v44  ;;  %v5743_v17 = vunpack.i.l.bf16 %v5742_v44 }
 0xcdc   :  { %v5754_v14 = vunpack.i.h.bf16 %v5752_v13  ;;  %v5753_v41 = vunpack.i.l.bf16 %v5752_v13  ;;  %2899 = vmatprep.mubr.bf16.mxu0 %v2681_v38 }
 0xcdd   :  { %2900 = vmatmul.mubr.bf16.gmra.mxu0 %v2680_v50  ;;  %v2630_v47 = vsel %vm965_vm10, %v7364_v25, %v5744_v18  ;;  %v2629_v57 = vsel %vm965_vm10, %v7346_v43, %v5743_v17 }
 0xcde   :  { %v5757_v59 = vpop.permute.xlu0 %5756  ;;  %v2597_v48 = vsel %vm197_vm2, %v2581_v52, %v5753_v41  ;;  %v2598_v23 = vsel %vm197_vm2, %v2582_v53, %v5754_v14  ;;  %v6112_v53 = vld [vmem:[#allocation9 + $0x88] sm:$0xff]  }
 0xcdf   :  { %v5777_v55 = vpop.permute.xlu1 %5776  ;;  %v5759_v10 = vunpack.i.h.bf16 %v5757_v59  ;;  %v5758_v45 = vunpack.i.l.bf16 %v5757_v59  ;;  %v2613_v26 = vsel %vm1372_vm3, %v2597_v48, %v5728_v28  ;;  %v2614_v0 = vsel %vm1372_vm3, %v2598_v23, %v5729_v15  ;;  %5479 = vmatprep.subr.bf16.mxu0 %v6112_v53 }
 0xce0   :  { %v5779_v25 = vunpack.i.h.bf16 %v5777_v55  ;;  %v5778_v19 = vunpack.i.l.bf16 %v5777_v55  ;;  %v2683_v21 = vpack.c.bf16 %v2614_v0, %v2613_v26  ;;  %5480 = vmatpush3.bf16.msra.mxu0 %v6112_v53 }
 0xce1   :  { %v2645_v20 = vsel %vm197_vm2, %v2629_v57, %v5758_v45  ;;  %v2646_v56 = vsel %vm197_vm2, %v2630_v47, %v5759_v10  ;;  %v6113_v10 = vld [vmem:[#allocation9 + $0x80] sm:$0xff]  }
 0xce2   :  { %v5762_v61 = vpop.permute.xlu0 %5761  ;;  %v2584_v60 = vsel %vm965_vm10, %v7214_v27, %v5779_v25  ;;  %v2583_v24 = vsel %vm965_vm10, %v7182_v6, %v5778_v19  ;;  %5481 = vmatprep.subr.bf16.mxu0 %v6113_v10 }
 0xce3   :  { %v5764_v34 = vunpack.i.h.bf16 %v5762_v61  ;;  %v5763_v32 = vunpack.i.l.bf16 %v5762_v61  ;;  %v5782_v1 = vpop.permute.xlu1 %5781  ;;  %v7549_v61 = vld [vmem:[%s8674_s9] ss:$0 sm:$0xff] }
 0xce4   :  { %v5784_v63 = vunpack.i.h.bf16 %v5782_v1  ;;  %v5783_v31 = vunpack.i.l.bf16 %v5782_v1  ;;  %v5465_v41 = vpop.f32.mrf.mxu1  ;;  %5482 = vmatpush3.bf16.msra.mxu0 %v6113_v10 }
 0xce5   :  { %v2661_v54 = vsel %vm1372_vm3, %v2645_v20, %v5763_v32  ;;  %v2662_v58 = vsel %vm1372_vm3, %v2646_v56, %v5764_v34 }
 0xce6   :  { %v5767_v46 = vpop.permute.xlu0 %5766  ;;  %v2684_v43 = vpack.c.bf16 %v2662_v58, %v2661_v54  ;;  %v2599_v3 = vsel %vm197_vm2, %v2583_v24, %v5783_v31  ;;  %v2958_v59 = vpop.f32.mrf.mxu1 }
 0xce7   :  { %v5769_v11 = vunpack.i.h.bf16 %v5767_v46  ;;  %v5768_v8 = vunpack.i.l.bf16 %v5767_v46  ;;  %v5787_v51 = vpop.permute.xlu1 %5786 }
 0xce8   :  { %v5789_v29 = vunpack.i.h.bf16 %v5787_v51  ;;  %v5788_v22 = vunpack.i.l.bf16 %v5787_v51  ;;  %2907 = vmatprep.mubr.bf16.mxu0 %v2684_v43  ;;  %v5466_v55 = vpop.f32.mrf.mxu1 }
 0xce9   :  { %v2632_v4 = vsel %vm965_vm10, %v7389_v9, %v5769_v11  ;;  %v2631_v62 = vsel %vm965_vm10, %v7367_v49, %v5768_v8  ;;  %2908 = vmatmul.mubr.bf16.gmra.mxu0 %v2683_v21  ;;  %v2600_v9 = vsel %vm197_vm2, %v2584_v60, %v5784_v63 }
 0xcea   :  { %v5772_v12 = vpop.permute.xlu0 %5771  ;;  %v2647_v49 = vsel %vm197_vm2, %v2631_v62, %v5733_v36  ;;  %v2648_v44 = vsel %vm197_vm2, %v2632_v4, %v5734_v40  ;;  %v2615_v38 = vsel %vm1372_vm3, %v2599_v3, %v5788_v22  ;;  %v2616_v16 = vsel %vm1372_vm3, %v2600_v9, %v5789_v29  ;;  %v2961_v48 = vpop.f32.mrf.mxu1 }
 0xceb   :  { %v5774_v7 = vunpack.i.h.bf16 %v5772_v12  ;;  %v5773_v35 = vunpack.i.l.bf16 %v5772_v12  ;;  %v2686_v42 = vpack.c.bf16 %v2616_v16, %v2615_v38 }
 0xcec   :  { %v5469_v57 = vpop.f32.mrf.mxu1 }
 0xced   :  { %v2663_v27 = vsel %vm1372_vm3, %v2647_v49, %v5773_v35  ;;  %v2664_v2 = vsel %vm1372_vm3, %v2648_v44, %v5774_v7 }
 0xcee   :  { %v2687_v6 = vpack.c.bf16 %v2664_v2, %v2663_v27  ;;  %v2974_v20 = vpop.f32.mrf.mxu1 }
 0xcf0   :  { %2915 = vmatprep.mubr.bf16.mxu0 %v2687_v6  ;;  %v5470_v63 = vpop.f32.mrf.mxu1 }
 0xcf1   :  { %2916 = vmatmul.mubr.bf16.gmra.mxu0 %v2686_v42 }
 0xcf2   :  { %v2977_v36 = vpop.f32.mrf.mxu1 }
 0xd5d   :  { %v5174_v13 = vpop.f32.mrf.mxu0 }
 0xd5f   :  { %v5175_v50 = vpop.f32.mrf.mxu0 }
 0xd60   :  { %v5176_v28 = vadd.f32 %v5175_v50, %v5174_v13 }
 0xd61   :  { %v5177_v14 = vpop.f32.mrf.mxu0 }
 0xd62   :  { %v2862_v26 = vadd.f32 %v5176_v28, %v7549_v61 }
 0xd63   :  { %v5178_v18 = vpop.f32.mrf.mxu0 }
 0xd64   :  { %v5179_v23 = vadd.f32 %v5178_v18, %v5177_v14  ;;  %v2959_v46 = vadd.f32 %v2958_v59, %v2862_v26 }
 0xd66   :  { %v2865_v34 = vadd.f32 %v5179_v23, %v7549_v61  ;;  %v3044_v22 = vsel %vm965_vm10, %v2959_v46, 0.0 }
 0xd68   :  { %v2962_v54 = vadd.f32 %v2961_v48, %v2865_v34  ;;  %v5473_v48 = vpop.f32.mrf.mxu1 }
 0xd6a   :  { %v3045_v11 = vsel %vm965_vm10, %v2962_v54, 0.0 }
 0xd6b   :  { %v3046_v60 = vadd.f32 %v3045_v11, %v3044_v22 }
 0xd6d   :  { %v5180_v17 = vpop.f32.mrf.mxu0 }
 0xd6f   :  { %v5181_v52 = vpop.f32.mrf.mxu0 }
 0xd70   :  { %v5182_v47 = vadd.f32 %v5181_v52, %v5180_v17 }
 0xd71   :  { %v5183_v45 = vpop.f32.mrf.mxu0 }
 0xd72   :  { %v2870_v0 = vadd.f32 %v5182_v47, %v7549_v61  ;;  %v2990_v47 = vpop.f32.mrf.mxu1 }
 0xd73   :  { %v5184_v15 = vpop.f32.mrf.mxu0 }
 0xd74   :  { %v5185_v32 = vadd.f32 %v5184_v15, %v5183_v45  ;;  %v2967_v43 = vadd.f32 %v5465_v41, %v2870_v0  ;;  %v5474_v26 = vpop.f32.mrf.mxu1 }
 0xd76   :  { %v2873_v58 = vadd.f32 %v5185_v32, %v7549_v61  ;;  %v3047_v4 = vsel %vm965_vm10, %v2967_v43, 0.0 }
 0xd77   :  { %v3048_v3 = vadd.f32 %v3047_v4, %v3046_v60 }
 0xd78   :  { %v2970_v8 = vadd.f32 %v5466_v55, %v2873_v58 }
 0xd7a   :  { %v3049_v12 = vsel %vm965_vm10, %v2970_v8, 0.0 }
 0xd7b   :  { %v3050_v38 = vadd.f32 %v3049_v12, %v3048_v3 }
 0xd7d   :  { %v5186_v1 = vpop.f32.mrf.mxu0 }
 0xd7f   :  { %v5187_v56 = vpop.f32.mrf.mxu0 }
 0xd80   :  { %v5188_v25 = vadd.f32 %v5187_v56, %v5186_v1 }
 0xd81   :  { %v5189_v19 = vpop.f32.mrf.mxu0 }
 0xd82   :  { %v2878_v21 = vadd.f32 %v5188_v25, %v7549_v61 }
 0xd83   :  { %v5190_v31 = vpop.f32.mrf.mxu0 }
 0xd84   :  { %v5191_v51 = vadd.f32 %v5190_v31, %v5189_v19  ;;  %v2975_v62 = vadd.f32 %v2974_v20, %v2878_v21  ;;  %v2993_v31 = vpop.f32.mrf.mxu1 }
 0xd85   :  { %v5192_v29 = vpop.f32.mrf.mxu0 }
 0xd86   :  { %v2881_v40 = vadd.f32 %v5191_v51, %v7549_v61  ;;  %v3051_v49 = vsel %vm965_vm10, %v2975_v62, 0.0 }
 0xd87   :  { %v5193_v24 = vpop.f32.mrf.mxu0  ;;  %v3052_v42 = vadd.f32 %v3051_v49, %v3050_v38 }
 0xd88   :  { %v2978_v7 = vadd.f32 %v2977_v36, %v2881_v40  ;;  %v5194_v35 = vadd.f32 %v5193_v24, %v5192_v29 }
 0xd89   :  { %v5195_v9 = vpop.f32.mrf.mxu0 }
 0xd8a   :  { %v2886_v44 = vadd.f32 %v5194_v35, %v7549_v61  ;;  %v3053_v27 = vsel %vm965_vm10, %v2978_v7, 0.0 }
 0xd8b   :  { %v5196_v16 = vpop.f32.mrf.mxu0  ;;  %v3054_v14 = vadd.f32 %v3053_v27, %v3052_v42 }
 0xd8c   :  { %v2983_v2 = vadd.f32 %v5469_v57, %v2886_v44  ;;  %v5197_v6 = vadd.f32 %v5196_v16, %v5195_v9 }
 0xd8d   :  { %v5198_v41 = vpop.f32.mrf.mxu0 }
 0xd8e   :  { %v3055_v13 = vsel %vm965_vm10, %v2983_v2, 0.0  ;;  %v2889_v50 = vadd.f32 %v5197_v6, %v7549_v61 }
 0xd8f   :  { %v3056_v17 = vadd.f32 %v3055_v13, %v3054_v14  ;;  %v5199_v52 = vpop.f32.mrf.mxu0 }
 0xd90   :  { %v2986_v18 = vadd.f32 %v5470_v63, %v2889_v50  ;;  %v5200_v21 = vadd.f32 %v5199_v52, %v5198_v41 }
 0xd91   :  { %v5201_v45 = vpop.f32.mrf.mxu0 }
 0xd92   :  { %v3057_v59 = vsel %vm965_vm10, %v2986_v18, 0.0  ;;  %v2894_v60 = vadd.f32 %v5200_v21, %v7549_v61 }
 0xd93   :  { %v3058_v53 = vadd.f32 %v3057_v59, %v3056_v17  ;;  %v5202_v28 = vpop.f32.mrf.mxu0 }
 0xd94   :  { %v5203_v63 = vadd.f32 %v5202_v28, %v5201_v45  ;;  %v7610_v59 = vadd.f32 %v2990_v47, %v2894_v60 }
 0xd95   :  { %v3059_v55 = vrot.slane %v3058_v53, 4 }
 0xd96   :  { %v2897_v24 = vadd.f32 %v5203_v63, %v7549_v61 }
 0xd97   :  { %v3060_v10 = vadd.f32 %v3059_v55, %v3058_v53 }
 0xd98   :  { %v7604_v13 = vadd.f32 %v2993_v31, %v2897_v24 }
 0xd99   :  { %v3061_v23 = vrot.slane %v3060_v10, 2 }
 0xd9b   :  { %v3062_v15 = vadd.f32 %v3061_v23, %v3060_v10 }
 0xd9d   :  { %v3063_v57 = vrot.slane %v3062_v15, 1  ;;  %v5204_v34 = vpop.f32.mrf.mxu0 }
 0xd9f   :  { %v3064_v32 = vadd.f32 %v3063_v57, %v3062_v15  ;;  %v5205_v1 = vpop.f32.mrf.mxu0  ;;  %v3066_v57 = vsel %vm965_vm10, %v7604_v13, 0.0 }
 0xda1   :  { %v3086_v0 = vmul.f32 0.015625, %v3064_v32  ;;  %v5207_v20 = vpop.f32.mrf.mxu0 }
 0xda3   :  { %v7567_v56 = vsub.f32 %v2959_v46, %v3086_v0  ;;  %v7569_v58 = vsub.f32 %v2962_v54, %v3086_v0  ;;  %v7571_v25 = vsub.f32 %v2967_v43, %v3086_v0  ;;  %v7573_v19 = vsub.f32 %v2970_v8, %v3086_v0  ;;  %v5208_v22 = vpop.f32.mrf.mxu0  ;;  %v7583_v43 = vpop.f32.mrf.mxu1 }
 0xda4   :  { %v7575_v11 = vsub.f32 %v2975_v62, %v3086_v0  ;;  %v5206_v54 = vadd.f32 %v5205_v1, %v5204_v34  ;;  %v7585_v8 = vsub.f32 %v2978_v7, %v3086_v0  ;;  %v7593_v12 = vsub.f32 %v2983_v2, %v3086_v0 }
 0xda5   :  { %v3104_v51 = vmul.f32 %v7567_v56, %v7567_v56  ;;  %v3105_v29 = vmul.f32 %v7569_v58, %v7569_v58  ;;  %v3106_v46 = vmul.f32 %v7571_v25, %v7571_v25  ;;  %v3107_v4 = vmul.f32 %v7573_v19, %v7573_v19  ;;  %v3006_v38 = vpop.f32.mrf.mxu1 }
 0xda6   :  { %v3108_v35 = vmul.f32 %v7575_v11, %v7575_v11  ;;  %v5209_v3 = vadd.f32 %v5208_v22, %v5207_v20  ;;  %v2902_v44 = vadd.f32 %v5206_v54, %v7549_v61  ;;  %v7599_v16 = vsub.f32 %v2986_v18, %v3086_v0 }
 0xda7   :  { %v3120_v62 = vsel %vm965_vm10, %v3104_v51, 0.0  ;;  %v3121_v40 = vsel %vm965_vm10, %v3105_v29, 0.0  ;;  %v3123_v7 = vsel %vm965_vm10, %v3106_v46, 0.0  ;;  %v3109_v27 = vmul.f32 %v7585_v8, %v7585_v8  ;;  %v5478_v10 = vpop.f32.mrf.mxu1 }
 0xda8   :  { %v3122_v36 = vadd.f32 %v3121_v40, %v3120_v62  ;;  %v3125_v6 = vsel %vm965_vm10, %v3107_v4, 0.0  ;;  %v2905_v50 = vadd.f32 %v5209_v3, %v7549_v61  ;;  %v3110_v41 = vmul.f32 %v7593_v12, %v7593_v12 }
 0xda9   :  { %v5210_v9 = vpop.f32.mrf.mxu0  ;;  %v3127_v17 = vsel %vm965_vm10, %v3108_v35, 0.0  ;;  %v7612_v52 = vadd.f32 %v5473_v48, %v2902_v44  ;;  %v3111_v45 = vmul.f32 %v7599_v16, %v7599_v16  ;;  %v3129_v23 = vsel %vm965_vm10, %v3109_v27, 0.0  ;;  %v3009_v31 = vpop.f32.mrf.mxu1 }
 0xdaa   :  { %v3124_v49 = vadd.f32 %v3123_v7, %v3122_v36  ;;  %v3002_v34 = vadd.f32 %v5474_v26, %v2905_v50  ;;  %v3131_v32 = vsel %vm965_vm10, %v3110_v41, 0.0  ;;  %v3065_v48 = vsel %vm965_vm10, %v7610_v59, 0.0 }
 0xdab   :  { %v5211_v2 = vpop.f32.mrf.mxu0  ;;  %v3068_v20 = vsel %vm965_vm10, %v7612_v52, 0.0  ;;  %v3133_v51 = vsel %vm965_vm10, %v3111_v45, 0.0  ;;  %v3067_v29 = vadd.f32 %v3066_v57, %v3065_v48  ;;  %v6114_v48 = vld [vmem:[#allocation9 + $0x78] sm:$0xff]  }
 0xdac   :  { %v3126_v42 = vadd.f32 %v3125_v6, %v3124_v49  ;;  %v5212_v14 = vadd.f32 %v5211_v2, %v5210_v9  ;;  %v3070_v54 = vsel %vm965_vm10, %v3002_v34, 0.0  ;;  %5232 = vmatprep.subr.bf16.mxu1 %v6114_v48  ;;  %v6119_v48 = vld [vmem:[#allocation9 + $0x28] sm:$0xff]  }
 0xdad   :  { %v5213_v18 = vpop.f32.mrf.mxu0  ;;  %v3069_v62 = vadd.f32 %v3068_v20, %v3067_v29 }
 0xdae   :  { %v3128_v53 = vadd.f32 %v3127_v17, %v3126_v42  ;;  %v2910_v55 = vadd.f32 %v5212_v14, %v7549_v61 }
 0xdaf   :  { %v5214_v15 = vpop.f32.mrf.mxu0  ;;  %v3071_v35 = vadd.f32 %v3070_v54, %v3069_v62 }
 0xdb0   :  { %v3130_v28 = vadd.f32 %v3129_v23, %v3128_v53  ;;  %v5215_v47 = vadd.f32 %v5214_v15, %v5213_v18  ;;  %v3007_v21 = vadd.f32 %v3006_v38, %v2910_v55 }
 0xdb1   :  { %v5216_v1 = vpop.f32.mrf.mxu0 }
 0xdb2   :  { %v3132_v0 = vadd.f32 %v3131_v32, %v3130_v28  ;;  %v2913_v63 = vadd.f32 %v5215_v47, %v7549_v61  ;;  %v3072_v60 = vsel %vm965_vm10, %v3007_v21, 0.0 }
 0xdb3   :  { %v5217_v46 = vpop.f32.mrf.mxu0  ;;  %v3073_v38 = vadd.f32 %v3072_v60, %v3071_v35 }
 0xdb4   :  { %v3134_v26 = vadd.f32 %v3133_v51, %v3132_v0  ;;  %v3010_v22 = vadd.f32 %v3009_v31, %v2913_v63  ;;  %v5218_v4 = vadd.f32 %v5217_v46, %v5216_v1  ;;  %v6116_v1 = vld [vmem:[#allocation9 + $0x70] sm:$0xff]  }
 0xdb5   :  { %v5219_v40 = vpop.f32.mrf.mxu0  ;;  %v6117_v51 = vld [vmem:[#allocation9 + $0x30] sm:$0xff]  }
 0xdb6   :  { %v3135_v36 = vrot.slane %v3134_v26, 4  ;;  %v2918_v24 = vadd.f32 %v5218_v4, %v7549_v61  ;;  %v3074_v9 = vsel %vm965_vm10, %v3010_v22, 0.0 }
 0xdb7   :  { %v5220_v7 = vpop.f32.mrf.mxu0  ;;  %v3075_v42 = vadd.f32 %v3074_v9, %v3073_v38  ;;  %v7679_v38 = vpop.permute.xlu0 %3210 }
 0xdb8   :  { %v3136_v3 = vadd.f32 %v3135_v36, %v3134_v26  ;;  %v3015_v49 = vadd.f32 %v7583_v43, %v2918_v24  ;;  %v5221_v44 = vadd.f32 %v5220_v7, %v5219_v40  ;;  %8749 = vst [vmem:[#allocation19_spill] sm:$0xff] %v7679_v38 }
 0xdba   :  { %v3137_v27 = vrot.slane %v3136_v3, 2  ;;  %v3076_v6 = vsel %vm965_vm10, %v3015_v49, 0.0  ;;  %v2921_v2 = vadd.f32 %v5221_v44, %v7549_v61  ;;  %v6115_v61 = vld [vmem:[#allocation9 + $0x38] sm:$0xff]  }
 0xdbb   :  { %v3077_v41 = vadd.f32 %v3076_v6, %v3075_v42  ;;  %5233 = vmatpush3.bf16.msra.mxu1 %v6115_v61 }
 0xdbc   :  { %v3138_v50 = vadd.f32 %v3137_v27, %v3136_v3  ;;  %v3018_v14 = vadd.f32 %v5478_v10, %v2921_v2  ;;  %5234 = vmatprep.subr.bf16.mxu1 %v6116_v1 }
 0xdbe   :  { %v3139_v17 = vrot.slane %v3138_v50, 1  ;;  %v3078_v18 = vsel %vm965_vm10, %v3018_v14, 0.0 }
 0xdbf   :  { %v3079_v53 = vadd.f32 %v3078_v18, %v3077_v41  ;;  %5235 = vmatpush3.bf16.msra.mxu1 %v6117_v51 }
 0xdc0   :  { %v3140_v55 = vadd.f32 %v3139_v17, %v3138_v50 }
 0xdc1   :  { %v3080_v45 = vrot.slane %v3079_v53, 4 }
 0xdc2   :  { %v3162_v23 = vmul.f32 0.015625, %v3140_v55 }
 0xdc3   :  { %v3081_v15 = vadd.f32 %v3080_v45, %v3079_v53 }
 0xdc4   :  { %v3164_v43 = vadd.f32 1e-08, %v3162_v23 }
 0xdc5   :  { %v3082_v28 = vrot.slane %v3081_v15, 2 }
 0xdc6   :  { %6138 = vrsqrt.f32 %v3164_v43 }
 0xdc7   :  { %v3083_v57 = vadd.f32 %v3082_v28, %v3081_v15 }
 0xdc9   :  { %v3084_v47 = vrot.slane %v3083_v57, 1 }
 0xdcb   :  { %v3085_v32 = vadd.f32 %v3084_v47, %v3083_v57 }
 0xdcd   :  { %v3087_v0 = vmul.f32 0.015625, %v3085_v32  ;;  %v6118_v32 = vld [vmem:[#allocation9 + $0x68] sm:$0xff]  }
 0xdce   :  { %5236 = vmatprep.subr.bf16.mxu1 %v6118_v32 }
 0xdcf   :  { %v7636_v10 = vsub.f32 %v7610_v59, %v3087_v0  ;;  %v7639_v20 = vsub.f32 %v7604_v13, %v3087_v0  ;;  %v7642_v63 = vsub.f32 %v7612_v52, %v3087_v0  ;;  %v7644_v31 = vsub.f32 %v3002_v34, %v3087_v0  ;;  %5237 = vmatpush3.bf16.msra.mxu1 %v6119_v48 }
 0xdd0   :  { %v7652_v26 = vsub.f32 %v3007_v21, %v3087_v0  ;;  %v7654_v13 = vsub.f32 %v3010_v22, %v3087_v0  ;;  %v7656_v52 = vsub.f32 %v3015_v49, %v3087_v0  ;;  %v7658_v34 = vsub.f32 %v3018_v14, %v3087_v0 }
 0xdd1   :  { %v3112_v29 = vmul.f32 %v7636_v10, %v7636_v10  ;;  %v3113_v46 = vmul.f32 %v7639_v20, %v7639_v20  ;;  %v3114_v59 = vmul.f32 %v7642_v63, %v7642_v63  ;;  %v7662_v4 = vmul.f32 %v7644_v31, %v7644_v31 }
 0xdd2   :  { %v3116_v15 = vmul.f32 %v7652_v26, %v7652_v26 }
 0xdd3   :  { %v6139_v54 = vpop.eup %6138  ;;  %v3141_v62 = vsel %vm965_vm10, %v3112_v29, 0.0  ;;  %v3142_v40 = vsel %vm965_vm10, %v3113_v46, 0.0  ;;  %v3144_v36 = vsel %vm965_vm10, %v3114_v59, 0.0 }
 0xdd4   :  { %v3168_v21 = vmul.f32 %v6139_v54, %v7567_v56  ;;  %v3169_v22 = vmul.f32 %v6139_v54, %v7569_v58  ;;  %v3170_v60 = vmul.f32 %v6139_v54, %v7571_v25  ;;  %v3171_v24 = vmul.f32 %v6139_v54, %v7573_v19 }
 0xdd5   :  { %v3172_v35 = vmul.f32 %v6139_v54, %v7575_v11  ;;  %v3173_v7 = vmul.f32 %v6139_v54, %v7585_v8  ;;  %v3174_v3 = vmul.f32 %v6139_v54, %v7593_v12  ;;  %v3175_v9 = vmul.f32 %v6139_v54, %v7599_v16 }
 0xdd6   :  { %v3194_v49 = vmul.f32 %v7406_v37, %v3168_v21  ;;  %v3195_v44 = vmul.f32 %v7406_v37, %v3169_v22  ;;  %v3196_v56 = vmul.f32 %v7406_v37, %v3170_v60  ;;  %v3197_v58 = vmul.f32 %v7406_v37, %v3171_v24  ;;  %v6121_v21 = vld [vmem:[#allocation9 + $0x20] sm:$0xff]  }
 0xdd7   :  { %v3198_v25 = vmul.f32 %v7406_v37, %v3172_v35  ;;  %v3199_v19 = vmul.f32 %v7406_v37, %v3173_v7  ;;  %v3200_v11 = vmul.f32 %v7406_v37, %v3174_v3  ;;  %v3201_v8 = vmul.f32 %v7406_v37, %v3175_v9  ;;  %v6122_v3 = vld [vmem:[#allocation9 + $0x58] sm:$0xff]  }
 0xdd8   :  { %v3216_v12 = vadd.f32 %v7679_v38, %v3194_v49  ;;  %v3217_v16 = vadd.f32 %v7679_v38, %v3195_v44  ;;  %v3218_v27 = vadd.f32 %v7679_v38, %v3196_v56  ;;  %v3219_v6 = vadd.f32 %v7679_v38, %v3197_v58  ;;  %v6123_v9 = vld [vmem:[#allocation9 + $0x18] sm:$0xff]  }
 0xdd9   :  { %v3220_v2 = vadd.f32 %v7679_v38, %v3198_v25  ;;  %v3221_v42 = vadd.f32 %v7679_v38, %v3199_v19  ;;  %v3222_v50 = vadd.f32 %v7679_v38, %v3200_v11  ;;  %v3223_v14 = vadd.f32 %v7679_v38, %v3201_v8 }
 0xdda   :  { %vm3232_vm12 = vcmp.ge.f32.partialorder %v3216_v12, 0.0  ;;  %vm3233_vm13 = vcmp.ge.f32.partialorder %v3217_v16, 0.0  ;;  %vm3234_vm14 = vcmp.ge.f32.partialorder %v3218_v27, 0.0  ;;  %vm3235_vm15 = vcmp.ge.f32.partialorder %v3219_v6, 0.0 }
 0xddb   :  { %vm3236_vm0 = vcmp.ge.f32.partialorder %v3220_v2, 0.0  ;;  %vm3237_vm4 = vcmp.ge.f32.partialorder %v3221_v42, 0.0  ;;  %vm3238_vm5 = vcmp.ge.f32.partialorder %v3222_v50, 0.0  ;;  %vm3239_vm6 = vcmp.ge.f32.partialorder %v3223_v14, 0.0 }
 0xddc   :  { %v3248_v41 = vmul.f32 0.2, %v3216_v12  ;;  %v3249_v17 = vmul.f32 0.2, %v3217_v16  ;;  %v3250_v18 = vmul.f32 0.2, %v3218_v27  ;;  %v3143_v53 = vadd.f32 %v3142_v40, %v3141_v62 }
 0xddd   :  { %v3251_v55 = vmul.f32 0.2, %v3219_v6  ;;  %v3252_v45 = vmul.f32 0.2, %v3220_v2  ;;  %v3253_v23 = vmul.f32 0.2, %v3221_v42  ;;  %v3117_v54 = vmul.f32 %v7654_v13, %v7654_v13 }
 0xdde   :  { %v3254_v43 = vmul.f32 0.2, %v3222_v50  ;;  %v3255_v28 = vmul.f32 0.2, %v3223_v14  ;;  %v3264_v57 = vsel %vm3232_vm12, %v3216_v12, %v3248_v41  ;;  %v3265_v47 = vsel %vm3233_vm13, %v3217_v16, %v3249_v17  ;;  %v6120_v40 = vld [vmem:[#allocation9 + $0x60] sm:$0xff]  }
 0xddf   :  { %v3266_v61 = vsel %vm3234_vm14, %v3218_v27, %v3250_v18  ;;  %v3267_v1 = vsel %vm3235_vm15, %v3219_v6, %v3251_v55  ;;  %v3268_v0 = vsel %vm3236_vm0, %v3220_v2, %v3252_v45  ;;  %v3269_v51 = vsel %vm3237_vm4, %v3221_v42, %v3253_v23  ;;  %3280 = vst.msk [vmem:[#allocation2 + $0x11] sm:$0xff] %vm965_vm10, %v3264_v57  ;;  %v7749_v18 = vld [vmem:[#allocation2 + $0x90] sm:$0xff] }
 0xde0   :  { %3281 = vst.msk [vmem:[#allocation2 + $0x21] sm:$0xff] %vm965_vm10, %v3265_v47  ;;  %v3270_v29 = vsel %vm3238_vm5, %v3222_v50, %v3254_v43  ;;  %v3271_v46 = vsel %vm3239_vm6, %v3223_v14, %v3255_v28  ;;  %3285 = vst.msk [vmem:[#allocation2 + $0x61] sm:$0xff] %vm965_vm10, %v3269_v51  ;;  %v3145_v59 = vadd.f32 %v3144_v36, %v3143_v53  ;;  %v3146_v62 = vsel %vm965_vm10, %v7662_v4, 0.0  ;;  %v7751_v53 = vld [vmem:[#allocation2 + $0x98] sm:$0x3] }
 0xde1   :  { %3282 = vst.msk [vmem:[#allocation2 + $0x31] sm:$0xff] %vm965_vm10, %v3266_v61  ;;  %3283 = vst.msk [vmem:[#allocation2 + $0x41] sm:$0xff] %vm965_vm10, %v3267_v1  ;;  %v3118_v22 = vmul.f32 %v7656_v52, %v7656_v52  ;;  %v3119_v36 = vmul.f32 %v7658_v34, %v7658_v34  ;;  %v3148_v24 = vsel %vm965_vm10, %v3116_v15, 0.0  ;;  %5238 = vmatprep.subr.bf16.mxu1 %v6120_v40  ;;  %v3150_v7 = vsel %vm965_vm10, %v3117_v54, 0.0  ;;  %v7783_v54 = vld [vmem:[#allocation2 + $0x8] sm:$0x3] }
 0xde2   :  { %3284 = vst.msk [vmem:[#allocation2 + $0x51] sm:$0xff] %vm965_vm10, %v3268_v0  ;;  %3286 = vst.msk [vmem:[#allocation2 + $0x71] sm:$0xff] %vm965_vm10, %v3270_v29  ;;  %v3147_v60 = vadd.f32 %v3146_v62, %v3145_v59  ;;  %5239 = vmatpush3.bf16.msra.mxu1 %v6121_v21  ;;  %v7776_v0 = vld [vmem:[#allocation2] sm:$0xff]  ;;  %v6124_v62 = vld [vmem:[#allocation9 + $0x50] sm:$0xff]  }
 0xde3   :  { %3287 = vst.msk [vmem:[#allocation2 + $0x81] sm:$0xff] %vm965_vm10, %v3271_v46  ;;  %v3152_v49 = vsel %vm965_vm10, %v3118_v22, 0.0  ;;  %v3154_v44 = vsel %vm965_vm10, %v3119_v36, 0.0  ;;  %5240 = vmatprep.subr.bf16.mxu1 %v6122_v3  ;;  %v3831_v3 = vrot.slane %v7749_v18, 2 }
 0xde4   :  { %v3149_v35 = vadd.f32 %v3148_v24, %v3147_v60  ;;  %v6125_v24 = vld [vmem:[#allocation9 + $0x10] sm:$0xff]  }
 0xde6   :  { %v3151_v4 = vadd.f32 %v3150_v7, %v3149_v35  ;;  %v7725_v58 = vld [vmem:[#allocation2 + $0x10] sm:$0xff]  ;;  %5241 = vmatpush3.bf16.msra.mxu1 %v6123_v9 }
 0xde7   :  { %v7723_v56 = vld [vmem:[#allocation2 + $0x20] sm:$0xff]  ;;  %v7727_v25 = vld [vmem:[#allocation2 + $0x28] sm:$0x3]  ;;  %5242 = vmatprep.subr.bf16.mxu1 %v6124_v62 }
 0xde8   :  { %v7729_v19 = vld [vmem:[#allocation2 + $0x30] sm:$0xff]  ;;  %v5795_v11 = vpack.i.bf16 %v7723_v56, %v7725_v58  ;;  %v7733_v8 = vld [vmem:[#allocation2 + $0x38] sm:$0x3]  ;;  %v3507_v12 = vrot.slane %v7723_v56, 2  ;;  %v3508_v16 = vrot.slane %v7727_v25, 2  ;;  %v7737_v27 = vld [vmem:[#allocation2 + $0x40] sm:$0xff]  ;;  %v3153_v6 = vadd.f32 %v3152_v49, %v3151_v4 }
 0xde9   :  { %v5790_v2 = vpack.i.bf16 %v7729_v19, %v7723_v56  ;;  %v3510_v42 = vrot.slane %v7729_v19, 2  ;;  %v3511_v50 = vrot.slane %v7733_v8, 2  ;;  %v7743_v14 = vld [vmem:[#allocation2 + $0x50] sm:$0xff]  ;;  %v7745_v41 = vld [vmem:[#allocation2 + $0x48] sm:$0x3]  ;;  %v7747_v17 = vld [vmem:[#allocation2 + $0x60] sm:$0xff]  ;;  %v5805_v32 = vpack.i.bf16 %v7737_v27, %v7729_v19 }
 0xdea   :  { %5796 = vrot.lane.b32.xlu1 %v5795_v11, %s6288_s4  ;;  %v7755_v55 = vsel %vm2216_vm9, %v3507_v12, %v3508_v16  ;;  %v3516_v45 = vrot.slane %v7743_v14, 2  ;;  %v5800_v23 = vpack.i.bf16 %v7743_v14, %v7737_v27  ;;  %v3513_v15 = vrot.slane %v7737_v27, 2  ;;  %v7761_v43 = vld [vmem:[#allocation2 + $0x58] sm:$0x3]  ;;  %v7763_v28 = vld [vmem:[#allocation2 + $0x68] sm:$0x3]  ;;  %5243 = vmatpush3.bf16.msra.mxu1 %v6125_v24 }
 0xdeb   :  { %v3155_v57 = vadd.f32 %v3154_v44, %v3153_v6  ;;  %5791 = vrot.lane.b32.xlu0 %v5790_v2, %s6276_s1  ;;  %v7767_v47 = vsel %vm2216_vm9, %v3510_v42, %v3511_v50  ;;  %v3514_v48 = vrot.slane %v7745_v41, 2  ;;  %v7772_v61 = vld [vmem:[#allocation2 + $0x70] sm:$0xff]  ;;  %v7774_v1 = vld [vmem:[#allocation2 + $0x78] sm:$0x3]  ;;  %v3517_v29 = vrot.slane %v7761_v43, 2  ;;  %v7790_v60 = vld [vmem:[#allocation2 + $0x80] sm:$0xff] }
 0xdec   :  { %v3951_v51 = vpack.c.bf16 %v7767_v47, %v7755_v55  ;;  %v3519_v46 = vrot.slane %v7747_v17, 2  ;;  %v3520_v59 = vrot.slane %v7763_v28, 2  ;;  %v3522_v22 = vrot.slane %v7772_v61, 2  ;;  %v7801_v9 = vld [vmem:[#allocation2 + $0x88] sm:$0x3] }
 0xded   :  { %v3156_v40 = vrot.slane %v3155_v57, 4  ;;  %v7786_v21 = vsel %vm2216_vm9, %v3513_v15, %v3514_v48  ;;  %v3523_v36 = vrot.slane %v7774_v1, 2  ;;  %v7795_v35 = vsel %vm2216_vm9, %v3516_v45, %v3517_v29  ;;  %v3299_v12 = vld [vmem:[#allocation2 + $0x18] sm:$0x3]  ;;  %v6126_v45 = vld [vmem:[#allocation9 + $0x48] sm:$0xff]  }
 0xdee   :  { %5483 = vmatprep.mubr.msk.bf16.mxu0 %vm965_vm10, %v3951_v51  ;;  %5806 = vrot.lane.b32.xlu1 %v5805_v32, %s6288_s4  ;;  %v7798_v7 = vsel %vm2216_vm9, %v3519_v46, %v3520_v59  ;;  %v3832_v4 = vrot.slane %v7751_v53, 2  ;;  %v3954_v44 = vpack.c.bf16 %v7795_v35, %v7786_v21  ;;  %v3405_v16 = vrot.slane %v7776_v0, 1  ;;  %v6127_v32 = vld [vmem:[#allocation9 + $0x8] sm:$0xff]  }
 0xdef   :  { %v3157_v49 = vadd.f32 %v3156_v40, %v3155_v57  ;;  %5801 = vrot.lane.b32.xlu0 %v5800_v23, %s6276_s1  ;;  %v7808_v11 = vsel %vm2216_vm9, %v3522_v22, %v3523_v36  ;;  %v5815_v2 = vpack.i.bf16 %v7747_v17, %v7743_v14  ;;  %v3671_v42 = vrot.slane %v7790_v60, 2  ;;  %5244 = vmatprep.subr.bf16.mxu1 %v6126_v45 }
 0xdf0   :  { %v3957_v6 = vpack.c.bf16 %v7808_v11, %v7798_v7  ;;  %v3406_v50 = vrot.slane %v7783_v54, 1  ;;  %5484 = vmatmul.mubr.msk.bf16.vlgmr.msra.gmra.mxu0 %vm965_vm10, %v3954_v44  ;;  %v5810_v15 = vpack.i.bf16 %v7772_v61, %v7747_v17  ;;  %v3672_v57 = vrot.slane %v7801_v9, 2  ;;  %5245 = vmatpush3.bf16.msra.mxu1 %v6127_v32 }
 0xdf1   :  { %v3158_v23 = vrot.slane %v3157_v49, 2  ;;  %v3504_v48 = vrot.slane %v7725_v58, 2  ;;  %v3505_v51 = vrot.slane %v3299_v12, 2  ;;  %v3408_v29 = vrot.slane %v7725_v58, 1 }
 0xdf2   :  { %5487 = vmatprep.mubr.msk.bf16.mxu0 %vm965_vm10, %v3957_v6  ;;  %5816 = vrot.lane.b32.xlu1 %v5815_v2, %s6288_s4  ;;  %v3409_v46 = vrot.slane %v3299_v12, 1  ;;  %v3833_v62 = vsel %vm2216_vm9, %v3831_v3, %v3832_v4  ;;  %v3501_v40 = vrot.slane %v7776_v0, 2  ;;  %v5825_v22 = vpack.i.bf16 %v7790_v60, %v7772_v61  ;;  %v6128_v4 = vld [vmem:[#allocation9 + $0x40] sm:$0xff]  }
 0xdf3   :  { %v3159_v59 = vadd.f32 %v3158_v23, %v3157_v49  ;;  %5811 = vrot.lane.b32.xlu0 %v5810_v15, %s6276_s1  ;;  %v7831_v36 = vsel %vm2216_vm9, %v3671_v42, %v3672_v57  ;;  %v3407_v24 = vsel %vm2119_vm11, %v3405_v16, %v3406_v50  ;;  %v3502_v44 = vrot.slane %v7783_v54, 2  ;;  %v6129_v2 = vld [vmem:[#allocation9] sm:$0xff]   ;;  %5246 = vmatprep.subr.bf16.mxu1 %v6128_v4 }
 0xdf4   :  { %v5820_v49 = vpack.i.bf16 %v7749_v18, %v7790_v60  ;;  %v7838_v12 = vsel %vm2119_vm11, %v3408_v29, %v3409_v46  ;;  %v3411_v3 = vrot.slane %v7723_v56, 1  ;;  %v3506_v42 = vsel %vm2216_vm9, %v3504_v48, %v3505_v51  ;;  %5247 = vmatpush3.bf16.msra.mxu1 %v6129_v2 }
 0xdf5   :  { %v3160_v6 = vrot.slane %v3159_v59, 1  ;;  %v3412_v16 = vrot.slane %v7727_v25, 1  ;;  %v3414_v54 = vrot.slane %v7729_v19, 1  ;;  %v3415_v50 = vrot.slane %v7733_v8, 1  ;;  %5499 = vmatprep.subr.mxu1 %v8729_v30 }
 0xdf6   :  { %5826 = vrot.lane.b32.xlu1 %v5825_v22, %s6288_s4  ;;  %v3960_v23 = vpack.c.bf16 %v3833_v62, %v7831_v36  ;;  %v5835_v15 = vpack.i.bf16 %v7838_v12, %v3407_v24  ;;  %v5830_v32 = vpack.i.bf16 %v7755_v55, %v3506_v42  ;;  %v3503_v48 = vsel %vm2216_vm9, %v3501_v40, %v3502_v44 }
 0xdf7   :  { %v3161_v45 = vadd.f32 %v3160_v6, %v3159_v59  ;;  %5821 = vrot.lane.b32.xlu0 %v5820_v49, %s6276_s1  ;;  %v7854_v25 = vsel %vm2119_vm11, %v3411_v3, %v3412_v16  ;;  %v7857_v8 = vsel %vm2119_vm11, %v3414_v54, %v3415_v50  ;;  %v5840_v29 = vpack.i.bf16 %v3506_v42, %v3503_v48 }
 0xdf8   :  { %5488 = vmatmul.mubr.msk.bf16.gmra.mxu0 %vm965_vm10, %v3960_v23  ;;  %v5845_v46 = vpack.i.bf16 %v7857_v8, %v7854_v25  ;;  %v3417_v59 = vrot.slane %v7737_v27, 1  ;;  %v3418_v62 = vrot.slane %v7745_v41, 1  ;;  %v3420_v40 = vrot.slane %v7743_v14, 1 }
 0xdf9   :  { %v3163_v57 = vmul.f32 0.015625, %v3161_v45  ;;  %v3421_v22 = vrot.slane %v7761_v43, 1  ;;  %v5850_v24 = vpack.i.bf16 %v7786_v21, %v7767_v47  ;;  %v3423_v41 = vrot.slane %v7747_v17, 1 }
 0xdfa   :  { %5836 = vrot.lane.b32.xlu1 %v5835_v15, %s6287_s21  ;;  %v7873_v44 = vsel %vm2119_vm11, %v3417_v59, %v3418_v62  ;;  %v3424_v49 = vrot.slane %v7763_v28, 1  ;;  %v3426_v43 = vrot.slane %v7772_v61, 1  ;;  %v3427_v3 = vrot.slane %v7774_v1, 1 }
 0xdfb   :  { %v3165_v51 = vadd.f32 1e-08, %v3163_v57  ;;  %5831 = vrot.lane.b32.xlu0 %v5830_v32, %s6287_s21  ;;  %v7876_v6 = vsel %vm2119_vm11, %v3420_v40, %v3421_v22  ;;  %v5860_v4 = vpack.i.bf16 %v7767_v47, %v7755_v55  ;;  %v3777_v2 = vrot.slane %v7749_v18, 1 }
 0xdfc   :  { %v5865_v42 = vpack.i.bf16 %v7876_v6, %v7873_v44  ;;  %v3778_v16 = vrot.slane %v7751_v53, 1  ;;  %v3649_v54 = vrot.slane %v7790_v60, 1  ;;  %v3650_v28 = vrot.slane %v7801_v9, 1 }
 0xdfd   :  { %6140 = vrsqrt.f32 %v3165_v51  ;;  %v7894_v1 = vsel %vm2119_vm11, %v3423_v41, %v3424_v49  ;;  %v7897_v55 = vsel %vm2119_vm11, %v3426_v43, %v3427_v3  ;;  %v5870_v18 = vpack.i.bf16 %v7798_v7, %v7795_v35 }
 0xdfe   :  { %5841 = vrot.lane.b32.xlu1 %v5840_v29, %s6276_s1  ;;  %v5880_v53 = vpack.i.bf16 %v7795_v35, %v7786_v21  ;;  %v7904_v47 = vsel %vm2119_vm11, %v3777_v2, %v3778_v16  ;;  %v5885_v9 = vpack.i.bf16 %v7897_v55, %v7894_v1  ;;  %v5890_v50 = vpack.i.bf16 %v7831_v36, %v7808_v11  ;;  %v7927_v29 = vpop.permute.xlu1 %3212 }
 0xdff   :  { %5846 = vrot.lane.b32.xlu0 %v5845_v46, %s6288_s4  ;;  %v7912_v45 = vsel %vm2119_vm11, %v3649_v54, %v3650_v28 }
 0xe00   :  { %v5905_v54 = vpack.i.bf16 %v7904_v47, %v7912_v45 }
 0xe02   :  { %5856 = vrot.lane.b32.xlu1 %v5845_v46, %s6287_s21 }
 0xe03   :  { %5851 = vrot.lane.b32.xlu0 %v5850_v24, %s6287_s21 }
 0xe06   :  { %5861 = vrot.lane.b32.xlu1 %v5860_v4, %s6276_s1  ;;  %v5900_v4 = vpack.i.bf16 %v7808_v11, %v7798_v7 }
 0xe07   :  { %5866 = vrot.lane.b32.xlu0 %v5865_v42, %s6288_s4 }
 0xe0a   :  { %v6141_v60 = vpop.eup %6140  ;;  %5876 = vrot.lane.b32.xlu1 %v5865_v42, %s6287_s21 }
 0xe0b   :  { %v3176_v23 = vmul.f32 %v6141_v60, %v7636_v10  ;;  %v3177_v15 = vmul.f32 %v6141_v60, %v7639_v20  ;;  %v3178_v21 = vmul.f32 %v6141_v60, %v7642_v63  ;;  %v3179_v35 = vmul.f32 %v6141_v60, %v7644_v31  ;;  %5871 = vrot.lane.b32.xlu0 %v5870_v18, %s6287_s21 }
 0xe0c   :  { %v3180_v57 = vmul.f32 %v6141_v60, %v7652_v26  ;;  %v3181_v32 = vmul.f32 %v6141_v60, %v7654_v13  ;;  %v3182_v48 = vmul.f32 %v6141_v60, %v7656_v52  ;;  %v3183_v36 = vmul.f32 %v6141_v60, %v7658_v34 }
 0xe0d   :  { %v3202_v51 = vmul.f32 %v7397_v39, %v3176_v23  ;;  %v3203_v10 = vmul.f32 %v7397_v39, %v3177_v15  ;;  %v3204_v20 = vmul.f32 %v7397_v39, %v3178_v21  ;;  %v3205_v63 = vmul.f32 %v7397_v39, %v3179_v35  ;;  %v7967_v15 = vld [vmem:[#allocation2 + $0x130] sm:$0xff]  ;;  %v7969_v21 = vld [vmem:[#allocation2 + $0xa0] sm:$0xff]  ;;  %v7971_v35 = vld [vmem:[#allocation2 + $0xa8] sm:$0x3] }
 0xe0e   :  { %v3206_v31 = vmul.f32 %v7397_v39, %v3180_v57  ;;  %v3207_v26 = vmul.f32 %v7397_v39, %v3181_v32  ;;  %v3208_v13 = vmul.f32 %v7397_v39, %v3182_v48  ;;  %v3209_v52 = vmul.f32 %v7397_v39, %v3183_v36  ;;  %5881 = vrot.lane.b32.xlu1 %v5880_v53, %s6276_s1 }
 0xe0f   :  { %v3224_v34 = vadd.f32 %v7927_v29, %v3202_v51  ;;  %v3225_v46 = vadd.f32 %v7927_v29, %v3203_v10  ;;  %v3226_v59 = vadd.f32 %v7927_v29, %v3204_v20  ;;  %v3227_v62 = vadd.f32 %v7927_v29, %v3205_v63  ;;  %5886 = vrot.lane.b32.xlu0 %v5885_v9, %s6288_s4 }
 0xe10   :  { %v3228_v40 = vadd.f32 %v7927_v29, %v3206_v31  ;;  %v3229_v22 = vadd.f32 %v7927_v29, %v3207_v26  ;;  %v3230_v24 = vadd.f32 %v7927_v29, %v3208_v13  ;;  %v3231_v41 = vadd.f32 %v7927_v29, %v3209_v52 }
 0xe11   :  { %vm3240_vm7 = vcmp.ge.f32.partialorder %v3224_v34, 0.0  ;;  %vm3241_vm8 = vcmp.ge.f32.partialorder %v3225_v46, 0.0  ;;  %vm3242_vm12 = vcmp.ge.f32.partialorder %v3226_v59, 0.0  ;;  %vm3243_vm13 = vcmp.ge.f32.partialorder %v3227_v62, 0.0 }
 0xe12   :  { %vm3244_vm14 = vcmp.ge.f32.partialorder %v3228_v40, 0.0  ;;  %vm3245_vm15 = vcmp.ge.f32.partialorder %v3229_v22, 0.0  ;;  %vm3246_vm0 = vcmp.ge.f32.partialorder %v3230_v24, 0.0  ;;  %vm3247_vm4 = vcmp.ge.f32.partialorder %v3231_v41, 0.0  ;;  %5896 = vrot.lane.b32.xlu1 %v5885_v9, %s6287_s21 }
 0xe13   :  { %v3256_v49 = vmul.f32 0.2, %v3224_v34  ;;  %v3257_v43 = vmul.f32 0.2, %v3225_v46  ;;  %v3258_v3 = vmul.f32 0.2, %v3226_v59  ;;  %5891 = vrot.lane.b32.xlu0 %v5890_v50, %s6287_s21 }
 0xe14   :  { %v3259_v2 = vmul.f32 0.2, %v3227_v62  ;;  %v3260_v42 = vmul.f32 0.2, %v3228_v40  ;;  %v3261_v16 = vmul.f32 0.2, %v3229_v22 }
 0xe15   :  { %v3262_v28 = vmul.f32 0.2, %v3230_v24  ;;  %v3263_v18 = vmul.f32 0.2, %v3231_v41  ;;  %v3272_v53 = vsel %vm3240_vm7, %v3224_v34, %v3256_v49  ;;  %v3273_v60 = vsel %vm3241_vm8, %v3225_v46, %v3257_v43  ;;  %v7992_v34 = vld [vmem:[#allocation2 + $0x138] sm:$0x3] }
 0xe16   :  { %v3274_v9 = vsel %vm3242_vm12, %v3226_v59, %v3258_v3  ;;  %v3275_v23 = vsel %vm3243_vm13, %v3227_v62, %v3259_v2  ;;  %v3276_v50 = vsel %vm3244_vm14, %v3228_v40, %v3260_v42  ;;  %v3277_v7 = vsel %vm3245_vm15, %v3229_v22, %v3261_v16  ;;  %3288 = vst.msk [vmem:[#allocation2 + $0xb1] sm:$0xff] %vm965_vm10, %v3272_v53 }
 0xe17   :  { %3289 = vst.msk [vmem:[#allocation2 + $0xc1] sm:$0xff] %vm965_vm10, %v3273_v60  ;;  %5901 = vrot.lane.b32.xlu1 %v5900_v4, %s6276_s1  ;;  %v3278_v11 = vsel %vm3246_vm0, %v3230_v24, %v3262_v28  ;;  %v3279_v47 = vsel %vm3247_vm4, %v3231_v41, %v3263_v18  ;;  %3292 = vst.msk [vmem:[#allocation2 + $0xf1] sm:$0xff] %vm965_vm10, %v3276_v50  ;;  %5906 = vrot.lane.b32.xlu0 %v5905_v54, %s6288_s4  ;;  %v3429_v51 = vrot.slane %v7969_v21, 1 }
 0xe18   :  { %3293 = vst.msk [vmem:[#allocation2 + $0x101] sm:$0xff] %vm965_vm10, %v3277_v7  ;;  %3290 = vst.msk [vmem:[#allocation2 + $0xd1] sm:$0xff] %vm965_vm10, %v3274_v9  ;;  %v3430_v10 = vrot.slane %v7971_v35, 1 }
 0xe19   :  { %3291 = vst.msk [vmem:[#allocation2 + $0xe1] sm:$0xff] %vm965_vm10, %v3275_v23  ;;  %3294 = vst.msk [vmem:[#allocation2 + $0x111] sm:$0xff] %vm965_vm10, %v3278_v11 }
 0xe1a   :  { %3295 = vst.msk [vmem:[#allocation2 + $0x121] sm:$0xff] %vm965_vm10, %v3279_v47 }
 0xe1d   :  { %v7978_v36 = vld [vmem:[#allocation2 + $0xb0] sm:$0xff] }
 0xe1e   :  { %v7974_v32 = vld [vmem:[#allocation2 + $0xc0] sm:$0xff]  ;;  %v7976_v48 = vld [vmem:[#allocation2 + $0xc8] sm:$0x3]  ;;  %v8000_v22 = vld [vmem:[#allocation2 + $0xf0] sm:$0xff]  ;;  %v3528_v38 = vrot.slane %v7978_v36, 2 }
 0xe1f   :  { %v7982_v20 = vld [vmem:[#allocation2 + $0xd0] sm:$0xff]  ;;  %v7984_v63 = vld [vmem:[#allocation2 + $0xd8] sm:$0x3]  ;;  %v3531_v31 = vrot.slane %v7974_v32, 2  ;;  %v3532_v26 = vrot.slane %v7976_v48, 2  ;;  %v5915_v52 = vpack.i.bf16 %v7974_v32, %v7978_v36  ;;  %v3540_v3 = vrot.slane %v8000_v22, 2 }
 0xe20   :  { %v7988_v13 = vld [vmem:[#allocation2 + $0xe0] sm:$0xff]  ;;  %v3534_v46 = vrot.slane %v7982_v20, 2  ;;  %v3535_v59 = vrot.slane %v7984_v63, 2  ;;  %v5910_v62 = vpack.i.bf16 %v7982_v20, %v7974_v32  ;;  %v7998_v40 = vld [vmem:[#allocation2 + $0xe8] sm:$0x3]  ;;  %v8013_v2 = vld [vmem:[#allocation2 + $0x110] sm:$0xff] }
 0xe21   :  { %v3537_v24 = vrot.slane %v7988_v13, 2  ;;  %v8004_v41 = vsel %vm2216_vm9, %v3531_v31, %v3532_v26  ;;  %v8006_v49 = vld [vmem:[#allocation2 + $0xf8] sm:$0x3]  ;;  %v3538_v43 = vrot.slane %v7998_v40, 2  ;;  %5916 = vrot.lane.b32.xlu1 %v5915_v52, %s6288_s4  ;;  %v8011_v4 = vld [vmem:[#allocation2 + $0x100] sm:$0xff]  ;;  %v5925_v53 = vpack.i.bf16 %v7988_v13, %v7982_v20 }
 0xe22   :  { %v8016_v42 = vsel %vm2216_vm9, %v3534_v46, %v3535_v59  ;;  %5911 = vrot.lane.b32.xlu0 %v5910_v62, %s6276_s1  ;;  %v3541_v16 = vrot.slane %v8006_v49, 2  ;;  %v8020_v54 = vld [vmem:[#allocation2 + $0x108] sm:$0x3]  ;;  %v8022_v28 = vld [vmem:[#allocation2 + $0x118] sm:$0x3]  ;;  %v3543_v18 = vrot.slane %v8011_v4, 2  ;;  %v5920_v26 = vpack.i.bf16 %v8000_v22, %v7988_v13 }
 0xe23   :  { %v3963_v60 = vpack.c.bf16 %v8016_v42, %v8004_v41  ;;  %v8030_v9 = vsel %vm2216_vm9, %v3537_v24, %v3538_v43  ;;  %v3544_v23 = vrot.slane %v8020_v54, 2  ;;  %v3546_v50 = vrot.slane %v8013_v2, 2  ;;  %v8034_v7 = vld [vmem:[#allocation2 + $0x120] sm:$0xff]  ;;  %v8036_v11 = vld [vmem:[#allocation2 + $0x128] sm:$0x3] }
 0xe24   :  { %v8039_v47 = vsel %vm2216_vm9, %v3540_v3, %v3541_v16  ;;  %v3547_v31 = vrot.slane %v8022_v28, 2  ;;  %v3835_v52 = vrot.slane %v7992_v34, 2  ;;  %v3319_v46 = vld [vmem:[#allocation2 + $0xb8] sm:$0x3]  ;;  %v3674_v24 = vrot.slane %v8034_v7, 2 }
 0xe25   :  { %5491 = vmatprep.mubr.msk.bf16.mxu0 %vm965_vm10, %v3963_v60  ;;  %v3966_v59 = vpack.c.bf16 %v8039_v47, %v8030_v9  ;;  %v8049_v62 = vsel %vm2216_vm9, %v3543_v18, %v3544_v23  ;;  %5926 = vrot.lane.b32.xlu1 %v5925_v53, %s6288_s4  ;;  %v3525_v43 = vrot.slane %v7969_v21, 2  ;;  %v3675_v16 = vrot.slane %v8036_v11, 2 }
 0xe26   :  { %v8055_v3 = vsel %vm2216_vm9, %v3546_v50, %v3547_v31  ;;  %5921 = vrot.lane.b32.xlu0 %v5920_v26, %s6276_s1  ;;  %v3432_v60 = vrot.slane %v7978_v36, 1  ;;  %v3433_v57 = vrot.slane %v3319_v46, 1  ;;  %v5935_v53 = vpack.i.bf16 %v8011_v4, %v8000_v22 }
 0xe27   :  { %5492 = vmatmul.mubr.msk.bf16.gmra.mxu0 %vm965_vm10, %v3966_v59  ;;  %v3969_v18 = vpack.c.bf16 %v8055_v3, %v8049_v62  ;;  %v3431_v23 = vsel %vm2119_vm11, %v3429_v51, %v3430_v10  ;;  %v3526_v50 = vrot.slane %v7971_v35, 2  ;;  %v5930_v31 = vpack.i.bf16 %v8013_v2, %v8011_v4 }
 0xe28   :  { %v8070_v26 = vsel %vm2119_vm11, %v3432_v60, %v3433_v57  ;;  %v3529_v37 = vrot.slane %v3319_v46, 2  ;;  %v3676_v59 = vsel %vm2216_vm9, %v3674_v24, %v3675_v16  ;;  %v8750_v51 = vrot.slane %v7967_v15, 2 }
 0xe29   :  { %5495 = vmatprep.mubr.msk.bf16.mxu0 %vm965_vm10, %v3969_v18  ;;  %5936 = vrot.lane.b32.xlu1 %v5935_v53, %s6288_s4  ;;  %v5940_v10 = vpack.i.bf16 %v7967_v15, %v8034_v7  ;;  %v5950_v57 = vpack.i.bf16 %v8070_v26, %v3431_v23  ;;  %v3527_v60 = vsel %vm2216_vm9, %v3525_v43, %v3526_v50  ;;  %v3435_v46 = vrot.slane %v7974_v32, 1 }
 0xe2a   :  { %5931 = vrot.lane.b32.xlu0 %v5930_v31, %s6276_s1  ;;  %v3836_v35 = vsel %vm2216_vm9, %v8750_v51, %v3835_v52  ;;  %v3530_v18 = vsel %vm2216_vm9, %v3528_v38, %v3529_v37  ;;  %v3436_v53 = vrot.slane %v7976_v48, 1  ;;  %v3438_v31 = vrot.slane %v7982_v20, 1 }
 0xe2b   :  { %v3439_v24 = vrot.slane %v7984_v63, 1  ;;  %v3972_v16 = vpack.c.bf16 %v3836_v35, %v3676_v59  ;;  %v5955_v52 = vpack.i.bf16 %v3530_v18, %v3527_v60  ;;  %v5945_v43 = vpack.i.bf16 %v8004_v41, %v3530_v18 }
 0xe2c   :  { %v8094_v23 = vsel %vm2119_vm11, %v3435_v46, %v3436_v53  ;;  %v3441_v48 = vrot.slane %v7988_v13, 1  ;;  %v3442_v63 = vrot.slane %v7998_v40, 1  ;;  %v3444_v50 = vrot.slane %v8000_v22, 1 }
 0xe2d   :  { %5951 = vrot.lane.b32.xlu1 %v5950_v57, %s6287_s21  ;;  %v8097_v37 = vsel %vm2119_vm11, %v3438_v31, %v3439_v24  ;;  %v3445_v51 = vrot.slane %v8006_v49, 1  ;;  %v5975_v35 = vpack.i.bf16 %v8016_v42, %v8004_v41  ;;  %v3447_v49 = vrot.slane %v8011_v4, 1 }
 0xe2e   :  { %5941 = vrot.lane.b32.xlu0 %v5940_v10, %s6276_s1  ;;  %v5970_v38 = vpack.i.bf16 %v8097_v37, %v8094_v23  ;;  %v5965_v10 = vpack.i.bf16 %v8030_v9, %v8016_v42  ;;  %v8114_v57 = vsel %vm2119_vm11, %v3441_v48, %v3442_v63  ;;  %v3448_v41 = vrot.slane %v8020_v54, 1 }
 0xe2f   :  { %5496 = vmatmul.mubr.msk.bf16.gmra.mxu0 %vm965_vm10, %v3972_v16  ;;  %v8117_v60 = vsel %vm2119_vm11, %v3444_v50, %v3445_v51  ;;  %v3450_v46 = vrot.slane %v8013_v2, 1  ;;  %v3451_v42 = vrot.slane %v8022_v28, 1  ;;  %v5995_v18 = vpack.i.bf16 %v8039_v47, %v8030_v9 }
 0xe30   :  { %v5990_v40 = vpack.i.bf16 %v8117_v60, %v8114_v57  ;;  %v5985_v53 = vpack.i.bf16 %v8049_v62, %v8039_v47  ;;  %v8134_v31 = vsel %vm2119_vm11, %v3447_v49, %v3448_v41  ;;  %v3652_v28 = vrot.slane %v8034_v7, 1 }
 0xe31   :  { %5956 = vrot.lane.b32.xlu1 %v5955_v52, %s6276_s1  ;;  %v8137_v24 = vsel %vm2119_vm11, %v3450_v46, %v3451_v42  ;;  %v3653_v9 = vrot.slane %v8036_v11, 1  ;;  %v3780_v47 = vrot.slane %v7967_v15, 1  ;;  %v3781_v16 = vrot.slane %v7992_v34, 1 }
 0xe32   :  { %5946 = vrot.lane.b32.xlu0 %v5945_v43, %s6287_s21  ;;  %v6010_v54 = vpack.i.bf16 %v8137_v24, %v8134_v31  ;;  %v6015_v52 = vpack.i.bf16 %v8055_v3, %v8049_v62  ;;  %v6005_v43 = vpack.i.bf16 %v3676_v59, %v8055_v3  ;;  %v6025_v15 = vpack.i.bf16 %v8034_v7, %v8013_v2 }
 0xe33   :  { %v3782_v48 = vsel %vm2119_vm11, %v3780_v47, %v3781_v16 }
 0xe35   :  { %5971 = vrot.lane.b32.xlu1 %v5970_v38, %s6287_s21 }
 0xe36   :  { %5961 = vrot.lane.b32.xlu0 %v5970_v38, %s6288_s4  ;;  %v8154_v38 = vsel %vm2119_vm11, %v3652_v28, %v3653_v9 }
 0xe37   :  { %v6020_v34 = vpack.i.bf16 %v3782_v48, %v8154_v38 }
 0xe39   :  { %5976 = vrot.lane.b32.xlu1 %v5975_v35, %s6276_s1 }
 0xe3a   :  { %5966 = vrot.lane.b32.xlu0 %v5965_v10, %s6287_s21 }
 0xe3d   :  { %5991 = vrot.lane.b32.xlu1 %v5990_v40, %s6287_s21 }
 0xe3e   :  { %5981 = vrot.lane.b32.xlu0 %v5990_v40, %s6288_s4 }
 0xe41   :  { %5996 = vrot.lane.b32.xlu1 %v5995_v18, %s6276_s1 }
 0xe42   :  { %5986 = vrot.lane.b32.xlu0 %v5985_v53, %s6287_s21 }
 0xe45   :  { %6011 = vrot.lane.b32.xlu1 %v6010_v54, %s6287_s21 }
 0xe46   :  { %6001 = vrot.lane.b32.xlu0 %v6010_v54, %s6288_s4 }
 0xe49   :  { %6016 = vrot.lane.b32.xlu1 %v6015_v52, %s6276_s1 }
 0xe4a   :  { %6006 = vrot.lane.b32.xlu0 %v6005_v43, %s6287_s21 }
 0xe4d   :  { %6026 = vrot.lane.b32.xlu1 %v6025_v15, %s6288_s4 }
 0xe4e   :  { %6021 = vrot.lane.b32.xlu0 %v6020_v34, %s6288_s4 }
 0xe5c   :  { %v5797_v11 = vpop.permute.xlu1 %5796 }
 0xe5d   :  { %v5792_v62 = vpop.permute.xlu0 %5791  ;;  %v5799_v42 = vunpack.i.h.bf16 %v5797_v11  ;;  %v5798_v18 = vunpack.i.l.bf16 %v5797_v11 }
 0xe5e   :  { %v5794_v9 = vunpack.i.h.bf16 %v5792_v62  ;;  %v5793_v47 = vunpack.i.l.bf16 %v5792_v62 }
 0xe60   :  { %v8163_v3 = vpop.permute.xlu1 %5806 }
 0xe61   :  { %v5802_v59 = vpop.permute.xlu0 %5801 }
 0xe64   :  { %v8165_v63 = vpop.permute.xlu1 %5816 }
 0xe65   :  { %v8167_v50 = vpop.permute.xlu0 %5811 }
 0xe68   :  { %v8169_v51 = vpop.permute.xlu1 %5826 }
 0xe69   :  { %v8171_v35 = vpop.permute.xlu0 %5821 }
 0xe6c   :  { %v5837_v7 = vpop.permute.xlu1 %5836 }
 0xe6d   :  { %v5832_v10 = vpop.permute.xlu0 %5831  ;;  %v5839_v41 = vunpack.i.h.bf16 %v5837_v7  ;;  %v5838_v46 = vunpack.i.l.bf16 %v5837_v7 }
 0xe6e   :  { %v5834_v40 = vunpack.i.h.bf16 %v5832_v10  ;;  %v5833_v49 = vunpack.i.l.bf16 %v5832_v10 }
 0xe6f   :  { %v3854_v48 = vsel %vm965_vm10, %v7725_v58, %v5839_v41  ;;  %v3853_v15 = vsel %vm965_vm10, %v7776_v0, %v5838_v46 }
 0xe70   :  { %v3902_v53 = vsel %vm965_vm10, %v7854_v25, %v5834_v40  ;;  %v3901_v54 = vsel %vm965_vm10, %v7838_v12, %v5833_v49  ;;  %v5842_v28 = vpop.permute.xlu1 %5841 }
 0xe71   :  { %v5847_v16 = vpop.permute.xlu0 %5846  ;;  %v5844_v52 = vunpack.i.h.bf16 %v5842_v28  ;;  %v5843_v43 = vunpack.i.l.bf16 %v5842_v28  ;;  %v3917_v12 = vsel %vm197_vm2, %v3901_v54, %v5793_v47  ;;  %v3918_v10 = vsel %vm197_vm2, %v3902_v53, %v5794_v9 }
 0xe72   :  { %v5849_v34 = vunpack.i.h.bf16 %v5847_v16  ;;  %v5848_v11 = vunpack.i.l.bf16 %v5847_v16  ;;  %v5809_v54 = vunpack.i.h.bf16 %v8163_v3  ;;  %v5808_v53 = vunpack.i.l.bf16 %v8163_v3 }
 0xe73   :  { %v3869_v7 = vsel %vm197_vm2, %v3853_v15, %v5843_v43  ;;  %v3870_v25 = vsel %vm197_vm2, %v3854_v48, %v5844_v52  ;;  %v5804_v47 = vunpack.i.h.bf16 %v5802_v59  ;;  %v5803_v48 = vunpack.i.l.bf16 %v5802_v59 }
 0xe74   :  { %v3885_v62 = vsel %vm1372_vm3, %v3869_v7, %v5798_v18  ;;  %v3886_v40 = vsel %vm1372_vm3, %v3870_v25, %v5799_v42  ;;  %v5857_v49 = vpop.permute.xlu1 %5856  ;;  %v3933_v58 = vsel %vm1372_vm3, %v3917_v12, %v5848_v11  ;;  %v3934_v41 = vsel %vm1372_vm3, %v3918_v10, %v5849_v34 }
 0xe75   :  { %v3949_v0 = vpack.c.bf16 %v3886_v40, %v3885_v62  ;;  %v5852_v46 = vpop.permute.xlu0 %5851  ;;  %v3950_v28 = vpack.c.bf16 %v3934_v41, %v3933_v58  ;;  %v5859_v15 = vunpack.i.h.bf16 %v5857_v49  ;;  %v5858_v52 = vunpack.i.l.bf16 %v5857_v49 }
 0xe76   :  { %v5854_v16 = vunpack.i.h.bf16 %v5852_v46  ;;  %v5853_v43 = vunpack.i.l.bf16 %v5852_v46 }
 0xe77   :  { %4143 = vmatprep.mubr.bf16.mxu1 %v3950_v28  ;;  %v3856_v25 = vsel %vm965_vm10, %v7729_v19, %v5859_v15  ;;  %v3855_v12 = vsel %vm965_vm10, %v7723_v56, %v5858_v52  ;;  %v5819_v52 = vunpack.i.h.bf16 %v8165_v63 }
 0xe78   :  { %v3904_v42 = vsel %vm965_vm10, %v7873_v44, %v5854_v16  ;;  %v3903_v18 = vsel %vm965_vm10, %v7857_v8, %v5853_v43  ;;  %4144 = vmatmul.mubr.bf16.vlgmr.msra.gmra.mxu1 %v3949_v0  ;;  %v5862_v9 = vpop.permute.xlu1 %5861 }
 0xe79   :  { %v5867_v34 = vpop.permute.xlu0 %5866  ;;  %v5864_v11 = vunpack.i.h.bf16 %v5862_v9  ;;  %v5863_v7 = vunpack.i.l.bf16 %v5862_v9  ;;  %v3919_v8 = vsel %vm197_vm2, %v3903_v18, %v5803_v48  ;;  %v3920_v40 = vsel %vm197_vm2, %v3904_v42, %v5804_v47 }
 0xe7a   :  { %v5869_v3 = vunpack.i.h.bf16 %v5867_v34  ;;  %v5868_v10 = vunpack.i.l.bf16 %v5867_v34  ;;  %v5818_v42 = vunpack.i.l.bf16 %v8165_v63  ;;  %v5814_v9 = vunpack.i.h.bf16 %v8167_v50 }
 0xe7b   :  { %v3871_v44 = vsel %vm197_vm2, %v3855_v12, %v5863_v7  ;;  %v3872_v62 = vsel %vm197_vm2, %v3856_v25, %v5864_v11  ;;  %v5813_v47 = vunpack.i.l.bf16 %v8167_v50 }
 0xe7c   :  { %v5877_v59 = vpop.permute.xlu1 %5876  ;;  %v3935_v49 = vsel %vm1372_vm3, %v3919_v8, %v5868_v10  ;;  %v3936_v58 = vsel %vm1372_vm3, %v3920_v40, %v5869_v3  ;;  %v3887_v19 = vsel %vm1372_vm3, %v3871_v44, %v5808_v53  ;;  %v3888_v41 = vsel %vm1372_vm3, %v3872_v62, %v5809_v54 }
 0xe7d   :  { %v5872_v56 = vpop.permute.xlu0 %5871  ;;  %v3953_v0 = vpack.c.bf16 %v3936_v58, %v3935_v49  ;;  %v3952_v46 = vpack.c.bf16 %v3888_v41, %v3887_v19  ;;  %v5879_v43 = vunpack.i.h.bf16 %v5877_v59  ;;  %v5878_v15 = vunpack.i.l.bf16 %v5877_v59 }
 0xe7e   :  { %v5874_v28 = vunpack.i.h.bf16 %v5872_v56  ;;  %v5873_v16 = vunpack.i.l.bf16 %v5872_v56  ;;  %v5829_v56 = vunpack.i.h.bf16 %v8169_v51 }
 0xe7f   :  { %4151 = vmatprep.mubr.bf16.mxu1 %v3953_v0  ;;  %v3858_v7 = vsel %vm965_vm10, %v7743_v14, %v5879_v43  ;;  %v3857_v63 = vsel %vm965_vm10, %v7737_v27, %v5878_v15  ;;  %v5828_v0 = vunpack.i.l.bf16 %v8169_v51  ;;  %v5824_v43 = vunpack.i.h.bf16 %v8171_v35 }
 0xe80   :  { %v3906_v18 = vsel %vm965_vm10, %v7894_v1, %v5874_v28  ;;  %v3905_v53 = vsel %vm965_vm10, %v7876_v6, %v5873_v16  ;;  %4152 = vmatmul.mubr.bf16.gmra.mxu1 %v3952_v46  ;;  %v5882_v54 = vpop.permute.xlu1 %5881  ;;  %v5823_v15 = vunpack.i.l.bf16 %v8171_v35 }
 0xe81   :  { %v5887_v48 = vpop.permute.xlu0 %5886  ;;  %v5884_v34 = vunpack.i.h.bf16 %v5882_v54  ;;  %v5883_v11 = vunpack.i.l.bf16 %v5882_v54  ;;  %v3921_v3 = vsel %vm197_vm2, %v3905_v53, %v5813_v47  ;;  %v3922_v10 = vsel %vm197_vm2, %v3906_v18, %v5814_v9 }
 0xe82   :  { %v5889_v25 = vunpack.i.h.bf16 %v5887_v48  ;;  %v5888_v1 = vunpack.i.l.bf16 %v5887_v48 }
 0xe83   :  { %v3873_v12 = vsel %vm197_vm2, %v3857_v63, %v5883_v11  ;;  %v3874_v6 = vsel %vm197_vm2, %v3858_v7, %v5884_v34 }
 0xe84   :  { %v5897_v50 = vpop.permute.xlu1 %5896  ;;  %v3937_v44 = vsel %vm1372_vm3, %v3921_v3, %v5888_v1  ;;  %v3938_v62 = vsel %vm1372_vm3, %v3922_v10, %v5889_v25  ;;  %v3889_v14 = vsel %vm1372_vm3, %v3873_v12, %v5818_v42  ;;  %v3890_v8 = vsel %vm1372_vm3, %v3874_v6, %v5819_v52 }
 0xe85   :  { %v5892_v27 = vpop.permute.xlu0 %5891  ;;  %v3956_v40 = vpack.c.bf16 %v3938_v62, %v3937_v44  ;;  %v3955_v59 = vpack.c.bf16 %v3890_v8, %v3889_v14  ;;  %v5899_v19 = vunpack.i.h.bf16 %v5897_v50  ;;  %v5898_v41 = vunpack.i.l.bf16 %v5897_v50 }
 0xe86   :  { %v5894_v49 = vunpack.i.h.bf16 %v5892_v27  ;;  %v5893_v58 = vunpack.i.l.bf16 %v5892_v27 }
 0xe87   :  { %4159 = vmatprep.mubr.bf16.mxu1 %v3956_v40  ;;  %v3860_v53 = vsel %vm965_vm10, %v7772_v61, %v5899_v19  ;;  %v3859_v51 = vsel %vm965_vm10, %v7747_v17, %v5898_v41 }
 0xe88   :  { %v3908_v46 = vsel %vm965_vm10, %v7912_v45, %v5894_v49  ;;  %v3907_v28 = vsel %vm965_vm10, %v7897_v55, %v5893_v58  ;;  %4160 = vmatmul.mubr.bf16.gmra.mxu1 %v3955_v59 }
 0xe89   :  { %v5902_v16 = vpop.permute.xlu1 %5901  ;;  %v5907_v52 = vpop.permute.xlu0 %5906  ;;  %v3923_v47 = vsel %vm197_vm2, %v3907_v28, %v5823_v15  ;;  %v3924_v48 = vsel %vm197_vm2, %v3908_v46, %v5824_v43 }
 0xe8a   :  { %v5904_v42 = vunpack.i.h.bf16 %v5902_v16  ;;  %v5903_v18 = vunpack.i.l.bf16 %v5902_v16  ;;  %v5909_v54 = vunpack.i.h.bf16 %v5907_v52  ;;  %v5908_v45 = vunpack.i.l.bf16 %v5907_v52 }
 0xe8c   :  { %v3875_v9 = vsel %vm197_vm2, %v3859_v51, %v5903_v18  ;;  %v3876_v55 = vsel %vm197_vm2, %v3860_v53, %v5904_v42  ;;  %v3939_v35 = vsel %vm1372_vm3, %v3923_v47, %v5908_v45  ;;  %v3940_v34 = vsel %vm1372_vm3, %v3924_v48, %v5909_v54 }
 0xe8d   :  { %v3891_v11 = vsel %vm1372_vm3, %v3875_v9, %v5828_v0  ;;  %v3892_v61 = vsel %vm1372_vm3, %v3876_v55, %v5829_v56  ;;  %v3959_v7 = vpack.c.bf16 %v3940_v34, %v3939_v35 }
 0xe8e   :  { %v3958_v17 = vpack.c.bf16 %v3892_v61, %v3891_v11 }
 0xe8f   :  { %4167 = vmatprep.mubr.bf16.mxu1 %v3959_v7 }
 0xe90   :  { %4168 = vmatmul.mubr.bf16.gmra.mxu1 %v3958_v17 }
 0xe93   :  { %v5917_v63 = vpop.permute.xlu1 %5916 }
 0xe94   :  { %v5912_v25 = vpop.permute.xlu0 %5911  ;;  %v5919_v41 = vunpack.i.h.bf16 %v5917_v63  ;;  %v5918_v56 = vunpack.i.l.bf16 %v5917_v63 }
 0xe95   :  { %v5914_v15 = vunpack.i.h.bf16 %v5912_v25 }
 0xe97   :  { %v5927_v1 = vpop.permute.xlu1 %5926 }
 0xe98   :  { %v8247_v12 = vpop.permute.xlu0 %5921 }
 0xe9b   :  { %v8249_v6 = vpop.permute.xlu1 %5936 }
 0xe9c   :  { %v8251_v3 = vpop.permute.xlu0 %5931 }
 0xe9f   :  { %v5952_v10 = vpop.permute.xlu1 %5951 }
 0xea0   :  { %v8253_v50 = vpop.permute.xlu0 %5941  ;;  %v5954_v44 = vunpack.i.h.bf16 %v5952_v10  ;;  %v5953_v62 = vunpack.i.l.bf16 %v5952_v10  ;;  %v5928_v10 = vunpack.i.l.bf16 %v5927_v1 }
 0xea2   :  { %v3862_v59 = vsel %vm965_vm10, %v7978_v36, %v5954_v44  ;;  %v3861_v49 = vsel %vm965_vm10, %v7969_v21, %v5953_v62  ;;  %v5913_v36 = vunpack.i.l.bf16 %v5912_v25  ;;  %v5929_v25 = vunpack.i.h.bf16 %v5927_v1 }
 0xea3   :  { %v5957_v14 = vpop.permute.xlu1 %5956 }
 0xea4   :  { %v5947_v8 = vpop.permute.xlu0 %5946  ;;  %v5959_v27 = vunpack.i.h.bf16 %v5957_v14  ;;  %v5958_v40 = vunpack.i.l.bf16 %v5957_v14 }
 0xea5   :  { %v5949_v58 = vunpack.i.h.bf16 %v5947_v8  ;;  %v5948_v19 = vunpack.i.l.bf16 %v5947_v8 }
 0xea6   :  { %v3877_v0 = vsel %vm197_vm2, %v3861_v49, %v5958_v40  ;;  %v3878_v46 = vsel %vm197_vm2, %v3862_v59, %v5959_v27  ;;  %v5924_v27 = vunpack.i.h.bf16 %v8247_v12 }
 0xea7   :  { %v3910_v28 = vsel %vm965_vm10, %v8094_v23, %v5949_v58  ;;  %v3909_v16 = vsel %vm965_vm10, %v8070_v26, %v5948_v19  ;;  %v5972_v43 = vpop.permute.xlu1 %5971  ;;  %v3893_v21 = vsel %vm1372_vm3, %v3877_v0, %v5918_v56  ;;  %v3894_v42 = vsel %vm1372_vm3, %v3878_v46, %v5919_v41 }
 0xea8   :  { %v5962_v52 = vpop.permute.xlu0 %5961  ;;  %v5974_v51 = vunpack.i.h.bf16 %v5972_v43  ;;  %v5973_v54 = vunpack.i.l.bf16 %v5972_v43  ;;  %v3925_v45 = vsel %vm197_vm2, %v3909_v16, %v5913_v36  ;;  %v3926_v9 = vsel %vm197_vm2, %v3910_v28, %v5914_v15 }
 0xea9   :  { %v5964_v18 = vunpack.i.h.bf16 %v5962_v52  ;;  %v5963_v53 = vunpack.i.l.bf16 %v5962_v52  ;;  %v3961_v11 = vpack.c.bf16 %v3894_v42, %v3893_v21 }
 0xeaa   :  { %v3864_v61 = vsel %vm965_vm10, %v7982_v20, %v5974_v51  ;;  %v3863_v7 = vsel %vm965_vm10, %v7974_v32, %v5973_v54  ;;  %v5923_v32 = vunpack.i.l.bf16 %v8247_v12  ;;  %v5939_v51 = vunpack.i.h.bf16 %v8249_v6 }
 0xeab   :  { %v5977_v23 = vpop.permute.xlu1 %5976  ;;  %v3941_v55 = vsel %vm1372_vm3, %v3925_v45, %v5963_v53  ;;  %v3942_v26 = vsel %vm1372_vm3, %v3926_v9, %v5964_v18  ;;  %v5938_v54 = vunpack.i.l.bf16 %v8249_v6 }
 0xeac   :  { %v5967_v47 = vpop.permute.xlu0 %5966  ;;  %v5979_v48 = vunpack.i.h.bf16 %v5977_v23  ;;  %v5978_v35 = vunpack.i.l.bf16 %v5977_v23  ;;  %v3962_v34 = vpack.c.bf16 %v3942_v26, %v3941_v55  ;;  %v5933_v23 = vunpack.i.l.bf16 %v8251_v3 }
 0xead   :  { %v5969_v17 = vunpack.i.h.bf16 %v5967_v47  ;;  %v5968_v63 = vunpack.i.l.bf16 %v5967_v47 }
 0xeae   :  { %v3879_v44 = vsel %vm197_vm2, %v3863_v7, %v5978_v35  ;;  %v3880_v62 = vsel %vm197_vm2, %v3864_v61, %v5979_v48  ;;  %4175 = vmatprep.mubr.bf16.mxu1 %v3962_v34 }
 0xeaf   :  { %v3912_v14 = vsel %vm965_vm10, %v8114_v57, %v5969_v17  ;;  %v3911_v8 = vsel %vm965_vm10, %v8097_v37, %v5968_v63  ;;  %4176 = vmatmul.mubr.bf16.gmra.mxu1 %v3961_v11  ;;  %v5992_v20 = vpop.permute.xlu1 %5991  ;;  %v3895_v1 = vsel %vm1372_vm3, %v3879_v44, %v5928_v10  ;;  %v3896_v59 = vsel %vm1372_vm3, %v3880_v62, %v5929_v25 }
 0xeb0   :  { %v5982_v40 = vpop.permute.xlu0 %5981  ;;  %v5994_v19 = vunpack.i.h.bf16 %v5992_v20  ;;  %v5993_v41 = vunpack.i.l.bf16 %v5992_v20  ;;  %v3927_v57 = vsel %vm197_vm2, %v3911_v8, %v5923_v32  ;;  %v3928_v56 = vsel %vm197_vm2, %v3912_v14, %v5924_v27 }
 0xeb1   :  { %v5984_v49 = vunpack.i.h.bf16 %v5982_v40  ;;  %v5983_v58 = vunpack.i.l.bf16 %v5982_v40  ;;  %v3964_v15 = vpack.c.bf16 %v3896_v59, %v3895_v1  ;;  %v5944_v14 = vunpack.i.h.bf16 %v8253_v50 }
 0xeb2   :  { %v3866_v36 = vsel %vm965_vm10, %v8000_v22, %v5994_v19  ;;  %v3865_v52 = vsel %vm965_vm10, %v7988_v13, %v5993_v41  ;;  %v5934_v13 = vunpack.i.h.bf16 %v8251_v3  ;;  %v5943_v8 = vunpack.i.l.bf16 %v8253_v50 }
 0xeb3   :  { %v5997_v37 = vpop.permute.xlu1 %5996  ;;  %v3943_v0 = vsel %vm1372_vm3, %v3927_v57, %v5983_v58  ;;  %v3944_v46 = vsel %vm1372_vm3, %v3928_v56, %v5984_v49 }
 0xeb4   :  { %v5987_v28 = vpop.permute.xlu0 %5986  ;;  %v5999_v12 = vunpack.i.h.bf16 %v5997_v37  ;;  %v5998_v16 = vunpack.i.l.bf16 %v5997_v37  ;;  %v3965_v43 = vpack.c.bf16 %v3944_v46, %v3943_v0 }
 0xeb5   :  { %v5989_v21 = vunpack.i.h.bf16 %v5987_v28  ;;  %v5988_v42 = vunpack.i.l.bf16 %v5987_v28 }
 0xeb6   :  { %v3881_v18 = vsel %vm197_vm2, %v3865_v52, %v5998_v16  ;;  %v3882_v53 = vsel %vm197_vm2, %v3866_v36, %v5999_v12  ;;  %4183 = vmatprep.mubr.bf16.mxu1 %v3965_v43 }
 0xeb7   :  { %v3914_v45 = vsel %vm965_vm10, %v8134_v31, %v5989_v21  ;;  %v3913_v22 = vsel %vm965_vm10, %v8117_v60, %v5988_v42  ;;  %4184 = vmatmul.mubr.bf16.gmra.mxu1 %v3964_v15  ;;  %v6012_v9 = vpop.permute.xlu1 %6011  ;;  %v3897_v48 = vsel %vm1372_vm3, %v3881_v18, %v5938_v54  ;;  %v3898_v35 = vsel %vm1372_vm3, %v3882_v53, %v5939_v51  ;;  %v5485_v42 = vpop.f32.mrf.mxu0 }
 0xeb8   :  { %v6002_v55 = vpop.permute.xlu0 %6001  ;;  %v3929_v6 = vsel %vm197_vm2, %v3913_v22, %v5933_v23  ;;  %v3930_v31 = vsel %vm197_vm2, %v3914_v45, %v5934_v13  ;;  %v6014_v61 = vunpack.i.h.bf16 %v6012_v9  ;;  %v6013_v7 = vunpack.i.l.bf16 %v6012_v9 }
 0xeb9   :  { %v6004_v26 = vunpack.i.h.bf16 %v6002_v55  ;;  %v6003_v47 = vunpack.i.l.bf16 %v6002_v55  ;;  %v3967_v63 = vpack.c.bf16 %v3898_v35, %v3897_v48  ;;  %v4242_v51 = vpop.f32.mrf.mxu0  ;;  %v8332_v35 = vld [vmem:[%s8676_s11] ss:$0 sm:$0xff] }
 0xeba   :  { %v3868_v40 = vsel %vm965_vm10, %v8013_v2, %v6014_v61  ;;  %v3867_v1 = vsel %vm965_vm10, %v8011_v4, %v6013_v7 }
 0xebb   :  { %v6017_v34 = vpop.permute.xlu1 %6016  ;;  %v3945_v60 = vsel %vm1372_vm3, %v3929_v6, %v6003_v47  ;;  %v3946_v11 = vsel %vm1372_vm3, %v3930_v31, %v6004_v26  ;;  %v5486_v22 = vpop.f32.mrf.mxu0 }
 0xebc   :  { %v6007_v17 = vpop.permute.xlu0 %6006  ;;  %v3968_v3 = vpack.c.bf16 %v3946_v11, %v3945_v60  ;;  %v6019_v44 = vunpack.i.h.bf16 %v6017_v34  ;;  %v6018_v62 = vunpack.i.l.bf16 %v6017_v34 }
 0xebd   :  { %v6009_v25 = vunpack.i.h.bf16 %v6007_v17  ;;  %v6008_v10 = vunpack.i.l.bf16 %v6007_v17  ;;  %v4245_v23 = vpop.f32.mrf.mxu0 }
 0xebe   :  { %4191 = vmatprep.mubr.bf16.mxu1 %v3968_v3  ;;  %v3883_v19 = vsel %vm197_vm2, %v3867_v1, %v6018_v62  ;;  %v3884_v50 = vsel %vm197_vm2, %v3868_v40, %v6019_v44 }
 0xebf   :  { %v3916_v20 = vsel %vm965_vm10, %v8154_v38, %v6009_v25  ;;  %v3915_v27 = vsel %vm965_vm10, %v8137_v24, %v6008_v10  ;;  %4192 = vmatmul.mubr.bf16.gmra.mxu1 %v3967_v63  ;;  %v6027_v32 = vpop.permute.xlu1 %6026  ;;  %v5489_v48 = vpop.f32.mrf.mxu0 }
 0xec0   :  { %v6022_v59 = vpop.permute.xlu0 %6021  ;;  %v6029_v49 = vunpack.i.h.bf16 %v6027_v32  ;;  %v6028_v58 = vunpack.i.l.bf16 %v6027_v32  ;;  %v3931_v57 = vsel %vm197_vm2, %v3915_v27, %v5943_v8  ;;  %v3932_v24 = vsel %vm197_vm2, %v3916_v20, %v5944_v14 }
 0xec1   :  { %v6024_v41 = vunpack.i.h.bf16 %v6022_v59  ;;  %v6023_v38 = vunpack.i.l.bf16 %v6022_v59  ;;  %v4258_v7 = vpop.f32.mrf.mxu0 }
 0xec2   :  { %v3899_v56 = vsel %vm1372_vm3, %v3883_v19, %v6028_v58  ;;  %v3900_v2 = vsel %vm1372_vm3, %v3884_v50, %v6029_v49 }
 0xec3   :  { %v3947_v37 = vsel %vm1372_vm3, %v3931_v57, %v6023_v38  ;;  %v3948_v4 = vsel %vm1372_vm3, %v3932_v24, %v6024_v41  ;;  %v3970_v0 = vpack.c.bf16 %v3900_v2, %v3899_v56  ;;  %v5490_v8 = vpop.f32.mrf.mxu0 }
 0xec4   :  { %v3971_v46 = vpack.c.bf16 %v3948_v4, %v3947_v37 }
 0xec5   :  { %v4261_v19 = vpop.f32.mrf.mxu0 }
 0xec6   :  { %4199 = vmatprep.mubr.bf16.mxu1 %v3971_v46 }
 0xec7   :  { %4200 = vmatmul.mubr.bf16.gmra.mxu1 %v3970_v0 }
 0xec8   :  { %5531 = vmatprep.mubr.msk.f32.mxu1 %vm6285_vm1, %v8729_v30 }
 0xf38   :  { %v5248_v28 = vpop.f32.mrf.mxu1 }
 0xf3a   :  { %v5249_v12 = vpop.f32.mrf.mxu1 }
 0xf3b   :  { %v5250_v16 = vadd.f32 %v5249_v12, %v5248_v28 }
 0xf3c   :  { %v5251_v43 = vpop.f32.mrf.mxu1 }
 0xf3d   :  { %v4146_v60 = vadd.f32 %v5250_v16, %v8332_v35 }
 0xf3e   :  { %v5252_v15 = vpop.f32.mrf.mxu1 }
 0xf3f   :  { %v5253_v55 = vadd.f32 %v5252_v15, %v5251_v43  ;;  %v8340_v10 = vadd.f32 %v4242_v51, %v4146_v60  ;;  %v5493_v43 = vpop.f32.mrf.mxu0 }
 0xf40   :  { %v5254_v36 = vpop.f32.mrf.mxu1 }
 0xf41   :  { %v4149_v6 = vadd.f32 %v5253_v55, %v8332_v35  ;;  %v4305_v1 = vsel %vm965_vm10, %v8340_v10, 0.0 }
 0xf42   :  { %v5255_v52 = vpop.f32.mrf.mxu1 }
 0xf43   :  { %v5256_v47 = vadd.f32 %v5255_v52, %v5254_v36  ;;  %v8337_v17 = vadd.f32 %v4245_v23, %v4149_v6 }
 0xf44   :  { %v5257_v21 = vpop.f32.mrf.mxu1 }
 0xf45   :  { %v4154_v11 = vadd.f32 %v5256_v47, %v8332_v35  ;;  %v4306_v20 = vsel %vm965_vm10, %v8337_v17, 0.0 }
 0xf46   :  { %v5258_v18 = vpop.f32.mrf.mxu1  ;;  %v4307_v50 = vadd.f32 %v4306_v20, %v4305_v1 }
 0xf47   :  { %v5259_v31 = vadd.f32 %v5258_v18, %v5257_v21  ;;  %v8342_v44 = vadd.f32 %v5485_v42, %v4154_v11  ;;  %v4274_v21 = vpop.f32.mrf.mxu0 }
 0xf48   :  { %v5260_v53 = vpop.f32.mrf.mxu1 }
 0xf49   :  { %v4157_v3 = vadd.f32 %v5259_v31, %v8332_v35  ;;  %v4308_v59 = vsel %vm965_vm10, %v8342_v44, 0.0  ;;  %v5494_v51 = vpop.f32.mrf.mxu0 }
 0xf4a   :  { %v5261_v54 = vpop.f32.mrf.mxu1  ;;  %v4309_v24 = vadd.f32 %v4308_v59, %v4307_v50 }
 0xf4b   :  { %v5262_v61 = vadd.f32 %v5261_v54, %v5260_v53  ;;  %v8347_v27 = vadd.f32 %v5486_v22, %v4157_v3 }
 0xf4c   :  { %v5263_v45 = vpop.f32.mrf.mxu1 }
 0xf4d   :  { %v4162_v62 = vadd.f32 %v5262_v61, %v8332_v35  ;;  %v4310_v41 = vsel %vm965_vm10, %v8347_v27, 0.0 }
 0xf4e   :  { %v5264_v9 = vpop.f32.mrf.mxu1  ;;  %v4311_v37 = vadd.f32 %v4310_v41, %v4309_v24 }
 0xf4f   :  { %v5265_v63 = vadd.f32 %v5264_v9, %v5263_v45  ;;  %v8354_v49 = vadd.f32 %v4258_v7, %v4162_v62  ;;  %v4277_v9 = vpop.f32.mrf.mxu0 }
 0xf50   :  { %v5266_v13 = vpop.f32.mrf.mxu1 }
 0xf51   :  { %v4165_v32 = vadd.f32 %v5265_v63, %v8332_v35  ;;  %v4312_v56 = vsel %vm965_vm10, %v8354_v49, 0.0  ;;  %v5497_v6 = vpop.f32.mrf.mxu0 }
 0xf52   :  { %v5267_v26 = vpop.f32.mrf.mxu1  ;;  %v4313_v46 = vadd.f32 %v4312_v56, %v4311_v37 }
 0xf53   :  { %v5268_v14 = vadd.f32 %v5267_v26, %v5266_v13  ;;  %v8359_v38 = vadd.f32 %v4261_v19, %v4165_v32  ;;  %v4290_v63 = vpop.f32.mrf.mxu0 }
 0xf54   :  { %v5269_v34 = vpop.f32.mrf.mxu1 }
 0xf55   :  { %v4170_v58 = vadd.f32 %v5268_v14, %v8332_v35  ;;  %v4314_v4 = vsel %vm965_vm10, %v8359_v38, 0.0 }
 0xf56   :  { %v5270_v25 = vpop.f32.mrf.mxu1  ;;  %v4315_v12 = vadd.f32 %v4314_v4, %v4313_v46 }
 0xf57   :  { %v5271_v40 = vadd.f32 %v5270_v25, %v5269_v34  ;;  %v8364_v2 = vadd.f32 %v5489_v48, %v4170_v58  ;;  %v5498_v58 = vpop.f32.mrf.mxu0 }
 0xf59   :  { %v4173_v57 = vadd.f32 %v5271_v40, %v8332_v35  ;;  %v4316_v28 = vsel %vm965_vm10, %v8364_v2, 0.0 }
 0xf5a   :  { %v4317_v15 = vadd.f32 %v4316_v28, %v4315_v12  ;;  %v4293_v12 = vpop.f32.mrf.mxu0 }
 0xf5b   :  { %v8368_v0 = vadd.f32 %v5490_v8, %v4173_v57 }
 0xf5d   :  { %v4318_v16 = vsel %vm965_vm10, %v8368_v0, 0.0 }
 0xf5e   :  { %v4319_v36 = vadd.f32 %v4318_v16, %v4317_v15 }
 0xf60   :  { %v4320_v18 = vrot.slane %v4319_v36, 4 }
 0xf62   :  { %v4321_v45 = vadd.f32 %v4320_v18, %v4319_v36 }
 0xf64   :  { %v4322_v55 = vrot.slane %v4321_v45, 2 }
 0xf66   :  { %v4323_v11 = vadd.f32 %v4322_v55, %v4321_v45 }
 0xf68   :  { %v4324_v20 = vrot.slane %v4323_v11, 1 }
 0xf6a   :  { %v4325_v24 = vadd.f32 %v4324_v20, %v4323_v11 }
 0xf6f   :  { %v5272_v52 = vpop.f32.mrf.mxu1 }
 0xf71   :  { %v5273_v42 = vpop.f32.mrf.mxu1 }
 0xf72   :  { %v5274_v47 = vadd.f32 %v5273_v42, %v5272_v52 }
 0xf73   :  { %v5275_v53 = vpop.f32.mrf.mxu1 }
 0xf74   :  { %v4178_v7 = vadd.f32 %v5274_v47, %v8332_v35 }
 0xf75   :  { %v5276_v54 = vpop.f32.mrf.mxu1 }
 0xf76   :  { %v5277_v23 = vadd.f32 %v5276_v54, %v5275_v53  ;;  %v8380_v40 = vadd.f32 %v4274_v21, %v4178_v7  ;;  %v4347_v21 = vmul.f32 0.015625, %v4325_v24 }
 0xf77   :  { %v5278_v22 = vpop.f32.mrf.mxu1 }
 0xf78   :  { %v4181_v34 = vadd.f32 %v5277_v23, %v8332_v35  ;;  %v4326_v37 = vsel %vm965_vm10, %v8380_v40, 0.0  ;;  %v8400_v55 = vsub.f32 %v8340_v10, %v4347_v21  ;;  %v8413_v7 = vsub.f32 %v8342_v44, %v4347_v21 }
 0xf79   :  { %v5279_v13 = vpop.f32.mrf.mxu1 }
 0xf7a   :  { %v5280_v48 = vadd.f32 %v5279_v13, %v5278_v22  ;;  %v8377_v62 = vadd.f32 %v4277_v9, %v4181_v34  ;;  %v4365_v11 = vmul.f32 %v8400_v55, %v8400_v55 }
 0xf7b   :  { %v5281_v26 = vpop.f32.mrf.mxu1 }
 0xf7c   :  { %v4186_v3 = vadd.f32 %v5280_v48, %v8332_v35  ;;  %v4327_v50 = vsel %vm965_vm10, %v8377_v62, 0.0 }
 0xf7d   :  { %v5282_v31 = vpop.f32.mrf.mxu1  ;;  %v4328_v16 = vadd.f32 %v4327_v50, %v4326_v37 }
 0xf7e   :  { %v5283_v60 = vadd.f32 %v5282_v31, %v5281_v26  ;;  %v8382_v1 = vadd.f32 %v5493_v43, %v4186_v3  ;;  %v8403_v26 = vsub.f32 %v8337_v17, %v4347_v21  ;;  %v4381_v3 = vsel %vm965_vm10, %v4365_v11, 0.0 }
 0xf7f   :  { %v5284_v61 = vpop.f32.mrf.mxu1 }
 0xf80   :  { %v4189_v14 = vadd.f32 %v5283_v60, %v8332_v35  ;;  %v4329_v4 = vsel %vm965_vm10, %v8382_v1, 0.0 }
 0xf81   :  { %v5285_v25 = vpop.f32.mrf.mxu1  ;;  %v4330_v42 = vadd.f32 %v4329_v4, %v4328_v16  ;;  %v8435_v4 = vsub.f32 %v8364_v2, %v4347_v21 }
 0xf82   :  { %v5286_v8 = vadd.f32 %v5285_v25, %v5284_v61  ;;  %v8387_v41 = vadd.f32 %v5494_v51, %v4189_v14  ;;  %v8418_v25 = vsub.f32 %v8347_v27, %v4347_v21  ;;  %v4367_v14 = vmul.f32 %v8413_v7, %v8413_v7 }
 0xf83   :  { %v5287_v32 = vpop.f32.mrf.mxu1 }
 0xf84   :  { %v4194_v59 = vadd.f32 %v5286_v8, %v8332_v35  ;;  %v4331_v15 = vsel %vm965_vm10, %v8387_v41, 0.0  ;;  %v4368_v44 = vmul.f32 %v8418_v25, %v8418_v25 }
 0xf85   :  { %v5288_v19 = vpop.f32.mrf.mxu1  ;;  %v4332_v54 = vadd.f32 %v4331_v15, %v4330_v42 }
 0xf86   :  { %v5289_v57 = vadd.f32 %v5288_v19, %v5287_v32  ;;  %v4291_v46 = vadd.f32 %v4290_v63, %v4194_v59  ;;  %v8423_v32 = vsub.f32 %v8354_v49, %v4347_v21 }
 0xf87   :  { %v5290_v56 = vpop.f32.mrf.mxu1 }
 0xf88   :  { %v4197_v28 = vadd.f32 %v5289_v57, %v8332_v35  ;;  %v4333_v53 = vsel %vm965_vm10, %v4291_v46, 0.0  ;;  %v8429_v57 = vsub.f32 %v8359_v38, %v4347_v21  ;;  %v4369_v27 = vmul.f32 %v8423_v32, %v8423_v32 }
 0xf89   :  { %v5291_v43 = vpop.f32.mrf.mxu1  ;;  %v4334_v23 = vadd.f32 %v4333_v53, %v4332_v54 }
 0xf8a   :  { %v4294_v36 = vadd.f32 %v4293_v12, %v4197_v28  ;;  %v5292_v52 = vadd.f32 %v5291_v43, %v5290_v56  ;;  %v4386_v56 = vsel %vm965_vm10, %v4368_v44, 0.0  ;;  %v4370_v28 = vmul.f32 %v8429_v57, %v8429_v57 }
 0xf8b   :  { %v5293_v18 = vpop.f32.mrf.mxu1  ;;  %v4388_v12 = vsel %vm965_vm10, %v4369_v27, 0.0 }
 0xf8c   :  { %v4202_v51 = vadd.f32 %v5292_v52, %v8332_v35  ;;  %v4335_v22 = vsel %vm965_vm10, %v4294_v36, 0.0 }
 0xf8d   :  { %v5294_v45 = vpop.f32.mrf.mxu1  ;;  %v4336_v31 = vadd.f32 %v4335_v22, %v4334_v23 }
 0xf8e   :  { %v4299_v9 = vadd.f32 %v5497_v6, %v4202_v51  ;;  %v5295_v13 = vadd.f32 %v5294_v45, %v5293_v18  ;;  %v4366_v6 = vmul.f32 %v8403_v26, %v8403_v26 }
 0xf90   :  { %v4337_v47 = vsel %vm965_vm10, %v4299_v9, 0.0  ;;  %v4205_v48 = vadd.f32 %v5295_v13, %v8332_v35  ;;  %v4382_v35 = vsel %vm965_vm10, %v4366_v6, 0.0 }
 0xf91   :  { %v4338_v60 = vadd.f32 %v4337_v47, %v4336_v31  ;;  %v4383_v8 = vadd.f32 %v4382_v35, %v4381_v3 }
 0xf92   :  { %v4302_v34 = vadd.f32 %v5498_v58, %v4205_v48  ;;  %v4384_v58 = vsel %vm965_vm10, %v4367_v14, 0.0 }
 0xf93   :  { %v4385_v19 = vadd.f32 %v4384_v58, %v4383_v8 }
 0xf94   :  { %v4339_v61 = vsel %vm965_vm10, %v4302_v34, 0.0 }
 0xf95   :  { %v4340_v10 = vadd.f32 %v4339_v61, %v4338_v60  ;;  %v4387_v37 = vadd.f32 %v4386_v56, %v4385_v19 }
 0xf97   :  { %v4341_v17 = vrot.slane %v4340_v10, 4  ;;  %v4389_v52 = vadd.f32 %v4388_v12, %v4387_v37 }
 0xf99   :  { %v4342_v63 = vadd.f32 %v4341_v17, %v4340_v10 }
 0xf9b   :  { %v4343_v20 = vrot.slane %v4342_v63, 2 }
 0xf9d   :  { %v4344_v59 = vadd.f32 %v4343_v20, %v4342_v63 }
 0xf9f   :  { %v4345_v50 = vrot.slane %v4344_v59, 1 }
 0xfa1   :  { %v4346_v24 = vadd.f32 %v4345_v50, %v4344_v59 }
 0xfa3   :  { %v4348_v49 = vmul.f32 0.015625, %v4346_v24 }
 0xfa5   :  { %v8441_v16 = vsub.f32 %v8380_v40, %v4348_v49  ;;  %v8444_v38 = vsub.f32 %v8377_v62, %v4348_v49  ;;  %v8447_v43 = vsub.f32 %v8382_v1, %v4348_v49  ;;  %v8450_v15 = vsub.f32 %v8387_v41, %v4348_v49 }
 0xfa6   :  { %v4361_v2 = vsub.f32 %v4291_v46, %v4348_v49  ;;  %v8459_v62 = vsub.f32 %v8368_v0, %v4347_v21  ;;  %v4371_v1 = vmul.f32 %v8435_v4, %v8435_v4  ;;  %v4390_v41 = vsel %vm965_vm10, %v4370_v28, 0.0 }
 0xfa7   :  { %v4373_v42 = vmul.f32 %v8441_v16, %v8441_v16  ;;  %v4374_v18 = vmul.f32 %v8444_v38, %v8444_v38  ;;  %v4375_v40 = vmul.f32 %v8447_v43, %v8447_v43  ;;  %v4362_v53 = vsub.f32 %v4294_v36, %v4348_v49 }
 0xfa8   :  { %v4376_v46 = vmul.f32 %v8450_v15, %v8450_v15  ;;  %v4391_v22 = vadd.f32 %v4390_v41, %v4389_v52  ;;  %v4363_v13 = vsub.f32 %v4299_v9, %v4348_v49  ;;  %v4377_v23 = vmul.f32 %v4361_v2, %v4361_v2 }
 0xfa9   :  { %v4402_v51 = vsel %vm965_vm10, %v4373_v42, 0.0  ;;  %v4403_v54 = vsel %vm965_vm10, %v4374_v18, 0.0  ;;  %v4405_v0 = vsel %vm965_vm10, %v4375_v40, 0.0  ;;  %v4372_v47 = vmul.f32 %v8459_v62, %v8459_v62 }
 0xfaa   :  { %v4404_v45 = vadd.f32 %v4403_v54, %v4402_v51  ;;  %v4364_v48 = vsub.f32 %v4302_v34, %v4348_v49  ;;  %v4378_v31 = vmul.f32 %v4362_v53, %v4362_v53  ;;  %v4407_v36 = vsel %vm965_vm10, %v4376_v46, 0.0 }
 0xfab   :  { %v4392_v60 = vsel %vm965_vm10, %v4371_v1, 0.0  ;;  %v4379_v61 = vmul.f32 %v4363_v13, %v4363_v13  ;;  %v4409_v10 = vsel %vm965_vm10, %v4377_v23, 0.0  ;;  %v4394_v35 = vsel %vm965_vm10, %v4372_v47, 0.0  ;;  %v8759_v47 = vld [vmem:[#allocation25_spill] sm:$0xff] }
 0xfac   :  { %v4406_v21 = vadd.f32 %v4405_v0, %v4404_v45  ;;  %v4393_v6 = vadd.f32 %v4392_v60, %v4391_v22  ;;  %v4380_v9 = vmul.f32 %v4364_v48, %v4364_v48  ;;  %v4411_v3 = vsel %vm965_vm10, %v4378_v31, 0.0  ;;  %v8761_v31 = vld [vmem:[#allocation23_spill] sm:$0xff]  ;;  %v8763_v60 = vld [vmem:[#allocation21_spill] sm:$0xff] }
 0xfad   :  { %v4413_v34 = vsel %vm965_vm10, %v4379_v61, 0.0 }
 0xfae   :  { %v4408_v11 = vadd.f32 %v4407_v36, %v4406_v21  ;;  %v4395_v14 = vadd.f32 %v4394_v35, %v4393_v6  ;;  %v4415_v20 = vsel %vm965_vm10, %v4380_v9, 0.0  ;;  %v8762_v36 = vld [vmem:[#allocation24_spill] sm:$0xff] }
 0xfb0   :  { %v4410_v17 = vadd.f32 %v4409_v10, %v4408_v11  ;;  %v4396_v44 = vrot.slane %v4395_v14, 4  ;;  %v8764_v11 = vld [vmem:[#allocation22_spill] sm:$0xff] }
 0xfb2   :  { %v4412_v63 = vadd.f32 %v4411_v3, %v4410_v17  ;;  %v4397_v50 = vadd.f32 %v4396_v44, %v4395_v14 }
 0xfb4   :  { %v4414_v8 = vadd.f32 %v4413_v34, %v4412_v63  ;;  %v4398_v56 = vrot.slane %v4397_v50, 2 }
 0xfb6   :  { %v4416_v59 = vadd.f32 %v4415_v20, %v4414_v8  ;;  %v4399_v28 = vadd.f32 %v4398_v56, %v4397_v50 }
 0xfb8   :  { %v4417_v58 = vrot.slane %v4416_v59, 4  ;;  %v4400_v42 = vrot.slane %v4399_v28, 1 }
 0xfba   :  { %v4418_v19 = vadd.f32 %v4417_v58, %v4416_v59  ;;  %v4401_v18 = vadd.f32 %v4400_v42, %v4399_v28 }
 0xfbc   :  { %v4419_v27 = vrot.slane %v4418_v19, 2  ;;  %v4423_v40 = vmul.f32 0.015625, %v4401_v18 }
 0xfbe   :  { %v4420_v24 = vadd.f32 %v4419_v27, %v4418_v19  ;;  %v4425_v1 = vadd.f32 1e-08, %v4423_v40 }
 0xfc0   :  { %v4421_v37 = vrot.slane %v4420_v24, 1 }
 0xfc2   :  { %v4422_v49 = vadd.f32 %v4421_v37, %v4420_v24 }
 0xfc4   :  { %v4424_v12 = vmul.f32 0.015625, %v4422_v49 }
 0xfc6   :  { %v4426_v52 = vadd.f32 1e-08, %v4424_v12 }
 0xfc8   :  { %6142 = vrsqrt.f32 %v4426_v52 }
 0xfc9   :  { %6144 = vrsqrt.f32 %v4425_v1 }
 0xfd5   :  { %v6143_v41 = vpop.eup %6142 }
 0xfd6   :  { %v4444_v46 = vmul.f32 %v6143_v41, %v4364_v48  ;;  %v4443_v51 = vmul.f32 %v6143_v41, %v4363_v13  ;;  %v4442_v54 = vmul.f32 %v6143_v41, %v4362_v53  ;;  %v4441_v45 = vmul.f32 %v6143_v41, %v4361_v2  ;;  %v6145_v21 = vpop.eup %6144  ;;  %v8760_v48 = vld [vmem:[#allocation26_spill] sm:$0xff] }
 0xfd7   :  { %v4440_v22 = vmul.f32 %v6143_v41, %v8450_v15  ;;  %v4439_v23 = vmul.f32 %v6143_v41, %v8447_v43  ;;  %v4438_v13 = vmul.f32 %v6143_v41, %v8444_v38  ;;  %v4437_v0 = vmul.f32 %v6143_v41, %v8441_v16 }
 0xfd8   :  { %4491 = vrot.lane.b32.xlu0 %v4444_v46, %s6276_s1  ;;  %4489 = vrot.lane.b32.xlu1 %v4443_v51, %s6276_s1  ;;  %v4436_v2 = vmul.f32 %v6145_v21, %v8459_v62  ;;  %v4435_v53 = vmul.f32 %v6145_v21, %v8435_v4  ;;  %v4434_v43 = vmul.f32 %v6145_v21, %v8429_v57  ;;  %v8758_v57 = vld [vmem:[#allocation28_spill] sm:$0xff] }
 0xfd9   :  { %v4433_v15 = vmul.f32 %v6145_v21, %v8423_v32  ;;  %v4432_v16 = vmul.f32 %v6145_v21, %v8418_v25  ;;  %v4431_v38 = vmul.f32 %v6145_v21, %v8413_v7  ;;  %v4430_v4 = vmul.f32 %v6145_v21, %v8403_v26  ;;  %v8751_v7 = vld [vmem:[#allocation33_spill] sm:$0xff]  ;;  %v8752_v25 = vld [vmem:[#allocation34_spill] sm:$0xff]  ;;  %v8753_v26 = vld [vmem:[#allocation31_spill] sm:$0xff] }
 0xfda   :  { %v4429_v62 = vmul.f32 %v6145_v21, %v8400_v55  ;;  %v8754_v55 = vld [vmem:[#allocation32_spill] sm:$0xff]  ;;  %v8755_v32 = vld [vmem:[#allocation29_spill] sm:$0xff] }
 0xfdc   :  { %4487 = vrot.lane.b32.xlu0 %v4442_v54, %s6276_s1  ;;  %4485 = vrot.lane.b32.xlu1 %v4441_v45, %s6276_s1 }
 0xfe0   :  { %4483 = vrot.lane.b32.xlu0 %v4440_v22, %s6276_s1  ;;  %4481 = vrot.lane.b32.xlu1 %v4439_v23, %s6276_s1 }
 0xfe4   :  { %4479 = vrot.lane.b32.xlu0 %v4438_v13, %s6276_s1  ;;  %4477 = vrot.lane.b32.xlu1 %v4437_v0, %s6276_s1  ;;  %v8765_v13 = vld [vmem:[#allocation20_spill] sm:$0xff] }
 0xfe8   :  { %4475 = vrot.lane.b32.xlu0 %v4436_v2, %s6276_s1  ;;  %4473 = vrot.lane.b32.xlu1 %v4435_v53, %s6276_s1 }
 0xfec   :  { %4471 = vrot.lane.b32.xlu0 %v4434_v43, %s6276_s1  ;;  %4469 = vrot.lane.b32.xlu1 %v4433_v15, %s6276_s1  ;;  %v8766_v43 = vld [vmem:[#allocation19_spill] sm:$0xff] }
 0xff0   :  { %4467 = vrot.lane.b32.xlu0 %v4432_v16, %s6276_s1  ;;  %4465 = vrot.lane.b32.xlu1 %v4431_v38, %s6276_s1 }
 0xff4   :  { %4463 = vrot.lane.b32.xlu0 %v4430_v4, %s6276_s1  ;;  %4461 = vrot.lane.b32.xlu1 %v4429_v62, %s6276_s1 }
 0xff8   :  { %4700 = vrot.lane.b32.xlu1 %v7128_v5, %s6287_s21  ;;  %v8756_v5 = vld [vmem:[#allocation30_spill] sm:$0xff] }
 0xffc   :  { %4698 = vrot.lane.b32.xlu1 %v7147_v33, %s6287_s21  ;;  %v8757_v33 = vld [vmem:[#allocation27_spill] sm:$0xff] }
0x1000   :  { %4696 = vrot.lane.b32.xlu1 %v8751_v7, %s6287_s21 }
0x1004   :  { %4694 = vrot.lane.b32.xlu1 %v8752_v25, %s6287_s21 }
0x1008   :  { %4692 = vrot.lane.b32.xlu1 %v8753_v26, %s6287_s21 }
0x100c   :  { %4690 = vrot.lane.b32.xlu1 %v8754_v55, %s6287_s21 }
0x1010   :  { %4688 = vrot.lane.b32.xlu1 %v8755_v32, %s6287_s21 }
0x1014   :  { %4686 = vrot.lane.b32.xlu1 %v8756_v5, %s6287_s21 }
0x1018   :  { %4684 = vrot.lane.b32.xlu1 %v8757_v33, %s6287_s21 }
0x101c   :  { %4682 = vrot.lane.b32.xlu1 %v8758_v57, %s6287_s21 }
0x1020   :  { %4680 = vrot.lane.b32.xlu1 %v8759_v47, %s6287_s21 }
0x1024   :  { %4678 = vrot.lane.b32.xlu1 %v8760_v48, %s6287_s21 }
0x1028   :  { %4676 = vrot.lane.b32.xlu1 %v8761_v31, %s6287_s21 }
0x102c   :  { %4674 = vrot.lane.b32.xlu1 %v8762_v36, %s6287_s21 }
0x1030   :  { %4672 = vrot.lane.b32.xlu1 %v8763_v60, %s6287_s21 }
0x1034   :  { %4670 = vrot.lane.b32.xlu1 %v8764_v11, %s6287_s21 }
0x104a   :  { %v4492_v6 = vpop.permute.xlu0 %4491  ;;  %v4490_v61 = vpop.permute.xlu1 %4489 }
0x104b   :  { %v4524_v10 = vmul.f32 %v4492_v6, %v7397_v39  ;;  %v4523_v17 = vmul.f32 %v4490_v61, %v7397_v39 }
0x104d   :  { %v4540_v9 = vadd.f32 %v4524_v10, %v7927_v29  ;;  %v4539_v3 = vadd.f32 %v4523_v17, %v7927_v29 }
0x104e   :  { %v4488_v35 = vpop.permute.xlu0 %4487  ;;  %v4486_v63 = vpop.permute.xlu1 %4485 }
0x104f   :  { %v4522_v14 = vmul.f32 %v4488_v35, %v7397_v39  ;;  %vm4556_vm1 = vcmp.ge.f32.partialorder %v4540_v9, 0.0  ;;  %v4572_v34 = vmul.f32 0.2, %v4540_v9  ;;  %v4521_v20 = vmul.f32 %v4486_v63, %v7397_v39 }
0x1050   :  { %v4571_v44 = vmul.f32 0.2, %v4539_v3  ;;  %vm4555_vm3 = vcmp.ge.f32.partialorder %v4539_v3, 0.0 }
0x1051   :  { %v4538_v8 = vadd.f32 %v4522_v14, %v7927_v29  ;;  %v4588_v59 = vsel %vm4556_vm1, %v4540_v9, %v4572_v34  ;;  %v4537_v19 = vadd.f32 %v4521_v20, %v7927_v29 }
0x1052   :  { %v4484_v58 = vpop.permute.xlu0 %4483  ;;  %4636 = vrot.lane.b32.xlu0 %v4588_v59, %s6276_s1  ;;  %v4587_v27 = vsel %vm4555_vm3, %v4539_v3, %v4571_v44  ;;  %v4482_v56 = vpop.permute.xlu1 %4481  ;;  %v4746_v44 = vld [vmem:[%s8683_s18] sm:$0x7] }
0x1053   :  { %v4520_v50 = vmul.f32 %v4484_v58, %v7397_v39  ;;  %v4570_v24 = vmul.f32 0.2, %v4538_v8  ;;  %vm4554_vm9 = vcmp.ge.f32.partialorder %v4538_v8, 0.0  ;;  %v4519_v49 = vmul.f32 %v4482_v56, %v7397_v39 }
0x1054   :  { %v4569_v12 = vmul.f32 0.2, %v4537_v19  ;;  %vm4553_vm11 = vcmp.ge.f32.partialorder %v4537_v19, 0.0  ;;  %v4735_v58 = vstv %s8767_s24  ;;  %v4739_v56 = vstv %s4737_s3 }
0x1055   :  { %v4536_v37 = vadd.f32 %v4520_v50, %v7927_v29  ;;  %v4586_v28 = vsel %vm4554_vm9, %v4538_v8, %v4570_v24  ;;  %v4535_v42 = vadd.f32 %v4519_v49, %v7927_v29  ;;  %v4747_v24 = vmul.f32 %v4746_v44, %v4735_v58 }
0x1056   :  { %4634 = vrot.lane.b32.xlu0 %v4587_v27, %s6276_s1  ;;  %v4480_v52 = vpop.permute.xlu0 %4479  ;;  %v4585_v40 = vsel %vm4553_vm11, %v4537_v19, %v4569_v12  ;;  %v4478_v41 = vpop.permute.xlu1 %4477 }
0x1057   :  { %v4518_v18 = vmul.f32 %v4480_v52, %v7397_v39  ;;  %v4568_v1 = vmul.f32 0.2, %v4536_v37  ;;  %vm4552_vm5 = vcmp.ge.f32.partialorder %v4536_v37, 0.0  ;;  %v4517_v51 = vmul.f32 %v4478_v41, %v7397_v39 }
0x1058   :  { %v4567_v45 = vmul.f32 0.2, %v4535_v42  ;;  %vm4551_vm6 = vcmp.ge.f32.partialorder %v4535_v42, 0.0 }
0x1059   :  { %v4534_v46 = vadd.f32 %v4518_v18, %v7927_v29  ;;  %v4584_v54 = vsel %vm4552_vm5, %v4536_v37, %v4568_v1  ;;  %v4533_v23 = vadd.f32 %v4517_v51, %v7927_v29  ;;  %v4748_v37 = vld [vmem:[%s8681_s16] sm:$0x7] }
0x105a   :  { %4632 = vrot.lane.b32.xlu0 %v4586_v28, %s6276_s1  ;;  %v4476_v22 = vpop.permute.xlu0 %4475  ;;  %v4583_v21 = vsel %vm4551_vm6, %v4535_v42, %v4567_v45  ;;  %v4474_v53 = vpop.permute.xlu1 %4473  ;;  %v4749_v49 = vmul.f32 %v4748_v37, %v4739_v56  ;;  %v4738_v42 = vld [vmem:[%s8680_s15] sm:$0x7] }
0x105b   :  { %v4516_v0 = vmul.f32 %v4476_v22, %v8765_v13  ;;  %v4566_v2 = vmul.f32 0.2, %v4534_v46  ;;  %vm4550_vm7 = vcmp.ge.f32.partialorder %v4534_v46, 0.0  ;;  %v4515_v39 = vmul.f32 %v4474_v53, %v8765_v13 }
0x105c   :  { %v4565_v38 = vmul.f32 0.2, %v4533_v23  ;;  %vm4549_vm8 = vcmp.ge.f32.partialorder %v4533_v23, 0.0  ;;  %v4750_v52 = vadd.f32 %v4749_v49, %v4747_v24 }
0x105d   :  { %v4532_v15 = vadd.f32 %v4516_v0, %v8766_v43  ;;  %v4582_v16 = vsel %vm4550_vm7, %v4534_v46, %v4566_v2  ;;  %v4531_v29 = vadd.f32 %v4515_v39, %v8766_v43 }
0x105e   :  { %4630 = vrot.lane.b32.xlu0 %v4585_v40, %s6276_s1  ;;  %v4472_v4 = vpop.permute.xlu0 %4471  ;;  %v4581_v7 = vsel %vm4549_vm8, %v4533_v23, %v4565_v38  ;;  %v4470_v26 = vpop.permute.xlu1 %4469  ;;  %4753 = vperm.xlu1 %6030, %v4750_v52   ;;  %v4740_v40 = vmul.f32 %v4739_v56, %v4738_v42 }
0x105f   :  { %v4514_v62 = vmul.f32 %v4472_v4, %v8765_v13  ;;  %v4564_v25 = vmul.f32 0.2, %v4532_v15  ;;  %vm4548_vm12 = vcmp.ge.f32.partialorder %v4532_v15, 0.0  ;;  %v4513_v32 = vmul.f32 %v4470_v26, %v8765_v13 }
0x1060   :  { %v4563_v33 = vmul.f32 0.2, %v4531_v29  ;;  %vm4547_vm13 = vcmp.ge.f32.partialorder %v4531_v29, 0.0 }
0x1061   :  { %v4530_v55 = vadd.f32 %v4514_v62, %v8766_v43  ;;  %v4580_v5 = vsel %vm4548_vm12, %v4532_v15, %v4564_v25  ;;  %v4529_v47 = vadd.f32 %v4513_v32, %v8766_v43 }
0x1062   :  { %4628 = vrot.lane.b32.xlu0 %v4584_v54, %s6276_s1  ;;  %v4468_v57 = vpop.permute.xlu0 %4467  ;;  %v4579_v31 = vsel %vm4547_vm13, %v4531_v29, %v4563_v33  ;;  %v4466_v60 = vpop.permute.xlu1 %4465 }
0x1063   :  { %v4512_v48 = vmul.f32 %v4468_v57, %v8765_v13  ;;  %v4562_v36 = vmul.f32 0.2, %v4530_v55  ;;  %vm4546_vm14 = vcmp.ge.f32.partialorder %v4530_v55, 0.0  ;;  %v4511_v6 = vmul.f32 %v4466_v60, %v8765_v13 }
0x1064   :  { %v4561_v10 = vmul.f32 0.2, %v4529_v47  ;;  %vm4545_vm15 = vcmp.ge.f32.partialorder %v4529_v47, 0.0 }
0x1065   :  { %v4528_v11 = vadd.f32 %v4512_v48, %v8766_v43  ;;  %v4578_v61 = vsel %vm4546_vm14, %v4530_v55, %v4562_v36  ;;  %v4527_v9 = vadd.f32 %v4511_v6, %v8766_v43 }
0x1066   :  { %4626 = vrot.lane.b32.xlu0 %v4583_v21, %s6276_s1  ;;  %v4464_v17 = vpop.permute.xlu0 %4463  ;;  %v4577_v35 = vsel %vm4545_vm15, %v4529_v47, %v4561_v10  ;;  %v4462_v14 = vpop.permute.xlu1 %4461 }
0x1067   :  { %v4510_v3 = vmul.f32 %v4464_v17, %v8765_v13  ;;  %v4560_v63 = vmul.f32 0.2, %v4528_v11  ;;  %vm4544_vm0 = vcmp.ge.f32.partialorder %v4528_v11, 0.0  ;;  %v4509_v8 = vmul.f32 %v4462_v14, %v8765_v13 }
0x1068   :  { %v4559_v59 = vmul.f32 0.2, %v4527_v9  ;;  %vm4543_vm4 = vcmp.ge.f32.partialorder %v4527_v9, 0.0 }
0x1069   :  { %v4526_v34 = vadd.f32 %v4510_v3, %v8766_v43  ;;  %v4576_v20 = vsel %vm4544_vm0, %v4528_v11, %v4560_v63  ;;  %v4525_v19 = vadd.f32 %v4509_v8, %v8766_v43  ;;  %v4734_v8 = vld [vmem:[%s8682_s17] sm:$0x7] }
0x106a   :  { %4624 = vrot.lane.b32.xlu0 %v4582_v16, %s6276_s1  ;;  %v4575_v50 = vsel %vm4543_vm4, %v4527_v9, %v4559_v59  ;;  %v4701_v1 = vpop.permute.xlu1 %4700 }
0x106b   :  { %v4558_v27 = vmul.f32 0.2, %v4526_v34  ;;  %vm4542_vm1 = vcmp.ge.f32.partialorder %v4526_v34, 0.0  ;;  %v4557_v12 = vmul.f32 0.2, %v4525_v19  ;;  %vm4541_vm3 = vcmp.ge.f32.partialorder %v4525_v19, 0.0 }
0x106d   :  { %v4574_v28 = vsel %vm4542_vm1, %v4526_v34, %v4558_v27  ;;  %v4573_v18 = vsel %vm4541_vm3, %v4525_v19, %v4557_v12  ;;  %v4736_v19 = vmul.f32 %v4735_v58, %v4734_v8 }
0x106e   :  { %4622 = vrot.lane.b32.xlu0 %v4581_v7, %s6276_s1  ;;  %v4699_v41 = vpop.permute.xlu1 %4698 }
0x1072   :  { %4620 = vrot.lane.b32.xlu0 %v4580_v5, %s6276_s1  ;;  %v4697_v46 = vpop.permute.xlu1 %4696 }
0x1076   :  { %4618 = vrot.lane.b32.xlu0 %v4579_v31, %s6276_s1  ;;  %v4695_v51 = vpop.permute.xlu1 %4694 }
0x107a   :  { %4616 = vrot.lane.b32.xlu0 %v4578_v61, %s6276_s1  ;;  %v4693_v54 = vpop.permute.xlu1 %4692 }
0x107e   :  { %4614 = vrot.lane.b32.xlu0 %v4577_v35, %s6276_s1  ;;  %v4691_v45 = vpop.permute.xlu1 %4690 }
0x1082   :  { %4612 = vrot.lane.b32.xlu0 %v4576_v20, %s6276_s1  ;;  %v4689_v21 = vpop.permute.xlu1 %4688 }
0x1086   :  { %4610 = vrot.lane.b32.xlu0 %v4575_v50, %s6276_s1  ;;  %v4687_v43 = vpop.permute.xlu1 %4686 }
0x108a   :  { %4608 = vrot.lane.b32.xlu0 %v4574_v28, %s6276_s1  ;;  %v4685_v4 = vpop.permute.xlu1 %4684 }
0x108e   :  { %4606 = vrot.lane.b32.xlu0 %v4573_v18, %s6276_s1  ;;  %v4683_v7 = vpop.permute.xlu1 %4682 }
0x1092   :  { %4742 = vrot.lane.b32.xlu0 %v4740_v40, %s6287_s21  ;;  %v4681_v5 = vpop.permute.xlu1 %4680 }
0x1096   :  { %v4679_v47 = vpop.permute.xlu1 %4678 }
0x109a   :  { %v4677_v11 = vpop.permute.xlu1 %4676 }
0x109e   :  { %v4675_v10 = vpop.permute.xlu1 %4674 }
0x10a2   :  { %v4673_v63 = vpop.permute.xlu1 %4672 }
0x10a6   :  { %v4671_v20 = vpop.permute.xlu1 %4670 }
0x10c4   :  { %v4637_v22 = vpop.permute.xlu0 %4636 }
0x10c5   :  { %v4733_v23 = vsel %vm965_vm10, %v4637_v22, %v4701_v1 }
0x10c6   :  { %5500 = vmatpush3.xpose.msk.msra.mxu1 %vm197_vm2, %v4733_v23 }
0x10c7   :  { %5501 = vmatprep.subr.mxu1 %v8729_v30 }
0x10c8   :  { %v4635_v13 = vpop.permute.xlu0 %4634 }
0x10c9   :  { %v4732_v0 = vsel %vm965_vm10, %v4635_v13, %v4699_v41 }
0x10ca   :  { %5502 = vmatpush3.xpose.msk.msra.mxu1 %vm197_vm2, %v4732_v0 }
0x10cb   :  { %5503 = vmatprep.subr.mxu1 %v8729_v30 }
0x10cc   :  { %v4633_v2 = vpop.permute.xlu0 %4632 }
0x10cd   :  { %v4731_v53 = vsel %vm965_vm10, %v4633_v2, %v4697_v46 }
0x10ce   :  { %5504 = vmatpush3.xpose.msk.msra.mxu1 %vm197_vm2, %v4731_v53 }
0x10cf   :  { %5505 = vmatprep.subr.mxu1 %v8729_v30 }
0x10d0   :  { %v4631_v15 = vpop.permute.xlu0 %4630 }
0x10d1   :  { %v4730_v39 = vsel %vm965_vm10, %v4631_v15, %v4695_v51 }
0x10d2   :  { %5506 = vmatpush3.xpose.msk.msra.mxu1 %vm197_vm2, %v4730_v39 }
0x10d3   :  { %5507 = vmatprep.subr.mxu1 %v8729_v30 }
0x10d4   :  { %v4629_v16 = vpop.permute.xlu0 %4628 }
0x10d5   :  { %v4729_v38 = vsel %vm965_vm10, %v4629_v16, %v4693_v54 }
0x10d6   :  { %5508 = vmatpush3.xpose.msk.msra.mxu1 %vm197_vm2, %v4729_v38 }
0x10d7   :  { %5509 = vmatprep.subr.mxu1 %v8729_v30 }
0x10d8   :  { %v4627_v29 = vpop.permute.xlu0 %4626 }
0x10d9   :  { %v4728_v62 = vsel %vm965_vm10, %v4627_v29, %v4691_v45  ;;  %v4754_v24 = vpop.permute.xlu1 %4753 }
0x10da   :  { %5510 = vmatpush3.xpose.msk.msra.mxu1 %vm197_vm2, %v4728_v62 }
0x10db   :  { %5511 = vmatprep.subr.mxu1 %v8729_v30 }
0x10dc   :  { %v4625_v25 = vpop.permute.xlu0 %4624 }
0x10dd   :  { %v4727_v26 = vsel %vm965_vm10, %v4625_v25, %v4689_v21 }
0x10de   :  { %5512 = vmatpush3.xpose.msk.msra.mxu1 %vm197_vm2, %v4727_v26 }
0x10df   :  { %5513 = vmatprep.subr.mxu1 %v8729_v30 }
0x10e0   :  { %v4623_v55 = vpop.permute.xlu0 %4622 }
0x10e1   :  { %v4726_v32 = vsel %vm965_vm10, %v4623_v55, %v4687_v43 }
0x10e2   :  { %5514 = vmatpush3.xpose.msk.msra.mxu1 %vm197_vm2, %v4726_v32 }
0x10e3   :  { %5515 = vmatprep.subr.mxu1 %v8729_v30 }
0x10e4   :  { %v4621_v33 = vpop.permute.xlu0 %4620 }
0x10e5   :  { %v4725_v57 = vsel %vm965_vm10, %v4621_v33, %v4685_v4 }
0x10e6   :  { %5516 = vmatpush3.xpose.msk.msra.mxu1 %vm197_vm2, %v4725_v57 }
0x10e7   :  { %5517 = vmatprep.subr.mxu1 %v8729_v30 }
0x10e8   :  { %v4619_v48 = vpop.permute.xlu0 %4618 }
0x10e9   :  { %v4724_v31 = vsel %vm965_vm10, %v4619_v48, %v4683_v7 }
0x10ea   :  { %5518 = vmatpush3.xpose.msk.msra.mxu1 %vm197_vm2, %v4724_v31 }
0x10eb   :  { %5519 = vmatprep.subr.mxu1 %v8729_v30 }
0x10ec   :  { %v4617_v36 = vpop.permute.xlu0 %4616 }
0x10ed   :  { %v4723_v60 = vsel %vm965_vm10, %v4617_v36, %v4681_v5 }
0x10ee   :  { %5520 = vmatpush3.xpose.msk.msra.mxu1 %vm197_vm2, %v4723_v60 }
0x10ef   :  { %5521 = vmatprep.subr.mxu1 %v8729_v30 }
0x10f0   :  { %v4615_v6 = vpop.permute.xlu0 %4614 }
0x10f1   :  { %v4722_v61 = vsel %vm965_vm10, %v4615_v6, %v4679_v47 }
0x10f2   :  { %5522 = vmatpush3.xpose.msk.msra.mxu1 %vm197_vm2, %v4722_v61 }
0x10f3   :  { %5523 = vmatprep.subr.mxu1 %v8729_v30 }
0x10f4   :  { %v4613_v17 = vpop.permute.xlu0 %4612 }
0x10f5   :  { %v4721_v9 = vsel %vm965_vm10, %v4613_v17, %v4677_v11 }
0x10f6   :  { %5524 = vmatpush3.xpose.msk.msra.mxu1 %vm197_vm2, %v4721_v9 }
0x10f7   :  { %5525 = vmatprep.subr.mxu1 %v8729_v30 }
0x10f8   :  { %v4611_v3 = vpop.permute.xlu0 %4610 }
0x10f9   :  { %v4720_v35 = vsel %vm965_vm10, %v4611_v3, %v4675_v10 }
0x10fa   :  { %5526 = vmatpush3.xpose.msk.msra.mxu1 %vm197_vm2, %v4720_v35 }
0x10fb   :  { %5527 = vmatprep.subr.mxu1 %v8729_v30 }
0x10fc   :  { %v4609_v14 = vpop.permute.xlu0 %4608 }
0x10fd   :  { %v4719_v34 = vsel %vm965_vm10, %v4609_v14, %v4673_v63 }
0x10fe   :  { %5528 = vmatpush3.xpose.msk.msra.mxu1 %vm197_vm2, %v4719_v34 }
0x10ff   :  { %5529 = vmatprep.subr.mxu1 %v8729_v30 }
0x1100   :  { %v4607_v59 = vpop.permute.xlu0 %4606 }
0x1101   :  { %v4718_v44 = vsel %vm965_vm10, %v4607_v59, %v4671_v20 }
0x1102   :  { %5530 = vmatpush3.xpose.msk.msra.mxu1 %vm197_vm2, %v4718_v44 }
0x1104   :  { %v4743_v50 = vpop.permute.xlu0 %4742 }
0x1105   :  { %v4745_v27 = vsel %vm965_vm10, %v4736_v19, %v4743_v50 }
0x1106   :  { %5532 = vmatmul.mubr.msk.f32.vlgmr.msra.gmra.mxu1 %vm197_vm2, %v4745_v27 }
0x11c6   :  { %v4873_v56 = vpop.f32.mrf.mxu1 }
0x11c7   :  { %v4874_v37 = vadd.f32 %v4873_v56, %v4754_v24 }
0x11c8   :  { %v5533_v30 = vpop.f32.mrf.mxu1 }
0x11c9   :  { %4877 = vst [vmem:[%s8684_s19] sm:$0x7] %v4874_v37 }
0x11ca   :  { %4882 = vsyncpa [#allocation5], 1 }
0x11cb   :  { %4883 = vsyncpa [#allocation7], 1 }
0x11cc   :  { %4884 = vsyncpa [#allocation10], 1 }
0x11cd   :  { %4885 = vsyncpa [#allocation13], 1 }

</bundles_post_ra>
